<compile_context>
chip_gen: v5e
topology: v5e:2x2
jax: 0.10.0
libtpu: 0.0.40
codegen_flags: <defaults>
</compile_context>

<pallas_src>
import inspect
import math

import jax
import jax.numpy as jnp
from jax import lax
from jax.experimental import pallas as pl
from jax.experimental.pallas import tpu as pltpu


_BCE_EPS = 1e-7
# clip(sigmoid(z), eps, 1-eps) == sigmoid(clip(z, -L, L)) with L below, so the
# logits-form BCE on clamped logits matches the reference's clipped BCE.
_LOGIT_CLIP = math.log((1.0 - _BCE_EPS) / _BCE_EPS)

try:
    _FORI_UNROLL_OK = "unroll" in inspect.signature(lax.fori_loop).parameters
except Exception:  # pragma: no cover
    _FORI_UNROLL_OK = False


def _div_mod(n, d):
    """floor-div / mod of integer-valued f32 `n` by python int `d` (one fixup)."""
    d_f = float(d)
    q = jnp.floor(n * (1.0 / d_f))
    r = n - q * d_f
    q = q + jnp.where(r >= d_f, 1.0, 0.0) - jnp.where(r < 0.0, 1.0, 0.0)
    r = n - q * d_f
    return q, r


def _bce_with_logits(z, t):
    """-t*log(p) - (1-t)*log(1-p) with p = sigmoid(z), for pre-clamped z."""
    return jnp.maximum(z, 0.0) + jnp.log(1.0 + jnp.exp(-jnp.abs(z))) - t * z


def _tpu_config():
    """Returns (num_core_blocks, core_axis_semantics, input_budget_B, vmem_limit_B)."""
    try:
        kind = jax.devices()[0].device_kind.lower()
    except Exception:  # pragma: no cover
        kind = ""
    if "v7" in kind or kind.startswith("tpu7"):
        # v7x: 2 TCs/chip, 64 MiB VMEM per TC -> explicit core split, small tiles.
        return 2, getattr(pltpu, "CORE_PARALLEL", "parallel"), 14 << 20, 32 << 20
    if "v5" in kind or "v6" in kind:
        # v5e/v5p/v6e: 128 MiB physical VMEM -> big tiles, raised scoped limit.
        return 2, "parallel", 40 << 20, 80 << 20
    # Unknown / older chips: conservative (leave compiler-default VMEM limit).
    return 2, "parallel", 8 << 20, None


def _make_kernel(*, num_classes, label_smoothing, in_w, in_h, na, n_valid,
                 tile_rows, chunk_rows, tiles_per_core,
                 anchor_w_consts, anchor_h_consts):
    nc = num_classes
    ls = float(label_smoothing)
    hw = in_h * in_w
    zclip = _LOGIT_CLIP
    num_chunks = tile_rows // chunk_rows  # always even (tile_rows % 2*chunk == 0)

    def kernel(pred_ref, ytrue_ref, n_ref, loc_ref, cls_ref, conf_ref):
        core = pl.program_id(0)
        step = pl.program_id(1)

        @pl.when(step == 0)
        def _():
            n_ref[...] = jnp.zeros_like(n_ref)
            loc_ref[...] = jnp.zeros_like(loc_ref)
            cls_ref[...] = jnp.zeros_like(cls_ref)
            conf_ref[...] = jnp.zeros_like(conf_ref)

        block_row0 = (core * tiles_per_core + step) * tile_rows
        row_iota = lax.broadcasted_iota(jnp.int32, (chunk_rows, 128), 0)
        lane_iota = lax.broadcasted_iota(jnp.int32, (chunk_rows, 128), 1)

        # TODO(synk): gate the GIoU + class-BCE block behind a data-dependent
        # pl.when("chunk has positives") once that branch shape is validated;
        # kept ungated here so the kernel is guaranteed to lower cleanly.
        def chunk_body(c, carry):
            n_acc, loc_acc, cls_acc, conf_acc = carry
            r0 = pl.multiple_of(c * chunk_rows, chunk_rows)
            sl = pl.ds(r0, chunk_rows)

            # flat element index of every lane (int32 exact; N < 2**24 asserted)
            idx_i = (block_row0 + r0 + row_iota) * 128 + lane_iota
            valid = idx_i < n_valid
            idx = idx_i.astype(jnp.float32)

            # hierarchical div/mod: quotient of the big divide is tiny (b*na+a),
            # so one fix-up round is exact; remaining div/mods act on small ints.
            q_hw, r_hw = _div_mod(idx, hw)      # q_hw = b*na + anchor
            _, gx = _div_mod(r_hw, in_w)        # grid-x column
            _, a_id = _div_mod(q_hw, na)        # anchor id in [0, na)
            aw = jnp.full_like(idx, anchor_w_consts[na - 1])
            ah = jnp.full_like(idx, anchor_h_consts[na - 1])
            for k in range(na - 2, -1, -1):
                selk = a_id < (k + 0.5)
                aw = jnp.where(selk, anchor_w_consts[k], aw)
                ah = jnp.where(selk, anchor_h_consts[k], ah)

            tconf = ytrue_ref[4, sl, :]
            mask = jnp.logical_and(tconf == 1.0, valid)

            # predicted boxes (reference bug reproduced: y uses grid_x)
            sx = jax.nn.sigmoid(pred_ref[0, sl, :])
            sy = jax.nn.sigmoid(pred_ref[1, sl, :])
            sw = jax.nn.sigmoid(pred_ref[2, sl, :])
            sh = jax.nn.sigmoid(pred_ref[3, sl, :])
            bx = sx * 2.0 - 0.5 + gx
            by = sy * 2.0 - 0.5 + gx
            bw = (sw * 2.0) ** 2 * aw
            bh = (sh * 2.0) ** 2 * ah

            tx = ytrue_ref[0, sl, :]
            ty = ytrue_ref[1, sl, :]
            tw = ytrue_ref[2, sl, :]
            th = ytrue_ref[3, sl, :]

            # GIoU (reference bug reproduced: b2_area = tw * bh)
            b1_min_x = bx - bw * 0.5
            b1_max_x = bx + bw * 0.5
            b1_min_y = by - bh * 0.5
            b1_max_y = by + bh * 0.5
            b2_min_x = tx - tw * 0.5
            b2_max_x = tx + tw * 0.5
            b2_min_y = ty - th * 0.5
            b2_max_y = ty + th * 0.5
            iw = jnp.maximum(jnp.minimum(b1_max_x, b2_max_x) -
                             jnp.maximum(b1_min_x, b2_min_x), 0.0)
            ih = jnp.maximum(jnp.minimum(b1_max_y, b2_max_y) -
                             jnp.maximum(b1_min_y, b2_min_y), 0.0)
            inter = iw * ih
            b1_area = bw * bh
            b2_area = tw * bh
            union = b2_area + b1_area - inter
            iou = inter * pl.reciprocal(union, approx=True)
            gw = jnp.maximum(jnp.maximum(b1_max_x, b2_max_x) -
                             jnp.minimum(b1_min_x, b2_min_x), 0.0)
            gh = jnp.maximum(jnp.maximum(b1_max_y, b2_max_y) -
                             jnp.minimum(b1_min_y, b2_min_y), 0.0)
            g_area = gw * gh
            giou = iou - (g_area - union) * pl.reciprocal(g_area, approx=True)

            # class BCE (logits form == reference clipped-sigmoid BCE)
            cls_sum = jnp.zeros_like(idx)
            for k in range(nc):
                zk = jnp.clip(pred_ref[5 + k, sl, :], -zclip, zclip)
                sm = ytrue_ref[5 + k, sl, :] * (1.0 - ls) + ls / nc
                cls_sum = cls_sum + _bce_with_logits(zk, sm)

            # objectness BCE over every valid element
            tobj = jnp.where(mask, jnp.maximum(giou, 0.0), 0.0)
            zc = jnp.clip(pred_ref[4, sl, :], -zclip, zclip)
            bce_conf = _bce_with_logits(zc, tobj)

            n_acc = n_acc + jnp.where(mask, 1.0, 0.0)
            loc_acc = loc_acc + jnp.where(mask, 1.0 - giou, 0.0)
            cls_acc = cls_acc + jnp.where(mask, cls_sum, 0.0)
            conf_acc = conf_acc + jnp.where(valid, bce_conf, 0.0)
            return n_acc, loc_acc, cls_acc, conf_acc

        zeros = jnp.zeros((chunk_rows, 128), jnp.float32)
        init = (zeros, zeros, zeros, zeros)
        if _FORI_UNROLL_OK:
            accs = lax.fori_loop(0, num_chunks, chunk_body, init, unroll=2)
        else:  # pragma: no cover - very old jax
            accs = lax.fori_loop(0, num_chunks, chunk_body, init)
        n_acc, loc_acc, cls_acc, conf_acc = accs

        # single VMEM read-modify-write of the resident partial sums per step
        n_ref[...] += n_acc
        loc_ref[...] += loc_acc
        cls_ref[...] += cls_acc
        conf_ref[...] += conf_acc

    return kernel


def yolo_loss(l, inp, y_true, anchors, num_classes, input_shape,
              anchors_mask=((6, 7, 8), (3, 4, 5), (0, 1, 2)),
              label_smoothing=0.0):
    """Pallas implementation of YOLOLoss.forward.

    inp:    (bs, 3*(5+num_classes), H, W)  float32  (NCHW, like PyTorch)
    y_true: (bs, 3, H, W, 5+num_classes)   float32
    """
    balance = (0.4, 1.0, 4.0)
    box_ratio = 0.05
    obj_ratio = 1.0 * (input_shape[0] + input_shape[1]) / 640.0 ** 2
    cls_ratio = 0.5 * (num_classes / 80.0)

    bs, _, in_h, in_w = inp.shape
    na = len(anchors_mask[l])
    attrs = 5 + num_classes
    stride_h = input_shape[0] / in_h
    stride_w = input_shape[1] / in_w

    scaled = [(float(a_w) / stride_w, float(a_h) / stride_h)
              for a_w, a_h in anchors]
    sel = [scaled[k] for k in anchors_mask[l]]
    anchor_w_consts = tuple(w for w, _ in sel)
    anchor_h_consts = tuple(h for _, h in sel)

    N = bs * na * in_h * in_w
    assert N < (1 << 24), "f32 index math assumes N < 2**24"

    # ---- generation-aware tiling -------------------------------------------
    num_cores, core_sem, budget_bytes, vmem_limit = _tpu_config()

    chunk_rows = 16                      # two f32 vregs per attribute slab
    tile_unit = 2 * chunk_rows           # even chunk count -> fori unroll=2
    rows_total = -(-N // 128)
    per_core_rows = -(-rows_total // num_cores)
    # double-buffered pred+ytrue input blocks must fit the per-chip budget
    budget_rows = budget_bytes // (2 * 2 * attrs * 128 * 4)
    tile_rows = min((max(budget_rows, tile_unit) // tile_unit) * tile_unit,
                    -(-per_core_rows // tile_unit) * tile_unit)
    tile_rows = max(tile_rows, tile_unit)
    tiles_per_core = -(-per_core_rows // tile_rows)
    rows_pad = num_cores * tiles_per_core * tile_rows
    n_pad = rows_pad * 128

    # ---- one fused relayout (+pad) per tensor ------------------------------
    # pred keeps the minor W axis -> cheap strided copy; y_true needs one hard
    # minor-dim transpose.
    # TODO(synk): stream y_true in its native (..., attrs) layout and do the
    # attrs-minor -> attrs-major relayout with in-kernel 8x128 transposes
    # (idle XLU), saving a full HBM round trip of y_true.
    pred = jnp.pad(
        jnp.transpose(inp.astype(jnp.float32).reshape(bs, na, attrs, in_h, in_w),
                      (2, 0, 1, 3, 4)).reshape(attrs, N),
        ((0, 0), (0, n_pad - N))).reshape(attrs, rows_pad, 128)
    ytrue = jnp.pad(
        jnp.transpose(y_true.astype(jnp.float32),
                      (4, 0, 1, 2, 3)).reshape(attrs, N),
        ((0, 0), (0, n_pad - N))).reshape(attrs, rows_pad, 128)

    kernel = _make_kernel(
        num_classes=num_classes, label_smoothing=label_smoothing,
        in_w=in_w, in_h=in_h, na=na, n_valid=N,
        tile_rows=tile_rows, chunk_rows=chunk_rows,
        tiles_per_core=tiles_per_core,
        anchor_w_consts=anchor_w_consts, anchor_h_consts=anchor_h_consts)

    part_shape = jax.ShapeDtypeStruct((num_cores, chunk_rows, 128), jnp.float32)
    out_spec = pl.BlockSpec((None, chunk_rows, 128), lambda c, i: (c, 0, 0))
    in_spec = pl.BlockSpec((attrs, tile_rows, 128),
                           lambda c, i: (0, c * tiles_per_core + i, 0))

    cp_kwargs = dict(dimension_semantics=(core_sem, "arbitrary"))
    if vmem_limit is not None:
        cp_kwargs["vmem_limit_bytes"] = vmem_limit

    n_p, loc_p, cls_p, conf_p = pl.pallas_call(
        kernel,
        out_shape=(part_shape, part_shape, part_shape, part_shape),
        grid_spec=pltpu.PrefetchScalarGridSpec(
            num_scalar_prefetch=0,
            grid=(num_cores, tiles_per_core),
            in_specs=[in_spec, in_spec],
            out_specs=(out_spec, out_spec, out_spec, out_spec),
        ),
        compiler_params=pltpu.CompilerParams(**cp_kwargs),
    )(pred, ytrue)

    n = jnp.sum(n_p)
    denom = jnp.maximum(n, 1.0)
    loss_loc = jnp.sum(loc_p) / denom
    loss_cls = jnp.sum(cls_p) / (denom * num_classes)
    masked_part = jnp.where(n > 0.0,
                            loss_loc * box_ratio + loss_cls * cls_ratio,
                            jnp.float32(0.0))
    loss_conf = jnp.sum(conf_p) / jnp.float32(N)
    return masked_part + loss_conf * balance[l] * obj_ratio


if __name__ == "__main__":
    key = jax.random.PRNGKey(0)
    k1, k2, k3, k4, k5 = jax.random.split(key, 5)

    # Small, consistent shapes: bs=2, num_classes=3 -> attrs=8, H=W=8
    bs, num_classes, in_h, in_w = 2, 3, 8, 8
    attrs = 5 + num_classes
    input_shape = (64, 64)
    anchors = [(10, 13), (16, 30), (33, 23), (30, 61), (62, 45),
               (59, 119), (116, 90), (156, 198), (373, 326)]
    l = 0

    inp = jax.random.normal(k1, (bs, 3 * attrs, in_h, in_w), jnp.float32)

    # Deterministic y_true: (bs, 3, H, W, attrs)
    xy = jax.random.uniform(k2, (bs, 3, in_h, in_w, 2),
                            minval=0.0, maxval=float(in_w))
    wh = jax.random.uniform(k3, (bs, 3, in_h, in_w, 2),
                            minval=1.0, maxval=7.0)
    objmask = (jax.random.uniform(k4, (bs, 3, in_h, in_w, 1)) < 0.1
               ).astype(jnp.float32)
    cls_onehot = (jax.random.uniform(k5, (bs, 3, in_h, in_w, num_classes))
                  < 0.3).astype(jnp.float32)
    y_true = jnp.concatenate([xy, wh, objmask, cls_onehot], axis=-1)

    @jax.jit
    def run(inp_, y_true_):
        return yolo_loss(l, inp_, y_true_, anchors, num_classes, input_shape)

    loss = jax.block_until_ready(run(inp, y_true))
    print("KERNEL_OK")
</pallas_src>

<mosaic_0001>
module attributes {stable_mosaic.version = 11 : i64} {
  func.func @kernel(%arg0: i32, %arg1: i32, %arg2: memref<8x32x128xf32, #tpu.memory_space<vmem>>, %arg3: memref<8x32x128xf32, #tpu.memory_space<vmem>>, %arg4: memref<1x16x128xf32, #tpu.memory_space<vmem>>, %arg5: memref<1x16x128xf32, #tpu.memory_space<vmem>>, %arg6: memref<1x16x128xf32, #tpu.memory_space<vmem>>, %arg7: memref<1x16x128xf32, #tpu.memory_space<vmem>>) attributes {dimension_semantics = [#tpu.dimension_semantics<parallel>, #tpu.dimension_semantics<arbitrary>], iteration_bounds = array<i64: 2, 1>, scalar_prefetch = 0 : i64, scratch_operands = 0 : i64, tpu.core_type = #tpu.core_type<tc>, window_params = [{transform_indices = @transform_0, window_bounds = array<i64: 8, 32, 128>}, {transform_indices = @transform_1, window_bounds = array<i64: 8, 32, 128>}, {transform_indices = @transform_2, window_bounds = array<i64: 1, 16, 128>}, {transform_indices = @transform_3, window_bounds = array<i64: 1, 16, 128>}, {transform_indices = @transform_4, window_bounds = array<i64: 1, 16, 128>}, {transform_indices = @transform_5, window_bounds = array<i64: 1, 16, 128>}]} {
    %c0_i32 = arith.constant 0 : i32
    %0 = arith.cmpi eq, %arg1, %c0_i32 : i32
    %1 = arith.extui %0 : i1 to i32
    %c0_i32_0 = arith.constant 0 : i32
    %2 = arith.cmpi ne, %1, %c0_i32_0 : i32
    scf.if %2 {
      %cst_272 = arith.constant 0.000000e+00 : f32
      %697 = vector.broadcast %cst_272 : f32 to vector<16x128xf32>
      %c0_273 = arith.constant 0 : index
      %c0_274 = arith.constant 0 : index
      %c0_275 = arith.constant 0 : index
      %698 = vector.load %arg4[%c0_273, %c0_274, %c0_275] : memref<1x16x128xf32, #tpu.memory_space<vmem>>, vector<1x16x128xf32>
      %699 = vector.shape_cast %698 : vector<1x16x128xf32> to vector<16x128xf32>
      %700 = vector.shape_cast %697 : vector<16x128xf32> to vector<1x16x128xf32>
      tpu.vector_store %arg4[%c0_273, %c0_274, %c0_275], %700 {strides = array<i32>} : memref<1x16x128xf32, #tpu.memory_space<vmem>>, vector<1x16x128xf32>,
      %cst_276 = arith.constant 0.000000e+00 : f32
      %701 = vector.broadcast %cst_276 : f32 to vector<16x128xf32>
      %c0_277 = arith.constant 0 : index
      %c0_278 = arith.constant 0 : index
      %c0_279 = arith.constant 0 : index
      %702 = vector.load %arg5[%c0_277, %c0_278, %c0_279] : memref<1x16x128xf32, #tpu.memory_space<vmem>>, vector<1x16x128xf32>
      %703 = vector.shape_cast %702 : vector<1x16x128xf32> to vector<16x128xf32>
      %704 = vector.shape_cast %701 : vector<16x128xf32> to vector<1x16x128xf32>
      tpu.vector_store %arg5[%c0_277, %c0_278, %c0_279], %704 {strides = array<i32>} : memref<1x16x128xf32, #tpu.memory_space<vmem>>, vector<1x16x128xf32>,
      %cst_280 = arith.constant 0.000000e+00 : f32
      %705 = vector.broadcast %cst_280 : f32 to vector<16x128xf32>
      %c0_281 = arith.constant 0 : index
      %c0_282 = arith.constant 0 : index
      %c0_283 = arith.constant 0 : index
      %706 = vector.load %arg6[%c0_281, %c0_282, %c0_283] : memref<1x16x128xf32, #tpu.memory_space<vmem>>, vector<1x16x128xf32>
      %707 = vector.shape_cast %706 : vector<1x16x128xf32> to vector<16x128xf32>
      %708 = vector.shape_cast %705 : vector<16x128xf32> to vector<1x16x128xf32>
      tpu.vector_store %arg6[%c0_281, %c0_282, %c0_283], %708 {strides = array<i32>} : memref<1x16x128xf32, #tpu.memory_space<vmem>>, vector<1x16x128xf32>,
      %cst_284 = arith.constant 0.000000e+00 : f32
      %709 = vector.broadcast %cst_284 : f32 to vector<16x128xf32>
      %c0_285 = arith.constant 0 : index
      %c0_286 = arith.constant 0 : index
      %c0_287 = arith.constant 0 : index
      %710 = vector.load %arg7[%c0_285, %c0_286, %c0_287] : memref<1x16x128xf32, #tpu.memory_space<vmem>>, vector<1x16x128xf32>
      %711 = vector.shape_cast %710 : vector<1x16x128xf32> to vector<16x128xf32>
      %712 = vector.shape_cast %709 : vector<16x128xf32> to vector<1x16x128xf32>
      tpu.vector_store %arg7[%c0_285, %c0_286, %c0_287], %712 {strides = array<i32>} : memref<1x16x128xf32, #tpu.memory_space<vmem>>, vector<1x16x128xf32>,
    } else {
    }
    %c1_i32 = arith.constant 1 : i32
    %3 = arith.muli %arg0, %c1_i32 : i32
    %4 = arith.addi %3, %arg1 : i32
    %c32_i32 = arith.constant 32 : i32
    %5 = arith.muli %4, %c32_i32 : i32
    %6 = tpu.iota {dimensions = array<i32: 0>} : vector<16x128xi32>
    %7 = tpu.iota {dimensions = array<i32: 1>} : vector<16x128xi32>
    %cst = arith.constant 0.000000e+00 : f32
    %8 = vector.broadcast %cst : f32 to vector<16x128xf32>
    %c0_i32_1 = arith.constant 0 : i32
    %c16_i32 = arith.constant 16 : i32
    %9 = arith.muli %c0_i32_1, %c16_i32 : i32
    %10 = tpu.assume_multiple %9, 16 : i32
    %11 = arith.addi %5, %10 : i32
    %12 = vector.broadcast %11 : i32 to vector<16x128xi32>
    %13 = arith.addi %12, %6 : vector<16x128xi32>
    %c128_i32 = arith.constant 128 : i32
    %14 = vector.broadcast %c128_i32 : i32 to vector<16x128xi32>
    %15 = arith.muli %13, %14 : vector<16x128xi32>
    %16 = arith.addi %15, %7 : vector<16x128xi32>
    %c384_i32 = arith.constant 384 : i32
    %17 = vector.broadcast %c384_i32 : i32 to vector<16x128xi32>
    %18 = arith.cmpi slt, %16, %17 : vector<16x128xi32>
    %19 = arith.sitofp %16 : vector<16x128xi32> to vector<16x128xf32>
    %cst_2 = arith.constant 1.562500e-02 : f32
    %20 = vector.broadcast %cst_2 : f32 to vector<16x128xf32>
    %21 = arith.mulf %19, %20 : vector<16x128xf32>
    %22 = math.floor %21 : vector<16x128xf32>
    %cst_3 = arith.constant 6.400000e+01 : f32
    %23 = vector.broadcast %cst_3 : f32 to vector<16x128xf32>
    %24 = arith.mulf %22, %23 : vector<16x128xf32>
    %25 = arith.subf %19, %24 : vector<16x128xf32>
    %cst_4 = arith.constant 6.400000e+01 : f32
    %26 = vector.broadcast %cst_4 : f32 to vector<16x128xf32>
    %27 = arith.cmpf oge, %25, %26 : vector<16x128xf32>
    %cst_5 = arith.constant 1.000000e+00 : f32
    %cst_6 = arith.constant 0.000000e+00 : f32
    %28 = vector.broadcast %cst_5 : f32 to vector<16x128xf32>
    %29 = vector.broadcast %cst_6 : f32 to vector<16x128xf32>
    %30 = arith.select %27, %28, %29 : vector<16x128xi1>, vector<16x128xf32>
    %31 = arith.addf %22, %30 : vector<16x128xf32>
    %cst_7 = arith.constant 0.000000e+00 : f32
    %32 = vector.broadcast %cst_7 : f32 to vector<16x128xf32>
    %33 = arith.cmpf olt, %25, %32 : vector<16x128xf32>
    %cst_8 = arith.constant 1.000000e+00 : f32
    %cst_9 = arith.constant 0.000000e+00 : f32
    %34 = vector.broadcast %cst_8 : f32 to vector<16x128xf32>
    %35 = vector.broadcast %cst_9 : f32 to vector<16x128xf32>
    %36 = arith.select %33, %34, %35 : vector<16x128xi1>, vector<16x128xf32>
    %37 = arith.subf %31, %36 : vector<16x128xf32>
    %cst_10 = arith.constant 6.400000e+01 : f32
    %38 = vector.broadcast %cst_10 : f32 to vector<16x128xf32>
    %39 = arith.mulf %37, %38 : vector<16x128xf32>
    %40 = arith.subf %19, %39 : vector<16x128xf32>
    %cst_11 = arith.constant 1.250000e-01 : f32
    %41 = vector.broadcast %cst_11 : f32 to vector<16x128xf32>
    %42 = arith.mulf %40, %41 : vector<16x128xf32>
    %43 = math.floor %42 : vector<16x128xf32>
    %cst_12 = arith.constant 8.000000e+00 : f32
    %44 = vector.broadcast %cst_12 : f32 to vector<16x128xf32>
    %45 = arith.mulf %43, %44 : vector<16x128xf32>
    %46 = arith.subf %40, %45 : vector<16x128xf32>
    %cst_13 = arith.constant 8.000000e+00 : f32
    %47 = vector.broadcast %cst_13 : f32 to vector<16x128xf32>
    %48 = arith.cmpf oge, %46, %47 : vector<16x128xf32>
    %cst_14 = arith.constant 1.000000e+00 : f32
    %cst_15 = arith.constant 0.000000e+00 : f32
    %49 = vector.broadcast %cst_14 : f32 to vector<16x128xf32>
    %50 = vector.broadcast %cst_15 : f32 to vector<16x128xf32>
    %51 = arith.select %48, %49, %50 : vector<16x128xi1>, vector<16x128xf32>
    %52 = arith.addf %43, %51 : vector<16x128xf32>
    %cst_16 = arith.constant 0.000000e+00 : f32
    %53 = vector.broadcast %cst_16 : f32 to vector<16x128xf32>
    %54 = arith.cmpf olt, %46, %53 : vector<16x128xf32>
    %cst_17 = arith.constant 1.000000e+00 : f32
    %cst_18 = arith.constant 0.000000e+00 : f32
    %55 = vector.broadcast %cst_17 : f32 to vector<16x128xf32>
    %56 = vector.broadcast %cst_18 : f32 to vector<16x128xf32>
    %57 = arith.select %54, %55, %56 : vector<16x128xi1>, vector<16x128xf32>
    %58 = arith.subf %52, %57 : vector<16x128xf32>
    %cst_19 = arith.constant 8.000000e+00 : f32
    %59 = vector.broadcast %cst_19 : f32 to vector<16x128xf32>
    %60 = arith.mulf %58, %59 : vector<16x128xf32>
    %61 = arith.subf %40, %60 : vector<16x128xf32>
    %cst_20 = arith.constant 0.333333343 : f32
    %62 = vector.broadcast %cst_20 : f32 to vector<16x128xf32>
    %63 = arith.mulf %37, %62 : vector<16x128xf32>
    %64 = math.floor %63 : vector<16x128xf32>
    %cst_21 = arith.constant 3.000000e+00 : f32
    %65 = vector.broadcast %cst_21 : f32 to vector<16x128xf32>
    %66 = arith.mulf %64, %65 : vector<16x128xf32>
    %67 = arith.subf %37, %66 : vector<16x128xf32>
    %cst_22 = arith.constant 3.000000e+00 : f32
    %68 = vector.broadcast %cst_22 : f32 to vector<16x128xf32>
    %69 = arith.cmpf oge, %67, %68 : vector<16x128xf32>
    %cst_23 = arith.constant 1.000000e+00 : f32
    %cst_24 = arith.constant 0.000000e+00 : f32
    %70 = vector.broadcast %cst_23 : f32 to vector<16x128xf32>
    %71 = vector.broadcast %cst_24 : f32 to vector<16x128xf32>
    %72 = arith.select %69, %70, %71 : vector<16x128xi1>, vector<16x128xf32>
    %73 = arith.addf %64, %72 : vector<16x128xf32>
    %cst_25 = arith.constant 0.000000e+00 : f32
    %74 = vector.broadcast %cst_25 : f32 to vector<16x128xf32>
    %75 = arith.cmpf olt, %67, %74 : vector<16x128xf32>
    %cst_26 = arith.constant 1.000000e+00 : f32
    %cst_27 = arith.constant 0.000000e+00 : f32
    %76 = vector.broadcast %cst_26 : f32 to vector<16x128xf32>
    %77 = vector.broadcast %cst_27 : f32 to vector<16x128xf32>
    %78 = arith.select %75, %76, %77 : vector<16x128xi1>, vector<16x128xf32>
    %79 = arith.subf %73, %78 : vector<16x128xf32>
    %cst_28 = arith.constant 3.000000e+00 : f32
    %80 = vector.broadcast %cst_28 : f32 to vector<16x128xf32>
    %81 = arith.mulf %79, %80 : vector<16x128xf32>
    %82 = arith.subf %37, %81 : vector<16x128xf32>
    %cst_29 = arith.constant 4.662500e+01 : f32
    %83 = vector.broadcast %cst_29 : f32 to vector<16x128xf32>
    %cst_30 = arith.constant 4.075000e+01 : f32
    %84 = vector.broadcast %cst_30 : f32 to vector<16x128xf32>
    %cst_31 = arith.constant 1.500000e+00 : f32
    %85 = vector.broadcast %cst_31 : f32 to vector<16x128xf32>
    %86 = arith.cmpf olt, %82, %85 : vector<16x128xf32>
    %cst_32 = arith.constant 1.950000e+01 : f32
    %87 = vector.broadcast %cst_32 : f32 to vector<16x128xf32>
    %88 = arith.select %86, %87, %83 : vector<16x128xi1>, vector<16x128xf32>
    %cst_33 = arith.constant 2.475000e+01 : f32
    %89 = vector.broadcast %cst_33 : f32 to vector<16x128xf32>
    %90 = arith.select %86, %89, %84 : vector<16x128xi1>, vector<16x128xf32>
    %cst_34 = arith.constant 5.000000e-01 : f32
    %91 = vector.broadcast %cst_34 : f32 to vector<16x128xf32>
    %92 = arith.cmpf olt, %82, %91 : vector<16x128xf32>
    %cst_35 = arith.constant 1.450000e+01 : f32
    %93 = vector.broadcast %cst_35 : f32 to vector<16x128xf32>
    %94 = arith.select %92, %93, %88 : vector<16x128xi1>, vector<16x128xf32>
    %cst_36 = arith.constant 1.125000e+01 : f32
    %95 = vector.broadcast %cst_36 : f32 to vector<16x128xf32>
    %96 = arith.select %92, %95, %90 : vector<16x128xi1>, vector<16x128xf32>
    %c4 = arith.constant 4 : index
    %97 = arith.index_cast %10 : i32 to index
    %c0 = arith.constant 0 : index
    %98 = vector.load %arg3[%c4, %97, %c0] : memref<8x32x128xf32, #tpu.memory_space<vmem>>, vector<1x16x128xf32>
    %99 = vector.shape_cast %98 : vector<1x16x128xf32> to vector<16x128xf32>
    %cst_37 = arith.constant 1.000000e+00 : f32
    %100 = vector.broadcast %cst_37 : f32 to vector<16x128xf32>
    %101 = arith.cmpf oeq, %99, %100 : vector<16x128xf32>
    %102 = arith.andi %101, %18 : vector<16x128xi1>
    %c0_38 = arith.constant 0 : index
    %103 = arith.index_cast %10 : i32 to index
    %c0_39 = arith.constant 0 : index
    %104 = vector.load %arg2[%c0_38, %103, %c0_39] : memref<8x32x128xf32, #tpu.memory_space<vmem>>, vector<1x16x128xf32>
    %105 = vector.shape_cast %104 : vector<1x16x128xf32> to vector<16x128xf32>
    %106 = arith.negf %105 : vector<16x128xf32>
    %107 = math.exp %106 : vector<16x128xf32>
    %cst_40 = arith.constant 1.000000e+00 : f32
    %108 = vector.broadcast %cst_40 : f32 to vector<16x128xf32>
    %109 = arith.addf %108, %107 : vector<16x128xf32>
    %110 = arith.divf %108, %109 : vector<16x128xf32>
    %c1 = arith.constant 1 : index
    %111 = arith.index_cast %10 : i32 to index
    %c0_41 = arith.constant 0 : index
    %112 = vector.load %arg2[%c1, %111, %c0_41] : memref<8x32x128xf32, #tpu.memory_space<vmem>>, vector<1x16x128xf32>
    %113 = vector.shape_cast %112 : vector<1x16x128xf32> to vector<16x128xf32>
    %114 = arith.negf %113 : vector<16x128xf32>
    %115 = math.exp %114 : vector<16x128xf32>
    %cst_42 = arith.constant 1.000000e+00 : f32
    %116 = vector.broadcast %cst_42 : f32 to vector<16x128xf32>
    %117 = arith.addf %116, %115 : vector<16x128xf32>
    %118 = arith.divf %116, %117 : vector<16x128xf32>
    %c2 = arith.constant 2 : index
    %119 = arith.index_cast %10 : i32 to index
    %c0_43 = arith.constant 0 : index
    %120 = vector.load %arg2[%c2, %119, %c0_43] : memref<8x32x128xf32, #tpu.memory_space<vmem>>, vector<1x16x128xf32>
    %121 = vector.shape_cast %120 : vector<1x16x128xf32> to vector<16x128xf32>
    %122 = arith.negf %121 : vector<16x128xf32>
    %123 = math.exp %122 : vector<16x128xf32>
    %cst_44 = arith.constant 1.000000e+00 : f32
    %124 = vector.broadcast %cst_44 : f32 to vector<16x128xf32>
    %125 = arith.addf %124, %123 : vector<16x128xf32>
    %126 = arith.divf %124, %125 : vector<16x128xf32>
    %c3 = arith.constant 3 : index
    %127 = arith.index_cast %10 : i32 to index
    %c0_45 = arith.constant 0 : index
    %128 = vector.load %arg2[%c3, %127, %c0_45] : memref<8x32x128xf32, #tpu.memory_space<vmem>>, vector<1x16x128xf32>
    %129 = vector.shape_cast %128 : vector<1x16x128xf32> to vector<16x128xf32>
    %130 = arith.negf %129 : vector<16x128xf32>
    %131 = math.exp %130 : vector<16x128xf32>
    %cst_46 = arith.constant 1.000000e+00 : f32
    %132 = vector.broadcast %cst_46 : f32 to vector<16x128xf32>
    %133 = arith.addf %132, %131 : vector<16x128xf32>
    %134 = arith.divf %132, %133 : vector<16x128xf32>
    %cst_47 = arith.constant 2.000000e+00 : f32
    %135 = vector.broadcast %cst_47 : f32 to vector<16x128xf32>
    %136 = arith.mulf %110, %135 : vector<16x128xf32>
    %cst_48 = arith.constant 5.000000e-01 : f32
    %137 = vector.broadcast %cst_48 : f32 to vector<16x128xf32>
    %138 = arith.subf %136, %137 : vector<16x128xf32>
    %139 = arith.addf %138, %61 : vector<16x128xf32>
    %cst_49 = arith.constant 2.000000e+00 : f32
    %140 = vector.broadcast %cst_49 : f32 to vector<16x128xf32>
    %141 = arith.mulf %118, %140 : vector<16x128xf32>
    %cst_50 = arith.constant 5.000000e-01 : f32
    %142 = vector.broadcast %cst_50 : f32 to vector<16x128xf32>
    %143 = arith.subf %141, %142 : vector<16x128xf32>
    %144 = arith.addf %143, %61 : vector<16x128xf32>
    %cst_51 = arith.constant 2.000000e+00 : f32
    %145 = vector.broadcast %cst_51 : f32 to vector<16x128xf32>
    %146 = arith.mulf %126, %145 : vector<16x128xf32>
    %147 = arith.mulf %146, %146 : vector<16x128xf32>
    %148 = arith.mulf %147, %94 : vector<16x128xf32>
    %cst_52 = arith.constant 2.000000e+00 : f32
    %149 = vector.broadcast %cst_52 : f32 to vector<16x128xf32>
    %150 = arith.mulf %134, %149 : vector<16x128xf32>
    %151 = arith.mulf %150, %150 : vector<16x128xf32>
    %152 = arith.mulf %151, %96 : vector<16x128xf32>
    %c0_53 = arith.constant 0 : index
    %153 = arith.index_cast %10 : i32 to index
    %c0_54 = arith.constant 0 : index
    %154 = vector.load %arg3[%c0_53, %153, %c0_54] : memref<8x32x128xf32, #tpu.memory_space<vmem>>, vector<1x16x128xf32>
    %155 = vector.shape_cast %154 : vector<1x16x128xf32> to vector<16x128xf32>
    %c1_55 = arith.constant 1 : index
    %156 = arith.index_cast %10 : i32 to index
    %c0_56 = arith.constant 0 : index
    %157 = vector.load %arg3[%c1_55, %156, %c0_56] : memref<8x32x128xf32, #tpu.memory_space<vmem>>, vector<1x16x128xf32>
    %158 = vector.shape_cast %157 : vector<1x16x128xf32> to vector<16x128xf32>
    %c2_57 = arith.constant 2 : index
    %159 = arith.index_cast %10 : i32 to index
    %c0_58 = arith.constant 0 : index
    %160 = vector.load %arg3[%c2_57, %159, %c0_58] : memref<8x32x128xf32, #tpu.memory_space<vmem>>, vector<1x16x128xf32>
    %161 = vector.shape_cast %160 : vector<1x16x128xf32> to vector<16x128xf32>
    %c3_59 = arith.constant 3 : index
    %162 = arith.index_cast %10 : i32 to index
    %c0_60 = arith.constant 0 : index
    %163 = vector.load %arg3[%c3_59, %162, %c0_60] : memref<8x32x128xf32, #tpu.memory_space<vmem>>, vector<1x16x128xf32>
    %164 = vector.shape_cast %163 : vector<1x16x128xf32> to vector<16x128xf32>
    %cst_61 = arith.constant 5.000000e-01 : f32
    %165 = vector.broadcast %cst_61 : f32 to vector<16x128xf32>
    %166 = arith.mulf %148, %165 : vector<16x128xf32>
    %167 = arith.subf %139, %166 : vector<16x128xf32>
    %cst_62 = arith.constant 5.000000e-01 : f32
    %168 = vector.broadcast %cst_62 : f32 to vector<16x128xf32>
    %169 = arith.mulf %148, %168 : vector<16x128xf32>
    %170 = arith.addf %139, %169 : vector<16x128xf32>
    %cst_63 = arith.constant 5.000000e-01 : f32
    %171 = vector.broadcast %cst_63 : f32 to vector<16x128xf32>
    %172 = arith.mulf %152, %171 : vector<16x128xf32>
    %173 = arith.subf %144, %172 : vector<16x128xf32>
    %cst_64 = arith.constant 5.000000e-01 : f32
    %174 = vector.broadcast %cst_64 : f32 to vector<16x128xf32>
    %175 = arith.mulf %152, %174 : vector<16x128xf32>
    %176 = arith.addf %144, %175 : vector<16x128xf32>
    %cst_65 = arith.constant 5.000000e-01 : f32
    %177 = vector.broadcast %cst_65 : f32 to vector<16x128xf32>
    %178 = arith.mulf %161, %177 : vector<16x128xf32>
    %179 = arith.subf %155, %178 : vector<16x128xf32>
    %cst_66 = arith.constant 5.000000e-01 : f32
    %180 = vector.broadcast %cst_66 : f32 to vector<16x128xf32>
    %181 = arith.mulf %161, %180 : vector<16x128xf32>
    %182 = arith.addf %155, %181 : vector<16x128xf32>
    %cst_67 = arith.constant 5.000000e-01 : f32
    %183 = vector.broadcast %cst_67 : f32 to vector<16x128xf32>
    %184 = arith.mulf %164, %183 : vector<16x128xf32>
    %185 = arith.subf %158, %184 : vector<16x128xf32>
    %cst_68 = arith.constant 5.000000e-01 : f32
    %186 = vector.broadcast %cst_68 : f32 to vector<16x128xf32>
    %187 = arith.mulf %164, %186 : vector<16x128xf32>
    %188 = arith.addf %158, %187 : vector<16x128xf32>
    %189 = arith.minimumf %170, %182 : vector<16x128xf32>
    %190 = arith.maximumf %167, %179 : vector<16x128xf32>
    %191 = arith.subf %189, %190 : vector<16x128xf32>
    %cst_69 = arith.constant 0.000000e+00 : f32
    %192 = vector.broadcast %cst_69 : f32 to vector<16x128xf32>
    %193 = arith.maximumf %191, %192 : vector<16x128xf32>
    %194 = arith.minimumf %176, %188 : vector<16x128xf32>
    %195 = arith.maximumf %173, %185 : vector<16x128xf32>
    %196 = arith.subf %194, %195 : vector<16x128xf32>
    %cst_70 = arith.constant 0.000000e+00 : f32
    %197 = vector.broadcast %cst_70 : f32 to vector<16x128xf32>
    %198 = arith.maximumf %196, %197 : vector<16x128xf32>
    %199 = arith.mulf %193, %198 : vector<16x128xf32>
    %200 = arith.mulf %148, %152 : vector<16x128xf32>
    %201 = arith.mulf %161, %152 : vector<16x128xf32>
    %202 = arith.addf %201, %200 : vector<16x128xf32>
    %203 = arith.subf %202, %199 : vector<16x128xf32>
    %204 = tpu.reciprocal %203 {approx = true} : vector<16x128xf32> -> vector<16x128xf32>
    %205 = arith.mulf %199, %204 : vector<16x128xf32>
    %206 = arith.maximumf %170, %182 : vector<16x128xf32>
    %207 = arith.minimumf %167, %179 : vector<16x128xf32>
    %208 = arith.subf %206, %207 : vector<16x128xf32>
    %cst_71 = arith.constant 0.000000e+00 : f32
    %209 = vector.broadcast %cst_71 : f32 to vector<16x128xf32>
    %210 = arith.maximumf %208, %209 : vector<16x128xf32>
    %211 = arith.maximumf %176, %188 : vector<16x128xf32>
    %212 = arith.minimumf %173, %185 : vector<16x128xf32>
    %213 = arith.subf %211, %212 : vector<16x128xf32>
    %cst_72 = arith.constant 0.000000e+00 : f32
    %214 = vector.broadcast %cst_72 : f32 to vector<16x128xf32>
    %215 = arith.maximumf %213, %214 : vector<16x128xf32>
    %216 = arith.mulf %210, %215 : vector<16x128xf32>
    %217 = arith.subf %216, %203 : vector<16x128xf32>
    %218 = tpu.reciprocal %216 {approx = true} : vector<16x128xf32> -> vector<16x128xf32>
    %219 = arith.mulf %217, %218 : vector<16x128xf32>
    %220 = arith.subf %205, %219 : vector<16x128xf32>
    %cst_73 = arith.constant 0.000000e+00 : f32
    %221 = vector.broadcast %cst_73 : f32 to vector<16x128xf32>
    %c5 = arith.constant 5 : index
    %222 = arith.index_cast %10 : i32 to index
    %c0_74 = arith.constant 0 : index
    %223 = vector.load %arg2[%c5, %222, %c0_74] : memref<8x32x128xf32, #tpu.memory_space<vmem>>, vector<1x16x128xf32>
    %224 = vector.shape_cast %223 : vector<1x16x128xf32> to vector<16x128xf32>
    %cst_75 = arith.constant -16.1180954 : f32
    %cst_76 = arith.constant 16.1180954 : f32
    %225 = vector.broadcast %cst_75 : f32 to vector<16x128xf32>
    %226 = arith.maximumf %225, %224 : vector<16x128xf32>
    %227 = vector.broadcast %cst_76 : f32 to vector<16x128xf32>
    %228 = arith.minimumf %227, %226 : vector<16x128xf32>
    %c5_77 = arith.constant 5 : index
    %229 = arith.index_cast %10 : i32 to index
    %c0_78 = arith.constant 0 : index
    %230 = vector.load %arg3[%c5_77, %229, %c0_78] : memref<8x32x128xf32, #tpu.memory_space<vmem>>, vector<1x16x128xf32>
    %231 = vector.shape_cast %230 : vector<1x16x128xf32> to vector<16x128xf32>
    %cst_79 = arith.constant 1.000000e+00 : f32
    %232 = vector.broadcast %cst_79 : f32 to vector<16x128xf32>
    %233 = arith.mulf %231, %232 : vector<16x128xf32>
    %cst_80 = arith.constant 0.000000e+00 : f32
    %234 = vector.broadcast %cst_80 : f32 to vector<16x128xf32>
    %235 = arith.addf %233, %234 : vector<16x128xf32>
    %cst_81 = arith.constant 0.000000e+00 : f32
    %236 = vector.broadcast %cst_81 : f32 to vector<16x128xf32>
    %237 = arith.maximumf %228, %236 : vector<16x128xf32>
    %238 = math.absf %228 : vector<16x128xf32>
    %cst_82 = arith.constant 0.000000e+00 : f32
    %239 = vector.broadcast %cst_82 : f32 to vector<16x128xf32>
    %240 = arith.subf %239, %238 : vector<16x128xf32>
    %241 = math.exp %240 : vector<16x128xf32>
    %cst_83 = arith.constant 1.000000e+00 : f32
    %242 = vector.broadcast %cst_83 : f32 to vector<16x128xf32>
    %243 = arith.addf %242, %241 : vector<16x128xf32>
    %244 = math.log %243 : vector<16x128xf32>
    %245 = arith.addf %237, %244 : vector<16x128xf32>
    %246 = arith.mulf %235, %228 : vector<16x128xf32>
    %247 = arith.subf %245, %246 : vector<16x128xf32>
    %248 = arith.addf %221, %247 : vector<16x128xf32>
    %c6 = arith.constant 6 : index
    %249 = arith.index_cast %10 : i32 to index
    %c0_84 = arith.constant 0 : index
    %250 = vector.load %arg2[%c6, %249, %c0_84] : memref<8x32x128xf32, #tpu.memory_space<vmem>>, vector<1x16x128xf32>
    %251 = vector.shape_cast %250 : vector<1x16x128xf32> to vector<16x128xf32>
    %cst_85 = arith.constant -16.1180954 : f32
    %cst_86 = arith.constant 16.1180954 : f32
    %252 = vector.broadcast %cst_85 : f32 to vector<16x128xf32>
    %253 = arith.maximumf %252, %251 : vector<16x128xf32>
    %254 = vector.broadcast %cst_86 : f32 to vector<16x128xf32>
    %255 = arith.minimumf %254, %253 : vector<16x128xf32>
    %c6_87 = arith.constant 6 : index
    %256 = arith.index_cast %10 : i32 to index
    %c0_88 = arith.constant 0 : index
    %257 = vector.load %arg3[%c6_87, %256, %c0_88] : memref<8x32x128xf32, #tpu.memory_space<vmem>>, vector<1x16x128xf32>
    %258 = vector.shape_cast %257 : vector<1x16x128xf32> to vector<16x128xf32>
    %cst_89 = arith.constant 1.000000e+00 : f32
    %259 = vector.broadcast %cst_89 : f32 to vector<16x128xf32>
    %260 = arith.mulf %258, %259 : vector<16x128xf32>
    %cst_90 = arith.constant 0.000000e+00 : f32
    %261 = vector.broadcast %cst_90 : f32 to vector<16x128xf32>
    %262 = arith.addf %260, %261 : vector<16x128xf32>
    %cst_91 = arith.constant 0.000000e+00 : f32
    %263 = vector.broadcast %cst_91 : f32 to vector<16x128xf32>
    %264 = arith.maximumf %255, %263 : vector<16x128xf32>
    %265 = math.absf %255 : vector<16x128xf32>
    %cst_92 = arith.constant 0.000000e+00 : f32
    %266 = vector.broadcast %cst_92 : f32 to vector<16x128xf32>
    %267 = arith.subf %266, %265 : vector<16x128xf32>
    %268 = math.exp %267 : vector<16x128xf32>
    %cst_93 = arith.constant 1.000000e+00 : f32
    %269 = vector.broadcast %cst_93 : f32 to vector<16x128xf32>
    %270 = arith.addf %269, %268 : vector<16x128xf32>
    %271 = math.log %270 : vector<16x128xf32>
    %272 = arith.addf %264, %271 : vector<16x128xf32>
    %273 = arith.mulf %262, %255 : vector<16x128xf32>
    %274 = arith.subf %272, %273 : vector<16x128xf32>
    %275 = arith.addf %248, %274 : vector<16x128xf32>
    %c7 = arith.constant 7 : index
    %276 = arith.index_cast %10 : i32 to index
    %c0_94 = arith.constant 0 : index
    %277 = vector.load %arg2[%c7, %276, %c0_94] : memref<8x32x128xf32, #tpu.memory_space<vmem>>, vector<1x16x128xf32>
    %278 = vector.shape_cast %277 : vector<1x16x128xf32> to vector<16x128xf32>
    %cst_95 = arith.constant -16.1180954 : f32
    %cst_96 = arith.constant 16.1180954 : f32
    %279 = vector.broadcast %cst_95 : f32 to vector<16x128xf32>
    %280 = arith.maximumf %279, %278 : vector<16x128xf32>
    %281 = vector.broadcast %cst_96 : f32 to vector<16x128xf32>
    %282 = arith.minimumf %281, %280 : vector<16x128xf32>
    %c7_97 = arith.constant 7 : index
    %283 = arith.index_cast %10 : i32 to index
    %c0_98 = arith.constant 0 : index
    %284 = vector.load %arg3[%c7_97, %283, %c0_98] : memref<8x32x128xf32, #tpu.memory_space<vmem>>, vector<1x16x128xf32>
    %285 = vector.shape_cast %284 : vector<1x16x128xf32> to vector<16x128xf32>
    %cst_99 = arith.constant 1.000000e+00 : f32
    %286 = vector.broadcast %cst_99 : f32 to vector<16x128xf32>
    %287 = arith.mulf %285, %286 : vector<16x128xf32>
    %cst_100 = arith.constant 0.000000e+00 : f32
    %288 = vector.broadcast %cst_100 : f32 to vector<16x128xf32>
    %289 = arith.addf %287, %288 : vector<16x128xf32>
    %cst_101 = arith.constant 0.000000e+00 : f32
    %290 = vector.broadcast %cst_101 : f32 to vector<16x128xf32>
    %291 = arith.maximumf %282, %290 : vector<16x128xf32>
    %292 = math.absf %282 : vector<16x128xf32>
    %cst_102 = arith.constant 0.000000e+00 : f32
    %293 = vector.broadcast %cst_102 : f32 to vector<16x128xf32>
    %294 = arith.subf %293, %292 : vector<16x128xf32>
    %295 = math.exp %294 : vector<16x128xf32>
    %cst_103 = arith.constant 1.000000e+00 : f32
    %296 = vector.broadcast %cst_103 : f32 to vector<16x128xf32>
    %297 = arith.addf %296, %295 : vector<16x128xf32>
    %298 = math.log %297 : vector<16x128xf32>
    %299 = arith.addf %291, %298 : vector<16x128xf32>
    %300 = arith.mulf %289, %282 : vector<16x128xf32>
    %301 = arith.subf %299, %300 : vector<16x128xf32>
    %302 = arith.addf %275, %301 : vector<16x128xf32>
    %cst_104 = arith.constant 0.000000e+00 : f32
    %303 = vector.broadcast %cst_104 : f32 to vector<16x128xf32>
    %304 = arith.maximumf %220, %303 : vector<16x128xf32>
    %cst_105 = arith.constant 0.000000e+00 : f32
    %305 = vector.broadcast %cst_105 : f32 to vector<16x128xf32>
    %306 = arith.select %102, %304, %305 : vector<16x128xi1>, vector<16x128xf32>
    %c4_106 = arith.constant 4 : index
    %307 = arith.index_cast %10 : i32 to index
    %c0_107 = arith.constant 0 : index
    %308 = vector.load %arg2[%c4_106, %307, %c0_107] : memref<8x32x128xf32, #tpu.memory_space<vmem>>, vector<1x16x128xf32>
    %309 = vector.shape_cast %308 : vector<1x16x128xf32> to vector<16x128xf32>
    %cst_108 = arith.constant -16.1180954 : f32
    %cst_109 = arith.constant 16.1180954 : f32
    %310 = vector.broadcast %cst_108 : f32 to vector<16x128xf32>
    %311 = arith.maximumf %310, %309 : vector<16x128xf32>
    %312 = vector.broadcast %cst_109 : f32 to vector<16x128xf32>
    %313 = arith.minimumf %312, %311 : vector<16x128xf32>
    %cst_110 = arith.constant 0.000000e+00 : f32
    %314 = vector.broadcast %cst_110 : f32 to vector<16x128xf32>
    %315 = arith.maximumf %313, %314 : vector<16x128xf32>
    %316 = math.absf %313 : vector<16x128xf32>
    %cst_111 = arith.constant 0.000000e+00 : f32
    %317 = vector.broadcast %cst_111 : f32 to vector<16x128xf32>
    %318 = arith.subf %317, %316 : vector<16x128xf32>
    %319 = math.exp %318 : vector<16x128xf32>
    %cst_112 = arith.constant 1.000000e+00 : f32
    %320 = vector.broadcast %cst_112 : f32 to vector<16x128xf32>
    %321 = arith.addf %320, %319 : vector<16x128xf32>
    %322 = math.log %321 : vector<16x128xf32>
    %323 = arith.addf %315, %322 : vector<16x128xf32>
    %324 = arith.mulf %306, %313 : vector<16x128xf32>
    %325 = arith.subf %323, %324 : vector<16x128xf32>
    %cst_113 = arith.constant 1.000000e+00 : f32
    %cst_114 = arith.constant 0.000000e+00 : f32
    %326 = vector.broadcast %cst_113 : f32 to vector<16x128xf32>
    %327 = vector.broadcast %cst_114 : f32 to vector<16x128xf32>
    %328 = arith.select %102, %326, %327 : vector<16x128xi1>, vector<16x128xf32>
    %329 = arith.addf %8, %328 : vector<16x128xf32>
    %cst_115 = arith.constant 1.000000e+00 : f32
    %330 = vector.broadcast %cst_115 : f32 to vector<16x128xf32>
    %331 = arith.subf %330, %220 : vector<16x128xf32>
    %cst_116 = arith.constant 0.000000e+00 : f32
    %332 = vector.broadcast %cst_116 : f32 to vector<16x128xf32>
    %333 = arith.select %102, %331, %332 : vector<16x128xi1>, vector<16x128xf32>
    %334 = arith.addf %8, %333 : vector<16x128xf32>
    %cst_117 = arith.constant 0.000000e+00 : f32
    %335 = vector.broadcast %cst_117 : f32 to vector<16x128xf32>
    %336 = arith.select %102, %302, %335 : vector<16x128xi1>, vector<16x128xf32>
    %337 = arith.addf %8, %336 : vector<16x128xf32>
    %cst_118 = arith.constant 0.000000e+00 : f32
    %338 = vector.broadcast %cst_118 : f32 to vector<16x128xf32>
    %339 = arith.select %18, %325, %338 : vector<16x128xi1>, vector<16x128xf32>
    %340 = arith.addf %8, %339 : vector<16x128xf32>
    %c1_i32_119 = arith.constant 1 : i32
    %c16_i32_120 = arith.constant 16 : i32
    %341 = arith.muli %c1_i32_119, %c16_i32_120 : i32
    %342 = tpu.assume_multiple %341, 16 : i32
    %343 = arith.addi %5, %342 : i32
    %344 = vector.broadcast %343 : i32 to vector<16x128xi32>
    %345 = arith.addi %344, %6 : vector<16x128xi32>
    %c128_i32_121 = arith.constant 128 : i32
    %346 = vector.broadcast %c128_i32_121 : i32 to vector<16x128xi32>
    %347 = arith.muli %345, %346 : vector<16x128xi32>
    %348 = arith.addi %347, %7 : vector<16x128xi32>
    %c384_i32_122 = arith.constant 384 : i32
    %349 = vector.broadcast %c384_i32_122 : i32 to vector<16x128xi32>
    %350 = arith.cmpi slt, %348, %349 : vector<16x128xi32>
    %351 = arith.sitofp %348 : vector<16x128xi32> to vector<16x128xf32>
    %cst_123 = arith.constant 1.562500e-02 : f32
    %352 = vector.broadcast %cst_123 : f32 to vector<16x128xf32>
    %353 = arith.mulf %351, %352 : vector<16x128xf32>
    %354 = math.floor %353 : vector<16x128xf32>
    %cst_124 = arith.constant 6.400000e+01 : f32
    %355 = vector.broadcast %cst_124 : f32 to vector<16x128xf32>
    %356 = arith.mulf %354, %355 : vector<16x128xf32>
    %357 = arith.subf %351, %356 : vector<16x128xf32>
    %cst_125 = arith.constant 6.400000e+01 : f32
    %358 = vector.broadcast %cst_125 : f32 to vector<16x128xf32>
    %359 = arith.cmpf oge, %357, %358 : vector<16x128xf32>
    %cst_126 = arith.constant 1.000000e+00 : f32
    %cst_127 = arith.constant 0.000000e+00 : f32
    %360 = vector.broadcast %cst_126 : f32 to vector<16x128xf32>
    %361 = vector.broadcast %cst_127 : f32 to vector<16x128xf32>
    %362 = arith.select %359, %360, %361 : vector<16x128xi1>, vector<16x128xf32>
    %363 = arith.addf %354, %362 : vector<16x128xf32>
    %cst_128 = arith.constant 0.000000e+00 : f32
    %364 = vector.broadcast %cst_128 : f32 to vector<16x128xf32>
    %365 = arith.cmpf olt, %357, %364 : vector<16x128xf32>
    %cst_129 = arith.constant 1.000000e+00 : f32
    %cst_130 = arith.constant 0.000000e+00 : f32
    %366 = vector.broadcast %cst_129 : f32 to vector<16x128xf32>
    %367 = vector.broadcast %cst_130 : f32 to vector<16x128xf32>
    %368 = arith.select %365, %366, %367 : vector<16x128xi1>, vector<16x128xf32>
    %369 = arith.subf %363, %368 : vector<16x128xf32>
    %cst_131 = arith.constant 6.400000e+01 : f32
    %370 = vector.broadcast %cst_131 : f32 to vector<16x128xf32>
    %371 = arith.mulf %369, %370 : vector<16x128xf32>
    %372 = arith.subf %351, %371 : vector<16x128xf32>
    %cst_132 = arith.constant 1.250000e-01 : f32
    %373 = vector.broadcast %cst_132 : f32 to vector<16x128xf32>
    %374 = arith.mulf %372, %373 : vector<16x128xf32>
    %375 = math.floor %374 : vector<16x128xf32>
    %cst_133 = arith.constant 8.000000e+00 : f32
    %376 = vector.broadcast %cst_133 : f32 to vector<16x128xf32>
    %377 = arith.mulf %375, %376 : vector<16x128xf32>
    %378 = arith.subf %372, %377 : vector<16x128xf32>
    %cst_134 = arith.constant 8.000000e+00 : f32
    %379 = vector.broadcast %cst_134 : f32 to vector<16x128xf32>
    %380 = arith.cmpf oge, %378, %379 : vector<16x128xf32>
    %cst_135 = arith.constant 1.000000e+00 : f32
    %cst_136 = arith.constant 0.000000e+00 : f32
    %381 = vector.broadcast %cst_135 : f32 to vector<16x128xf32>
    %382 = vector.broadcast %cst_136 : f32 to vector<16x128xf32>
    %383 = arith.select %380, %381, %382 : vector<16x128xi1>, vector<16x128xf32>
    %384 = arith.addf %375, %383 : vector<16x128xf32>
    %cst_137 = arith.constant 0.000000e+00 : f32
    %385 = vector.broadcast %cst_137 : f32 to vector<16x128xf32>
    %386 = arith.cmpf olt, %378, %385 : vector<16x128xf32>
    %cst_138 = arith.constant 1.000000e+00 : f32
    %cst_139 = arith.constant 0.000000e+00 : f32
    %387 = vector.broadcast %cst_138 : f32 to vector<16x128xf32>
    %388 = vector.broadcast %cst_139 : f32 to vector<16x128xf32>
    %389 = arith.select %386, %387, %388 : vector<16x128xi1>, vector<16x128xf32>
    %390 = arith.subf %384, %389 : vector<16x128xf32>
    %cst_140 = arith.constant 8.000000e+00 : f32
    %391 = vector.broadcast %cst_140 : f32 to vector<16x128xf32>
    %392 = arith.mulf %390, %391 : vector<16x128xf32>
    %393 = arith.subf %372, %392 : vector<16x128xf32>
    %cst_141 = arith.constant 0.333333343 : f32
    %394 = vector.broadcast %cst_141 : f32 to vector<16x128xf32>
    %395 = arith.mulf %369, %394 : vector<16x128xf32>
    %396 = math.floor %395 : vector<16x128xf32>
    %cst_142 = arith.constant 3.000000e+00 : f32
    %397 = vector.broadcast %cst_142 : f32 to vector<16x128xf32>
    %398 = arith.mulf %396, %397 : vector<16x128xf32>
    %399 = arith.subf %369, %398 : vector<16x128xf32>
    %cst_143 = arith.constant 3.000000e+00 : f32
    %400 = vector.broadcast %cst_143 : f32 to vector<16x128xf32>
    %401 = arith.cmpf oge, %399, %400 : vector<16x128xf32>
    %cst_144 = arith.constant 1.000000e+00 : f32
    %cst_145 = arith.constant 0.000000e+00 : f32
    %402 = vector.broadcast %cst_144 : f32 to vector<16x128xf32>
    %403 = vector.broadcast %cst_145 : f32 to vector<16x128xf32>
    %404 = arith.select %401, %402, %403 : vector<16x128xi1>, vector<16x128xf32>
    %405 = arith.addf %396, %404 : vector<16x128xf32>
    %cst_146 = arith.constant 0.000000e+00 : f32
    %406 = vector.broadcast %cst_146 : f32 to vector<16x128xf32>
    %407 = arith.cmpf olt, %399, %406 : vector<16x128xf32>
    %cst_147 = arith.constant 1.000000e+00 : f32
    %cst_148 = arith.constant 0.000000e+00 : f32
    %408 = vector.broadcast %cst_147 : f32 to vector<16x128xf32>
    %409 = vector.broadcast %cst_148 : f32 to vector<16x128xf32>
    %410 = arith.select %407, %408, %409 : vector<16x128xi1>, vector<16x128xf32>
    %411 = arith.subf %405, %410 : vector<16x128xf32>
    %cst_149 = arith.constant 3.000000e+00 : f32
    %412 = vector.broadcast %cst_149 : f32 to vector<16x128xf32>
    %413 = arith.mulf %411, %412 : vector<16x128xf32>
    %414 = arith.subf %369, %413 : vector<16x128xf32>
    %cst_150 = arith.constant 4.662500e+01 : f32
    %415 = vector.broadcast %cst_150 : f32 to vector<16x128xf32>
    %cst_151 = arith.constant 4.075000e+01 : f32
    %416 = vector.broadcast %cst_151 : f32 to vector<16x128xf32>
    %cst_152 = arith.constant 1.500000e+00 : f32
    %417 = vector.broadcast %cst_152 : f32 to vector<16x128xf32>
    %418 = arith.cmpf olt, %414, %417 : vector<16x128xf32>
    %cst_153 = arith.constant 1.950000e+01 : f32
    %419 = vector.broadcast %cst_153 : f32 to vector<16x128xf32>
    %420 = arith.select %418, %419, %415 : vector<16x128xi1>, vector<16x128xf32>
    %cst_154 = arith.constant 2.475000e+01 : f32
    %421 = vector.broadcast %cst_154 : f32 to vector<16x128xf32>
    %422 = arith.select %418, %421, %416 : vector<16x128xi1>, vector<16x128xf32>
    %cst_155 = arith.constant 5.000000e-01 : f32
    %423 = vector.broadcast %cst_155 : f32 to vector<16x128xf32>
    %424 = arith.cmpf olt, %414, %423 : vector<16x128xf32>
    %cst_156 = arith.constant 1.450000e+01 : f32
    %425 = vector.broadcast %cst_156 : f32 to vector<16x128xf32>
    %426 = arith.select %424, %425, %420 : vector<16x128xi1>, vector<16x128xf32>
    %cst_157 = arith.constant 1.125000e+01 : f32
    %427 = vector.broadcast %cst_157 : f32 to vector<16x128xf32>
    %428 = arith.select %424, %427, %422 : vector<16x128xi1>, vector<16x128xf32>
    %c4_158 = arith.constant 4 : index
    %429 = arith.index_cast %342 : i32 to index
    %c0_159 = arith.constant 0 : index
    %430 = vector.load %arg3[%c4_158, %429, %c0_159] : memref<8x32x128xf32, #tpu.memory_space<vmem>>, vector<1x16x128xf32>
    %431 = vector.shape_cast %430 : vector<1x16x128xf32> to vector<16x128xf32>
    %cst_160 = arith.constant 1.000000e+00 : f32
    %432 = vector.broadcast %cst_160 : f32 to vector<16x128xf32>
    %433 = arith.cmpf oeq, %431, %432 : vector<16x128xf32>
    %434 = arith.andi %433, %350 : vector<16x128xi1>
    %c0_161 = arith.constant 0 : index
    %435 = arith.index_cast %342 : i32 to index
    %c0_162 = arith.constant 0 : index
    %436 = vector.load %arg2[%c0_161, %435, %c0_162] : memref<8x32x128xf32, #tpu.memory_space<vmem>>, vector<1x16x128xf32>
    %437 = vector.shape_cast %436 : vector<1x16x128xf32> to vector<16x128xf32>
    %438 = arith.negf %437 : vector<16x128xf32>
    %439 = math.exp %438 : vector<16x128xf32>
    %cst_163 = arith.constant 1.000000e+00 : f32
    %440 = vector.broadcast %cst_163 : f32 to vector<16x128xf32>
    %441 = arith.addf %440, %439 : vector<16x128xf32>
    %442 = arith.divf %440, %441 : vector<16x128xf32>
    %c1_164 = arith.constant 1 : index
    %443 = arith.index_cast %342 : i32 to index
    %c0_165 = arith.constant 0 : index
    %444 = vector.load %arg2[%c1_164, %443, %c0_165] : memref<8x32x128xf32, #tpu.memory_space<vmem>>, vector<1x16x128xf32>
    %445 = vector.shape_cast %444 : vector<1x16x128xf32> to vector<16x128xf32>
    %446 = arith.negf %445 : vector<16x128xf32>
    %447 = math.exp %446 : vector<16x128xf32>
    %cst_166 = arith.constant 1.000000e+00 : f32
    %448 = vector.broadcast %cst_166 : f32 to vector<16x128xf32>
    %449 = arith.addf %448, %447 : vector<16x128xf32>
    %450 = arith.divf %448, %449 : vector<16x128xf32>
    %c2_167 = arith.constant 2 : index
    %451 = arith.index_cast %342 : i32 to index
    %c0_168 = arith.constant 0 : index
    %452 = vector.load %arg2[%c2_167, %451, %c0_168] : memref<8x32x128xf32, #tpu.memory_space<vmem>>, vector<1x16x128xf32>
    %453 = vector.shape_cast %452 : vector<1x16x128xf32> to vector<16x128xf32>
    %454 = arith.negf %453 : vector<16x128xf32>
    %455 = math.exp %454 : vector<16x128xf32>
    %cst_169 = arith.constant 1.000000e+00 : f32
    %456 = vector.broadcast %cst_169 : f32 to vector<16x128xf32>
    %457 = arith.addf %456, %455 : vector<16x128xf32>
    %458 = arith.divf %456, %457 : vector<16x128xf32>
    %c3_170 = arith.constant 3 : index
    %459 = arith.index_cast %342 : i32 to index
    %c0_171 = arith.constant 0 : index
    %460 = vector.load %arg2[%c3_170, %459, %c0_171] : memref<8x32x128xf32, #tpu.memory_space<vmem>>, vector<1x16x128xf32>
    %461 = vector.shape_cast %460 : vector<1x16x128xf32> to vector<16x128xf32>
    %462 = arith.negf %461 : vector<16x128xf32>
    %463 = math.exp %462 : vector<16x128xf32>
    %cst_172 = arith.constant 1.000000e+00 : f32
    %464 = vector.broadcast %cst_172 : f32 to vector<16x128xf32>
    %465 = arith.addf %464, %463 : vector<16x128xf32>
    %466 = arith.divf %464, %465 : vector<16x128xf32>
    %cst_173 = arith.constant 2.000000e+00 : f32
    %467 = vector.broadcast %cst_173 : f32 to vector<16x128xf32>
    %468 = arith.mulf %442, %467 : vector<16x128xf32>
    %cst_174 = arith.constant 5.000000e-01 : f32
    %469 = vector.broadcast %cst_174 : f32 to vector<16x128xf32>
    %470 = arith.subf %468, %469 : vector<16x128xf32>
    %471 = arith.addf %470, %393 : vector<16x128xf32>
    %cst_175 = arith.constant 2.000000e+00 : f32
    %472 = vector.broadcast %cst_175 : f32 to vector<16x128xf32>
    %473 = arith.mulf %450, %472 : vector<16x128xf32>
    %cst_176 = arith.constant 5.000000e-01 : f32
    %474 = vector.broadcast %cst_176 : f32 to vector<16x128xf32>
    %475 = arith.subf %473, %474 : vector<16x128xf32>
    %476 = arith.addf %475, %393 : vector<16x128xf32>
    %cst_177 = arith.constant 2.000000e+00 : f32
    %477 = vector.broadcast %cst_177 : f32 to vector<16x128xf32>
    %478 = arith.mulf %458, %477 : vector<16x128xf32>
    %479 = arith.mulf %478, %478 : vector<16x128xf32>
    %480 = arith.mulf %479, %426 : vector<16x128xf32>
    %cst_178 = arith.constant 2.000000e+00 : f32
    %481 = vector.broadcast %cst_178 : f32 to vector<16x128xf32>
    %482 = arith.mulf %466, %481 : vector<16x128xf32>
    %483 = arith.mulf %482, %482 : vector<16x128xf32>
    %484 = arith.mulf %483, %428 : vector<16x128xf32>
    %c0_179 = arith.constant 0 : index
    %485 = arith.index_cast %342 : i32 to index
    %c0_180 = arith.constant 0 : index
    %486 = vector.load %arg3[%c0_179, %485, %c0_180] : memref<8x32x128xf32, #tpu.memory_space<vmem>>, vector<1x16x128xf32>
    %487 = vector.shape_cast %486 : vector<1x16x128xf32> to vector<16x128xf32>
    %c1_181 = arith.constant 1 : index
    %488 = arith.index_cast %342 : i32 to index
    %c0_182 = arith.constant 0 : index
    %489 = vector.load %arg3[%c1_181, %488, %c0_182] : memref<8x32x128xf32, #tpu.memory_space<vmem>>, vector<1x16x128xf32>
    %490 = vector.shape_cast %489 : vector<1x16x128xf32> to vector<16x128xf32>
    %c2_183 = arith.constant 2 : index
    %491 = arith.index_cast %342 : i32 to index
    %c0_184 = arith.constant 0 : index
    %492 = vector.load %arg3[%c2_183, %491, %c0_184] : memref<8x32x128xf32, #tpu.memory_space<vmem>>, vector<1x16x128xf32>
    %493 = vector.shape_cast %492 : vector<1x16x128xf32> to vector<16x128xf32>
    %c3_185 = arith.constant 3 : index
    %494 = arith.index_cast %342 : i32 to index
    %c0_186 = arith.constant 0 : index
    %495 = vector.load %arg3[%c3_185, %494, %c0_186] : memref<8x32x128xf32, #tpu.memory_space<vmem>>, vector<1x16x128xf32>
    %496 = vector.shape_cast %495 : vector<1x16x128xf32> to vector<16x128xf32>
    %cst_187 = arith.constant 5.000000e-01 : f32
    %497 = vector.broadcast %cst_187 : f32 to vector<16x128xf32>
    %498 = arith.mulf %480, %497 : vector<16x128xf32>
    %499 = arith.subf %471, %498 : vector<16x128xf32>
    %cst_188 = arith.constant 5.000000e-01 : f32
    %500 = vector.broadcast %cst_188 : f32 to vector<16x128xf32>
    %501 = arith.mulf %480, %500 : vector<16x128xf32>
    %502 = arith.addf %471, %501 : vector<16x128xf32>
    %cst_189 = arith.constant 5.000000e-01 : f32
    %503 = vector.broadcast %cst_189 : f32 to vector<16x128xf32>
    %504 = arith.mulf %484, %503 : vector<16x128xf32>
    %505 = arith.subf %476, %504 : vector<16x128xf32>
    %cst_190 = arith.constant 5.000000e-01 : f32
    %506 = vector.broadcast %cst_190 : f32 to vector<16x128xf32>
    %507 = arith.mulf %484, %506 : vector<16x128xf32>
    %508 = arith.addf %476, %507 : vector<16x128xf32>
    %cst_191 = arith.constant 5.000000e-01 : f32
    %509 = vector.broadcast %cst_191 : f32 to vector<16x128xf32>
    %510 = arith.mulf %493, %509 : vector<16x128xf32>
    %511 = arith.subf %487, %510 : vector<16x128xf32>
    %cst_192 = arith.constant 5.000000e-01 : f32
    %512 = vector.broadcast %cst_192 : f32 to vector<16x128xf32>
    %513 = arith.mulf %493, %512 : vector<16x128xf32>
    %514 = arith.addf %487, %513 : vector<16x128xf32>
    %cst_193 = arith.constant 5.000000e-01 : f32
    %515 = vector.broadcast %cst_193 : f32 to vector<16x128xf32>
    %516 = arith.mulf %496, %515 : vector<16x128xf32>
    %517 = arith.subf %490, %516 : vector<16x128xf32>
    %cst_194 = arith.constant 5.000000e-01 : f32
    %518 = vector.broadcast %cst_194 : f32 to vector<16x128xf32>
    %519 = arith.mulf %496, %518 : vector<16x128xf32>
    %520 = arith.addf %490, %519 : vector<16x128xf32>
    %521 = arith.minimumf %502, %514 : vector<16x128xf32>
    %522 = arith.maximumf %499, %511 : vector<16x128xf32>
    %523 = arith.subf %521, %522 : vector<16x128xf32>
    %cst_195 = arith.constant 0.000000e+00 : f32
    %524 = vector.broadcast %cst_195 : f32 to vector<16x128xf32>
    %525 = arith.maximumf %523, %524 : vector<16x128xf32>
    %526 = arith.minimumf %508, %520 : vector<16x128xf32>
    %527 = arith.maximumf %505, %517 : vector<16x128xf32>
    %528 = arith.subf %526, %527 : vector<16x128xf32>
    %cst_196 = arith.constant 0.000000e+00 : f32
    %529 = vector.broadcast %cst_196 : f32 to vector<16x128xf32>
    %530 = arith.maximumf %528, %529 : vector<16x128xf32>
    %531 = arith.mulf %525, %530 : vector<16x128xf32>
    %532 = arith.mulf %480, %484 : vector<16x128xf32>
    %533 = arith.mulf %493, %484 : vector<16x128xf32>
    %534 = arith.addf %533, %532 : vector<16x128xf32>
    %535 = arith.subf %534, %531 : vector<16x128xf32>
    %536 = tpu.reciprocal %535 {approx = true} : vector<16x128xf32> -> vector<16x128xf32>
    %537 = arith.mulf %531, %536 : vector<16x128xf32>
    %538 = arith.maximumf %502, %514 : vector<16x128xf32>
    %539 = arith.minimumf %499, %511 : vector<16x128xf32>
    %540 = arith.subf %538, %539 : vector<16x128xf32>
    %cst_197 = arith.constant 0.000000e+00 : f32
    %541 = vector.broadcast %cst_197 : f32 to vector<16x128xf32>
    %542 = arith.maximumf %540, %541 : vector<16x128xf32>
    %543 = arith.maximumf %508, %520 : vector<16x128xf32>
    %544 = arith.minimumf %505, %517 : vector<16x128xf32>
    %545 = arith.subf %543, %544 : vector<16x128xf32>
    %cst_198 = arith.constant 0.000000e+00 : f32
    %546 = vector.broadcast %cst_198 : f32 to vector<16x128xf32>
    %547 = arith.maximumf %545, %546 : vector<16x128xf32>
    %548 = arith.mulf %542, %547 : vector<16x128xf32>
    %549 = arith.subf %548, %535 : vector<16x128xf32>
    %550 = tpu.reciprocal %548 {approx = true} : vector<16x128xf32> -> vector<16x128xf32>
    %551 = arith.mulf %549, %550 : vector<16x128xf32>
    %552 = arith.subf %537, %551 : vector<16x128xf32>
    %cst_199 = arith.constant 0.000000e+00 : f32
    %553 = vector.broadcast %cst_199 : f32 to vector<16x128xf32>
    %c5_200 = arith.constant 5 : index
    %554 = arith.index_cast %342 : i32 to index
    %c0_201 = arith.constant 0 : index
    %555 = vector.load %arg2[%c5_200, %554, %c0_201] : memref<8x32x128xf32, #tpu.memory_space<vmem>>, vector<1x16x128xf32>
    %556 = vector.shape_cast %555 : vector<1x16x128xf32> to vector<16x128xf32>
    %cst_202 = arith.constant -16.1180954 : f32
    %cst_203 = arith.constant 16.1180954 : f32
    %557 = vector.broadcast %cst_202 : f32 to vector<16x128xf32>
    %558 = arith.maximumf %557, %556 : vector<16x128xf32>
    %559 = vector.broadcast %cst_203 : f32 to vector<16x128xf32>
    %560 = arith.minimumf %559, %558 : vector<16x128xf32>
    %c5_204 = arith.constant 5 : index
    %561 = arith.index_cast %342 : i32 to index
    %c0_205 = arith.constant 0 : index
    %562 = vector.load %arg3[%c5_204, %561, %c0_205] : memref<8x32x128xf32, #tpu.memory_space<vmem>>, vector<1x16x128xf32>
    %563 = vector.shape_cast %562 : vector<1x16x128xf32> to vector<16x128xf32>
    %cst_206 = arith.constant 1.000000e+00 : f32
    %564 = vector.broadcast %cst_206 : f32 to vector<16x128xf32>
    %565 = arith.mulf %563, %564 : vector<16x128xf32>
    %cst_207 = arith.constant 0.000000e+00 : f32
    %566 = vector.broadcast %cst_207 : f32 to vector<16x128xf32>
    %567 = arith.addf %565, %566 : vector<16x128xf32>
    %cst_208 = arith.constant 0.000000e+00 : f32
    %568 = vector.broadcast %cst_208 : f32 to vector<16x128xf32>
    %569 = arith.maximumf %560, %568 : vector<16x128xf32>
    %570 = math.absf %560 : vector<16x128xf32>
    %cst_209 = arith.constant 0.000000e+00 : f32
    %571 = vector.broadcast %cst_209 : f32 to vector<16x128xf32>
    %572 = arith.subf %571, %570 : vector<16x128xf32>
    %573 = math.exp %572 : vector<16x128xf32>
    %cst_210 = arith.constant 1.000000e+00 : f32
    %574 = vector.broadcast %cst_210 : f32 to vector<16x128xf32>
    %575 = arith.addf %574, %573 : vector<16x128xf32>
    %576 = math.log %575 : vector<16x128xf32>
    %577 = arith.addf %569, %576 : vector<16x128xf32>
    %578 = arith.mulf %567, %560 : vector<16x128xf32>
    %579 = arith.subf %577, %578 : vector<16x128xf32>
    %580 = arith.addf %553, %579 : vector<16x128xf32>
    %c6_211 = arith.constant 6 : index
    %581 = arith.index_cast %342 : i32 to index
    %c0_212 = arith.constant 0 : index
    %582 = vector.load %arg2[%c6_211, %581, %c0_212] : memref<8x32x128xf32, #tpu.memory_space<vmem>>, vector<1x16x128xf32>
    %583 = vector.shape_cast %582 : vector<1x16x128xf32> to vector<16x128xf32>
    %cst_213 = arith.constant -16.1180954 : f32
    %cst_214 = arith.constant 16.1180954 : f32
    %584 = vector.broadcast %cst_213 : f32 to vector<16x128xf32>
    %585 = arith.maximumf %584, %583 : vector<16x128xf32>
    %586 = vector.broadcast %cst_214 : f32 to vector<16x128xf32>
    %587 = arith.minimumf %586, %585 : vector<16x128xf32>
    %c6_215 = arith.constant 6 : index
    %588 = arith.index_cast %342 : i32 to index
    %c0_216 = arith.constant 0 : index
    %589 = vector.load %arg3[%c6_215, %588, %c0_216] : memref<8x32x128xf32, #tpu.memory_space<vmem>>, vector<1x16x128xf32>
    %590 = vector.shape_cast %589 : vector<1x16x128xf32> to vector<16x128xf32>
    %cst_217 = arith.constant 1.000000e+00 : f32
    %591 = vector.broadcast %cst_217 : f32 to vector<16x128xf32>
    %592 = arith.mulf %590, %591 : vector<16x128xf32>
    %cst_218 = arith.constant 0.000000e+00 : f32
    %593 = vector.broadcast %cst_218 : f32 to vector<16x128xf32>
    %594 = arith.addf %592, %593 : vector<16x128xf32>
    %cst_219 = arith.constant 0.000000e+00 : f32
    %595 = vector.broadcast %cst_219 : f32 to vector<16x128xf32>
    %596 = arith.maximumf %587, %595 : vector<16x128xf32>
    %597 = math.absf %587 : vector<16x128xf32>
    %cst_220 = arith.constant 0.000000e+00 : f32
    %598 = vector.broadcast %cst_220 : f32 to vector<16x128xf32>
    %599 = arith.subf %598, %597 : vector<16x128xf32>
    %600 = math.exp %599 : vector<16x128xf32>
    %cst_221 = arith.constant 1.000000e+00 : f32
    %601 = vector.broadcast %cst_221 : f32 to vector<16x128xf32>
    %602 = arith.addf %601, %600 : vector<16x128xf32>
    %603 = math.log %602 : vector<16x128xf32>
    %604 = arith.addf %596, %603 : vector<16x128xf32>
    %605 = arith.mulf %594, %587 : vector<16x128xf32>
    %606 = arith.subf %604, %605 : vector<16x128xf32>
    %607 = arith.addf %580, %606 : vector<16x128xf32>
    %c7_222 = arith.constant 7 : index
    %608 = arith.index_cast %342 : i32 to index
    %c0_223 = arith.constant 0 : index
    %609 = vector.load %arg2[%c7_222, %608, %c0_223] : memref<8x32x128xf32, #tpu.memory_space<vmem>>, vector<1x16x128xf32>
    %610 = vector.shape_cast %609 : vector<1x16x128xf32> to vector<16x128xf32>
    %cst_224 = arith.constant -16.1180954 : f32
    %cst_225 = arith.constant 16.1180954 : f32
    %611 = vector.broadcast %cst_224 : f32 to vector<16x128xf32>
    %612 = arith.maximumf %611, %610 : vector<16x128xf32>
    %613 = vector.broadcast %cst_225 : f32 to vector<16x128xf32>
    %614 = arith.minimumf %613, %612 : vector<16x128xf32>
    %c7_226 = arith.constant 7 : index
    %615 = arith.index_cast %342 : i32 to index
    %c0_227 = arith.constant 0 : index
    %616 = vector.load %arg3[%c7_226, %615, %c0_227] : memref<8x32x128xf32, #tpu.memory_space<vmem>>, vector<1x16x128xf32>
    %617 = vector.shape_cast %616 : vector<1x16x128xf32> to vector<16x128xf32>
    %cst_228 = arith.constant 1.000000e+00 : f32
    %618 = vector.broadcast %cst_228 : f32 to vector<16x128xf32>
    %619 = arith.mulf %617, %618 : vector<16x128xf32>
    %cst_229 = arith.constant 0.000000e+00 : f32
    %620 = vector.broadcast %cst_229 : f32 to vector<16x128xf32>
    %621 = arith.addf %619, %620 : vector<16x128xf32>
    %cst_230 = arith.constant 0.000000e+00 : f32
    %622 = vector.broadcast %cst_230 : f32 to vector<16x128xf32>
    %623 = arith.maximumf %614, %622 : vector<16x128xf32>
    %624 = math.absf %614 : vector<16x128xf32>
    %cst_231 = arith.constant 0.000000e+00 : f32
    %625 = vector.broadcast %cst_231 : f32 to vector<16x128xf32>
    %626 = arith.subf %625, %624 : vector<16x128xf32>
    %627 = math.exp %626 : vector<16x128xf32>
    %cst_232 = arith.constant 1.000000e+00 : f32
    %628 = vector.broadcast %cst_232 : f32 to vector<16x128xf32>
    %629 = arith.addf %628, %627 : vector<16x128xf32>
    %630 = math.log %629 : vector<16x128xf32>
    %631 = arith.addf %623, %630 : vector<16x128xf32>
    %632 = arith.mulf %621, %614 : vector<16x128xf32>
    %633 = arith.subf %631, %632 : vector<16x128xf32>
    %634 = arith.addf %607, %633 : vector<16x128xf32>
    %cst_233 = arith.constant 0.000000e+00 : f32
    %635 = vector.broadcast %cst_233 : f32 to vector<16x128xf32>
    %636 = arith.maximumf %552, %635 : vector<16x128xf32>
    %cst_234 = arith.constant 0.000000e+00 : f32
    %637 = vector.broadcast %cst_234 : f32 to vector<16x128xf32>
    %638 = arith.select %434, %636, %637 : vector<16x128xi1>, vector<16x128xf32>
    %c4_235 = arith.constant 4 : index
    %639 = arith.index_cast %342 : i32 to index
    %c0_236 = arith.constant 0 : index
    %640 = vector.load %arg2[%c4_235, %639, %c0_236] : memref<8x32x128xf32, #tpu.memory_space<vmem>>, vector<1x16x128xf32>
    %641 = vector.shape_cast %640 : vector<1x16x128xf32> to vector<16x128xf32>
    %cst_237 = arith.constant -16.1180954 : f32
    %cst_238 = arith.constant 16.1180954 : f32
    %642 = vector.broadcast %cst_237 : f32 to vector<16x128xf32>
    %643 = arith.maximumf %642, %641 : vector<16x128xf32>
    %644 = vector.broadcast %cst_238 : f32 to vector<16x128xf32>
    %645 = arith.minimumf %644, %643 : vector<16x128xf32>
    %cst_239 = arith.constant 0.000000e+00 : f32
    %646 = vector.broadcast %cst_239 : f32 to vector<16x128xf32>
    %647 = arith.maximumf %645, %646 : vector<16x128xf32>
    %648 = math.absf %645 : vector<16x128xf32>
    %cst_240 = arith.constant 0.000000e+00 : f32
    %649 = vector.broadcast %cst_240 : f32 to vector<16x128xf32>
    %650 = arith.subf %649, %648 : vector<16x128xf32>
    %651 = math.exp %650 : vector<16x128xf32>
    %cst_241 = arith.constant 1.000000e+00 : f32
    %652 = vector.broadcast %cst_241 : f32 to vector<16x128xf32>
    %653 = arith.addf %652, %651 : vector<16x128xf32>
    %654 = math.log %653 : vector<16x128xf32>
    %655 = arith.addf %647, %654 : vector<16x128xf32>
    %656 = arith.mulf %638, %645 : vector<16x128xf32>
    %657 = arith.subf %655, %656 : vector<16x128xf32>
    %cst_242 = arith.constant 1.000000e+00 : f32
    %cst_243 = arith.constant 0.000000e+00 : f32
    %658 = vector.broadcast %cst_242 : f32 to vector<16x128xf32>
    %659 = vector.broadcast %cst_243 : f32 to vector<16x128xf32>
    %660 = arith.select %434, %658, %659 : vector<16x128xi1>, vector<16x128xf32>
    %661 = arith.addf %329, %660 : vector<16x128xf32>
    %cst_244 = arith.constant 1.000000e+00 : f32
    %662 = vector.broadcast %cst_244 : f32 to vector<16x128xf32>
    %663 = arith.subf %662, %552 : vector<16x128xf32>
    %cst_245 = arith.constant 0.000000e+00 : f32
    %664 = vector.broadcast %cst_245 : f32 to vector<16x128xf32>
    %665 = arith.select %434, %663, %664 : vector<16x128xi1>, vector<16x128xf32>
    %666 = arith.addf %334, %665 : vector<16x128xf32>
    %cst_246 = arith.constant 0.000000e+00 : f32
    %667 = vector.broadcast %cst_246 : f32 to vector<16x128xf32>
    %668 = arith.select %434, %634, %667 : vector<16x128xi1>, vector<16x128xf32>
    %669 = arith.addf %337, %668 : vector<16x128xf32>
    %cst_247 = arith.constant 0.000000e+00 : f32
    %670 = vector.broadcast %cst_247 : f32 to vector<16x128xf32>
    %671 = arith.select %350, %657, %670 : vector<16x128xi1>, vector<16x128xf32>
    %672 = arith.addf %340, %671 : vector<16x128xf32>
    %c2_i32 = arith.constant 2 : i32
    %c0_248 = arith.constant 0 : index
    %c0_249 = arith.constant 0 : index
    %c0_250 = arith.constant 0 : index
    %673 = vector.load %arg4[%c0_248, %c0_249, %c0_250] : memref<1x16x128xf32, #tpu.memory_space<vmem>>, vector<1x16x128xf32>
    %674 = vector.shape_cast %673 : vector<1x16x128xf32> to vector<16x128xf32>
    %675 = arith.addf %674, %661 : vector<16x128xf32>
    %c0_251 = arith.constant 0 : index
    %c0_252 = arith.constant 0 : index
    %c0_253 = arith.constant 0 : index
    %676 = vector.load %arg4[%c0_251, %c0_252, %c0_253] : memref<1x16x128xf32, #tpu.memory_space<vmem>>, vector<1x16x128xf32>
    %677 = vector.shape_cast %676 : vector<1x16x128xf32> to vector<16x128xf32>
    %678 = vector.shape_cast %675 : vector<16x128xf32> to vector<1x16x128xf32>
    tpu.vector_store %arg4[%c0_251, %c0_252, %c0_253], %678 {strides = array<i32>} : memref<1x16x128xf32, #tpu.memory_space<vmem>>, vector<1x16x128xf32>,
    %c0_254 = arith.constant 0 : index
    %c0_255 = arith.constant 0 : index
    %c0_256 = arith.constant 0 : index
    %679 = vector.load %arg5[%c0_254, %c0_255, %c0_256] : memref<1x16x128xf32, #tpu.memory_space<vmem>>, vector<1x16x128xf32>
    %680 = vector.shape_cast %679 : vector<1x16x128xf32> to vector<16x128xf32>
    %681 = arith.addf %680, %666 : vector<16x128xf32>
    %c0_257 = arith.constant 0 : index
    %c0_258 = arith.constant 0 : index
    %c0_259 = arith.constant 0 : index
    %682 = vector.load %arg5[%c0_257, %c0_258, %c0_259] : memref<1x16x128xf32, #tpu.memory_space<vmem>>, vector<1x16x128xf32>
    %683 = vector.shape_cast %682 : vector<1x16x128xf32> to vector<16x128xf32>
    %684 = vector.shape_cast %681 : vector<16x128xf32> to vector<1x16x128xf32>
    tpu.vector_store %arg5[%c0_257, %c0_258, %c0_259], %684 {strides = array<i32>} : memref<1x16x128xf32, #tpu.memory_space<vmem>>, vector<1x16x128xf32>,
    %c0_260 = arith.constant 0 : index
    %c0_261 = arith.constant 0 : index
    %c0_262 = arith.constant 0 : index
    %685 = vector.load %arg6[%c0_260, %c0_261, %c0_262] : memref<1x16x128xf32, #tpu.memory_space<vmem>>, vector<1x16x128xf32>
    %686 = vector.shape_cast %685 : vector<1x16x128xf32> to vector<16x128xf32>
    %687 = arith.addf %686, %669 : vector<16x128xf32>
    %c0_263 = arith.constant 0 : index
    %c0_264 = arith.constant 0 : index
    %c0_265 = arith.constant 0 : index
    %688 = vector.load %arg6[%c0_263, %c0_264, %c0_265] : memref<1x16x128xf32, #tpu.memory_space<vmem>>, vector<1x16x128xf32>
    %689 = vector.shape_cast %688 : vector<1x16x128xf32> to vector<16x128xf32>
    %690 = vector.shape_cast %687 : vector<16x128xf32> to vector<1x16x128xf32>
    tpu.vector_store %arg6[%c0_263, %c0_264, %c0_265], %690 {strides = array<i32>} : memref<1x16x128xf32, #tpu.memory_space<vmem>>, vector<1x16x128xf32>,
    %c0_266 = arith.constant 0 : index
    %c0_267 = arith.constant 0 : index
    %c0_268 = arith.constant 0 : index
    %691 = vector.load %arg7[%c0_266, %c0_267, %c0_268] : memref<1x16x128xf32, #tpu.memory_space<vmem>>, vector<1x16x128xf32>
    %692 = vector.shape_cast %691 : vector<1x16x128xf32> to vector<16x128xf32>
    %693 = arith.addf %692, %672 : vector<16x128xf32>
    %c0_269 = arith.constant 0 : index
    %c0_270 = arith.constant 0 : index
    %c0_271 = arith.constant 0 : index
    %694 = vector.load %arg7[%c0_269, %c0_270, %c0_271] : memref<1x16x128xf32, #tpu.memory_space<vmem>>, vector<1x16x128xf32>
    %695 = vector.shape_cast %694 : vector<1x16x128xf32> to vector<16x128xf32>
    %696 = vector.shape_cast %693 : vector<16x128xf32> to vector<1x16x128xf32>
    tpu.vector_store %arg7[%c0_269, %c0_270, %c0_271], %696 {strides = array<i32>} : memref<1x16x128xf32, #tpu.memory_space<vmem>>, vector<1x16x128xf32>,
    return
  }
  func.func @transform_0(%arg0: i32, %arg1: i32) -> (i32, i32, i32) {
    %c1_i32 = arith.constant 1 : i32
    %0 = arith.muli %arg0, %c1_i32 : i32
    %1 = arith.addi %0, %arg1 : i32
    %c0_i32 = arith.constant 0 : i32
    %c0_i32_0 = arith.constant 0 : i32
    %c0_i32_1 = arith.constant 0 : i32
    return %c0_i32, %1, %c0_i32_0 : i32, i32, i32
  }
  func.func @transform_1(%arg0: i32, %arg1: i32) -> (i32, i32, i32) {
    %c1_i32 = arith.constant 1 : i32
    %0 = arith.muli %arg0, %c1_i32 : i32
    %1 = arith.addi %0, %arg1 : i32
    %c0_i32 = arith.constant 0 : i32
    %c0_i32_0 = arith.constant 0 : i32
    %c0_i32_1 = arith.constant 0 : i32
    return %c0_i32, %1, %c0_i32_0 : i32, i32, i32
  }
  func.func @transform_2(%arg0: i32, %arg1: i32) -> (i32, i32, i32) {
    %c0_i32 = arith.constant 0 : i32
    %c0_i32_0 = arith.constant 0 : i32
    %c0_i32_1 = arith.constant 0 : i32
    return %arg0, %c0_i32, %c0_i32_0 : i32, i32, i32
  }
  func.func @transform_3(%arg0: i32, %arg1: i32) -> (i32, i32, i32) {
    %c0_i32 = arith.constant 0 : i32
    %c0_i32_0 = arith.constant 0 : i32
    %c0_i32_1 = arith.constant 0 : i32
    return %arg0, %c0_i32, %c0_i32_0 : i32, i32, i32
  }
  func.func @transform_4(%arg0: i32, %arg1: i32) -> (i32, i32, i32) {
    %c0_i32 = arith.constant 0 : i32
    %c0_i32_0 = arith.constant 0 : i32
    %c0_i32_1 = arith.constant 0 : i32
    return %arg0, %c0_i32, %c0_i32_0 : i32, i32, i32
  }
  func.func @transform_5(%arg0: i32, %arg1: i32) -> (i32, i32, i32) {
    %c0_i32 = arith.constant 0 : i32
    %c0_i32_0 = arith.constant 0 : i32
    %c0_i32_1 = arith.constant 0 : i32
    return %arg0, %c0_i32, %c0_i32_0 : i32, i32, i32
  }
}

</mosaic_0001>

<bundles_post_ra>
// kernel: run.1
= control target key start
LH: loop header
LB: loop body
LE: loop exit
PB: predicated region body
PF: predicated region fallthrough
CT: control target
= control target key end

     0   :  { %s2369_s18 = smov 0   ;;  %s2371_s19 = smov 0   ;;  %s3694_s0 = inlined_call_operand.vmem [shape: f32[8,64,128], index: 0, kind: input, shape index: {}]   ;;  %s3695_s1 = inlined_call_operand.vmem [shape: f32[8,64,128], index: 1, kind: input, shape index: {}]   ;;  %s3696_s2 = inlined_call_operand.vmem [shape: f32[2,16,128], index: 2, kind: output, shape index: {0}]   ;;  %s3697_s3 = inlined_call_operand.vmem [shape: f32[2,16,128], index: 3, kind: output, shape index: {1}]   ;;  %s3698_s4 = inlined_call_operand.vmem [shape: f32[2,16,128], index: 4, kind: output, shape index: {2}]   ;;  %s3699_s5 = inlined_call_operand.vmem [shape: f32[2,16,128], index: 5, kind: output, shape index: {3}]  }
   0x1   :  { %s2373_s20 = smov 0   ;;  %s2375_s21 = smov 0  }
   0x2   :  { %s2377_s22 = smov 0  }
   0x3 LB: > { %s28_s23 = sadd.s32 1, %s2330_s21  ;;  %p44_p1 = scmp.ne.s32.totalorder %s2322_s19, %s2318_s18  ;;  %s2334_s22 = sphi %s2377_s22, %s16_s22   ;;  %s2330_s21 = sphi %s2375_s21, %s3857_s21   ;;  %s2326_s20 = sphi %s2373_s20, %s3856_s20   ;;  %s2322_s19 = sphi %s2371_s19, %s3855_s19   ;;  %s2318_s18 = sphi %s2369_s18, %s3854_s18  }
   0x4   : > { %p30_p0 = scmp.ge.s32.totalorder %s28_s23, 2  ;;  %p45_p2 = scmp.eq.s32.totalorder %s2334_s22, 0 }
   0x5   : > { %s37_s26 = sadd.s32 1, %s2322_s19  ;;  %p1982_p5 = scmp.ge.s32.totalorder %s2334_s22, 2 }
   0x6   : > { %s3859_s23 = smov (%p30_p0, %s28_s23), 0  ;;  %p2400_p3 = por %p45_p2, %p44_p1 }
   0x7   : > { %s34_s25 = ssub.s32 %s2330_s21, %s3859_s23  ;;  %202 = sbr.rel (%p1982_p5) target bundleno = 84 (0x54), region = 16 }
   0x8   : > { %p35_p4 = scmp.eq.s32.totalorder %s34_s25, 0 }
   0xa   : > { %s2408_s27 = scalar_select %p35_p4, %s2322_s19, %s37_s26  }
   0xc   : > { %205 = sbr.rel (!%p2400_p3) target bundleno = 48 (0x30), region = 20  ;;  %s207_s28 = sand.u32 (%p2400_p3), 1, %s2322_s19  }
   0xd   : > { %s2103_s29 = sshll.u32 (%p2400_p3), %s2330_s21, 5  ;;  %s1983_s30 = sshll.u32 (%p2400_p3), %s207_s28, 8 }
   0xe   : > { %s2418_s8 = scalar_lea.vmem (%p2400_p3), %s3694_s0, %s2103_s29  ;;  %s2423_s9 = scalar_lea.vmem (%p2400_p3), [#allocation2], %s1983_s30 }
   0xf   : > { %v304_v0 = vld [vmem:[%s2418_s8] sm:$0xff] (%p2400_p3)  ;;  %v306_v1 = vld [vmem:[%s2418_s8 + $0x8] sm:$0xff] (%p2400_p3)  ;;  %v308_v2 = vld [vmem:[%s2418_s8 + $0x10] sm:$0xff] (%p2400_p3) }
  0x10   : > { %305 = vst [vmem:[%s2423_s9] sm:$0xff] (%p2400_p3), %v304_v0  ;;  %v310_v3 = vld [vmem:[%s2418_s8 + $0x18] sm:$0xff] (%p2400_p3)  ;;  %v312_v4 = vld [vmem:[%s2418_s8 + $0x40] sm:$0xff] (%p2400_p3)  ;;  %v314_v5 = vld [vmem:[%s2418_s8 + $0x48] sm:$0xff] (%p2400_p3) }
  0x11   : > { %307 = vst [vmem:[%s2423_s9 + $0x8] sm:$0xff] %v306_v1  ;;  %v316_v6 = vld [vmem:[%s2418_s8 + $0x50] sm:$0xff]  ;;  %v318_v7 = vld [vmem:[%s2418_s8 + $0x58] sm:$0xff]  ;;  %v320_v8 = vld [vmem:[%s2418_s8 + $0x80] sm:$0xff] }
  0x12   : > { %309 = vst [vmem:[%s2423_s9 + $0x10] sm:$0xff] %v308_v2  ;;  %v322_v9 = vld [vmem:[%s2418_s8 + $0x88] sm:$0xff]  ;;  %v324_v10 = vld [vmem:[%s2418_s8 + $0x90] sm:$0xff]  ;;  %v326_v11 = vld [vmem:[%s2418_s8 + $0x98] sm:$0xff] }
  0x13   : > { %311 = vst [vmem:[%s2423_s9 + $0x18] sm:$0xff] %v310_v3  ;;  %v328_v12 = vld [vmem:[%s2418_s8 + $0xc0] sm:$0xff]  ;;  %v330_v13 = vld [vmem:[%s2418_s8 + $0xc8] sm:$0xff]  ;;  %v332_v14 = vld [vmem:[%s2418_s8 + $0xd0] sm:$0xff] }
  0x14   : > { %313 = vst [vmem:[%s2423_s9 + $0x20] sm:$0xff] %v312_v4  ;;  %v334_v15 = vld [vmem:[%s2418_s8 + $0xd8] sm:$0xff]  ;;  %v336_v16 = vld [vmem:[%s2418_s8 + $0x100] sm:$0xff]  ;;  %v338_v17 = vld [vmem:[%s2418_s8 + $0x108] sm:$0xff] }
  0x15   : > { %315 = vst [vmem:[%s2423_s9 + $0x28] sm:$0xff] %v314_v5  ;;  %v340_v18 = vld [vmem:[%s2418_s8 + $0x110] sm:$0xff]  ;;  %v342_v19 = vld [vmem:[%s2418_s8 + $0x118] sm:$0xff]  ;;  %v344_v20 = vld [vmem:[%s2418_s8 + $0x140] sm:$0xff] }
  0x16   : > { %317 = vst [vmem:[%s2423_s9 + $0x30] sm:$0xff] %v316_v6  ;;  %v346_v21 = vld [vmem:[%s2418_s8 + $0x148] sm:$0xff]  ;;  %v348_v22 = vld [vmem:[%s2418_s8 + $0x150] sm:$0xff]  ;;  %v350_v23 = vld [vmem:[%s2418_s8 + $0x158] sm:$0xff] }
  0x17   : > { %319 = vst [vmem:[%s2423_s9 + $0x38] sm:$0xff] %v318_v7  ;;  %v352_v24 = vld [vmem:[%s2418_s8 + $0x180] sm:$0xff]  ;;  %v354_v25 = vld [vmem:[%s2418_s8 + $0x188] sm:$0xff]  ;;  %v356_v26 = vld [vmem:[%s2418_s8 + $0x190] sm:$0xff] }
  0x18   : > { %321 = vst [vmem:[%s2423_s9 + $0x40] sm:$0xff] %v320_v8  ;;  %v358_v27 = vld [vmem:[%s2418_s8 + $0x198] sm:$0xff]  ;;  %v360_v28 = vld [vmem:[%s2418_s8 + $0x1c0] sm:$0xff]  ;;  %v362_v29 = vld [vmem:[%s2418_s8 + $0x1c8] sm:$0xff] }
  0x19   : > { %323 = vst [vmem:[%s2423_s9 + $0x48] sm:$0xff] %v322_v9  ;;  %v364_v30 = vld [vmem:[%s2418_s8 + $0x1d0] sm:$0xff]  ;;  %v366_v31 = vld [vmem:[%s2418_s8 + $0x1d8] sm:$0xff] }
  0x1a   : > { %325 = vst [vmem:[%s2423_s9 + $0x50] sm:$0xff] %v324_v10 }
  0x1b   : > { %327 = vst [vmem:[%s2423_s9 + $0x58] sm:$0xff] %v326_v11 }
  0x1c   : > { %329 = vst [vmem:[%s2423_s9 + $0x60] sm:$0xff] %v328_v12 }
  0x1d   : > { %331 = vst [vmem:[%s2423_s9 + $0x68] sm:$0xff] %v330_v13 }
  0x1e   : > { %333 = vst [vmem:[%s2423_s9 + $0x70] sm:$0xff] %v332_v14 }
  0x1f   : > { %335 = vst [vmem:[%s2423_s9 + $0x78] sm:$0xff] %v334_v15 }
  0x20   : > { %337 = vst [vmem:[%s2423_s9 + $0x80] sm:$0xff] %v336_v16 }
  0x21   : > { %339 = vst [vmem:[%s2423_s9 + $0x88] sm:$0xff] %v338_v17 }
  0x22   : > { %341 = vst [vmem:[%s2423_s9 + $0x90] sm:$0xff] %v340_v18 }
  0x23   : > { %343 = vst [vmem:[%s2423_s9 + $0x98] sm:$0xff] %v342_v19 }
  0x24   : > { %345 = vst [vmem:[%s2423_s9 + $0xa0] sm:$0xff] %v344_v20 }
  0x25   : > { %347 = vst [vmem:[%s2423_s9 + $0xa8] sm:$0xff] %v346_v21 }
  0x26   : > { %349 = vst [vmem:[%s2423_s9 + $0xb0] sm:$0xff] %v348_v22 }
  0x27   : > { %351 = vst [vmem:[%s2423_s9 + $0xb8] sm:$0xff] %v350_v23 }
  0x28   : > { %353 = vst [vmem:[%s2423_s9 + $0xc0] sm:$0xff] %v352_v24 }
  0x29   : > { %355 = vst [vmem:[%s2423_s9 + $0xc8] sm:$0xff] %v354_v25 }
  0x2a   : > { %357 = vst [vmem:[%s2423_s9 + $0xd0] sm:$0xff] %v356_v26 }
  0x2b   : > { %359 = vst [vmem:[%s2423_s9 + $0xd8] sm:$0xff] %v358_v27 }
  0x2c   : > { %361 = vst [vmem:[%s2423_s9 + $0xe0] sm:$0xff] %v360_v28 }
  0x2d   : > { %363 = vst [vmem:[%s2423_s9 + $0xe8] sm:$0xff] %v362_v29 }
  0x2e   : > { %365 = vst [vmem:[%s2423_s9 + $0xf0] sm:$0xff] %v364_v30 }
  0x2f   : > { %367 = vst [vmem:[%s2423_s9 + $0xf8] sm:$0xff] %v366_v31 }
  0x30 PF: > { %373 = sbr.rel (!%p2400_p3) target bundleno = 84 (0x54), region = 58  ;;  %s375_s10 = sand.u32 (%p2400_p3), 1, %s2322_s19  }
  0x31   : > { %s2104_s11 = sshll.u32 (%p2400_p3), %s2330_s21, 5  ;;  %s1986_s12 = sshll.u32 (%p2400_p3), %s375_s10, 8 }
  0x32   : > { %s2493_s15 = scalar_lea.vmem (%p2400_p3), %s3695_s1, %s2104_s11  ;;  %s2498_s16 = scalar_lea.vmem (%p2400_p3), [#allocation3], %s1986_s12 }
  0x33   : > { %v472_v32 = vld [vmem:[%s2493_s15] sm:$0xff] (%p2400_p3)  ;;  %v474_v33 = vld [vmem:[%s2493_s15 + $0x8] sm:$0xff] (%p2400_p3)  ;;  %v476_v34 = vld [vmem:[%s2493_s15 + $0x10] sm:$0xff] (%p2400_p3) }
  0x34   : > { %473 = vst [vmem:[%s2498_s16] sm:$0xff] (%p2400_p3), %v472_v32  ;;  %v478_v35 = vld [vmem:[%s2493_s15 + $0x18] sm:$0xff] (%p2400_p3)  ;;  %v480_v36 = vld [vmem:[%s2493_s15 + $0x40] sm:$0xff] (%p2400_p3)  ;;  %v482_v37 = vld [vmem:[%s2493_s15 + $0x48] sm:$0xff] (%p2400_p3) }
  0x35   : > { %475 = vst [vmem:[%s2498_s16 + $0x8] sm:$0xff] %v474_v33  ;;  %v484_v38 = vld [vmem:[%s2493_s15 + $0x50] sm:$0xff]  ;;  %v486_v39 = vld [vmem:[%s2493_s15 + $0x58] sm:$0xff]  ;;  %v488_v40 = vld [vmem:[%s2493_s15 + $0x80] sm:$0xff] }
  0x36   : > { %477 = vst [vmem:[%s2498_s16 + $0x10] sm:$0xff] %v476_v34  ;;  %v490_v41 = vld [vmem:[%s2493_s15 + $0x88] sm:$0xff]  ;;  %v492_v42 = vld [vmem:[%s2493_s15 + $0x90] sm:$0xff]  ;;  %v494_v43 = vld [vmem:[%s2493_s15 + $0x98] sm:$0xff] }
  0x37   : > { %479 = vst [vmem:[%s2498_s16 + $0x18] sm:$0xff] %v478_v35  ;;  %v496_v44 = vld [vmem:[%s2493_s15 + $0xc0] sm:$0xff]  ;;  %v498_v45 = vld [vmem:[%s2493_s15 + $0xc8] sm:$0xff]  ;;  %v500_v46 = vld [vmem:[%s2493_s15 + $0xd0] sm:$0xff] }
  0x38   : > { %481 = vst [vmem:[%s2498_s16 + $0x20] sm:$0xff] %v480_v36  ;;  %v502_v47 = vld [vmem:[%s2493_s15 + $0xd8] sm:$0xff]  ;;  %v504_v48 = vld [vmem:[%s2493_s15 + $0x100] sm:$0xff]  ;;  %v506_v49 = vld [vmem:[%s2493_s15 + $0x108] sm:$0xff] }
  0x39   : > { %483 = vst [vmem:[%s2498_s16 + $0x28] sm:$0xff] %v482_v37  ;;  %v508_v50 = vld [vmem:[%s2493_s15 + $0x110] sm:$0xff]  ;;  %v510_v51 = vld [vmem:[%s2493_s15 + $0x118] sm:$0xff]  ;;  %v512_v52 = vld [vmem:[%s2493_s15 + $0x140] sm:$0xff] }
  0x3a   : > { %485 = vst [vmem:[%s2498_s16 + $0x30] sm:$0xff] %v484_v38  ;;  %v514_v53 = vld [vmem:[%s2493_s15 + $0x148] sm:$0xff]  ;;  %v516_v54 = vld [vmem:[%s2493_s15 + $0x150] sm:$0xff]  ;;  %v518_v55 = vld [vmem:[%s2493_s15 + $0x158] sm:$0xff] }
  0x3b   : > { %487 = vst [vmem:[%s2498_s16 + $0x38] sm:$0xff] %v486_v39  ;;  %v520_v56 = vld [vmem:[%s2493_s15 + $0x180] sm:$0xff]  ;;  %v522_v57 = vld [vmem:[%s2493_s15 + $0x188] sm:$0xff]  ;;  %v524_v58 = vld [vmem:[%s2493_s15 + $0x190] sm:$0xff] }
  0x3c   : > { %489 = vst [vmem:[%s2498_s16 + $0x40] sm:$0xff] %v488_v40  ;;  %v526_v59 = vld [vmem:[%s2493_s15 + $0x198] sm:$0xff]  ;;  %v528_v60 = vld [vmem:[%s2493_s15 + $0x1c0] sm:$0xff]  ;;  %v530_v61 = vld [vmem:[%s2493_s15 + $0x1c8] sm:$0xff] }
  0x3d   : > { %491 = vst [vmem:[%s2498_s16 + $0x48] sm:$0xff] %v490_v41  ;;  %v532_v62 = vld [vmem:[%s2493_s15 + $0x1d0] sm:$0xff]  ;;  %v534_v63 = vld [vmem:[%s2493_s15 + $0x1d8] sm:$0xff] }
  0x3e   : > { %493 = vst [vmem:[%s2498_s16 + $0x50] sm:$0xff] %v492_v42 }
  0x3f   : > { %495 = vst [vmem:[%s2498_s16 + $0x58] sm:$0xff] %v494_v43 }
  0x40   : > { %497 = vst [vmem:[%s2498_s16 + $0x60] sm:$0xff] %v496_v44 }
  0x41   : > { %499 = vst [vmem:[%s2498_s16 + $0x68] sm:$0xff] %v498_v45 }
  0x42   : > { %501 = vst [vmem:[%s2498_s16 + $0x70] sm:$0xff] %v500_v46 }
  0x43   : > { %503 = vst [vmem:[%s2498_s16 + $0x78] sm:$0xff] %v502_v47 }
  0x44   : > { %505 = vst [vmem:[%s2498_s16 + $0x80] sm:$0xff] %v504_v48 }
  0x45   : > { %507 = vst [vmem:[%s2498_s16 + $0x88] sm:$0xff] %v506_v49 }
  0x46   : > { %509 = vst [vmem:[%s2498_s16 + $0x90] sm:$0xff] %v508_v50 }
  0x47   : > { %511 = vst [vmem:[%s2498_s16 + $0x98] sm:$0xff] %v510_v51 }
  0x48   : > { %513 = vst [vmem:[%s2498_s16 + $0xa0] sm:$0xff] %v512_v52 }
  0x49   : > { %515 = vst [vmem:[%s2498_s16 + $0xa8] sm:$0xff] %v514_v53 }
  0x4a   : > { %517 = vst [vmem:[%s2498_s16 + $0xb0] sm:$0xff] %v516_v54 }
  0x4b   : > { %519 = vst [vmem:[%s2498_s16 + $0xb8] sm:$0xff] %v518_v55 }
  0x4c   : > { %521 = vst [vmem:[%s2498_s16 + $0xc0] sm:$0xff] %v520_v56 }
  0x4d   : > { %523 = vst [vmem:[%s2498_s16 + $0xc8] sm:$0xff] %v522_v57 }
  0x4e   : > { %525 = vst [vmem:[%s2498_s16 + $0xd0] sm:$0xff] %v524_v58 }
  0x4f   : > { %527 = vst [vmem:[%s2498_s16 + $0xd8] sm:$0xff] %v526_v59 }
  0x50   : > { %529 = vst [vmem:[%s2498_s16 + $0xe0] sm:$0xff] %v528_v60 }
  0x51   : > { %531 = vst [vmem:[%s2498_s16 + $0xe8] sm:$0xff] %v530_v61 }
  0x52   : > { %533 = vst [vmem:[%s2498_s16 + $0xf0] sm:$0xff] %v532_v62 }
  0x53   : > { %535 = vst [vmem:[%s2498_s16 + $0xf8] sm:$0xff] %v534_v63 }
  0x54 PF: > { %p1989_p6 = scmp.ge.s32.totalorder %s2334_s22, 1  ;;  %p540_p7 = scmp.lt.s32.totalorder %s2334_s22, 3 }
  0x56   : > { %p541_p8 = pnand %p1989_p6, %p540_p7 }
  0x58   : > { %544 = sbr.rel (%p541_p8) target bundleno = 334 (0x14e), region = 96 }
  0x5d   : > { %s547_s17 = sand.u32 1, %s2318_s18   ;;  %v638_v0 = vlaneseq  ;;  %s2000_s25 = sshll.u32 %s2326_s20, 5  ;;  %v3706_v42 = vmov 0.0  }
  0x5e   : > { %s2564_s24 = sshll.u32 %s547_s17, 8  ;;  %v644_v2 = vstv %s2000_s25  ;;  %s2958_s28 = sadd.s32 16, %s2000_s25 }
  0x5f   : > { %v2567_v1 = vshrl.u32 %v638_v0, 7  ;;  %v2571_v3 = vand.u32 127, %v638_v0  ;;  %s2574_s26 = scalar_lea.vmem [#allocation2], %s2564_s24  ;;  %s2856_s18 = scalar_lea.vmem [#allocation3], %s2564_s24 }
  0x60   : > { %v747_v4 = vld [vmem:[%s2574_s26] sm:$0xff]  ;;  %v748_v5 = vld [vmem:[%s2574_s26 + $0x8] sm:$0xff]  ;;  %p604_p9 = scmp.lt.s32.totalorder %s2326_s20, 1 }
  0x61   : > { %v2005_v6 = vld [vmem:[%s2574_s26 + $0x20] sm:$0xff]  ;;  %v2580_v7 = vadd.s32 8, %v2567_v1  ;;  %v645_v8 = vadd.s32 %v644_v2, %v2567_v1  ;;  %v2003_v9 = vmul.f32 -1.442695, %v747_v4  ;;  %v2004_v10 = vmul.f32 -1.442695, %v748_v5 }
  0x62   : > { %v2007_v11 = vmul.f32 -1.442695, %v2005_v6  ;;  %v2006_v14 = vld [vmem:[%s2574_s26 + $0x28] sm:$0xff]  ;;  %v2009_v31 = vld [vmem:[%s2574_s26 + $0x40] sm:$0xff]  ;;  %s3861_s20 = smov (!%p604_p9, %s2326_s20), 1 }
  0x63   : > { %v646_v12 = vadd.s32 %v644_v2, %v2580_v7  ;;  %v647_v13 = vmul.u32 128, %v645_v8  ;;  %2152 = vpow2.f32 %v2003_v9  ;;  %v2008_v19 = vmul.f32 -1.442695, %v2006_v14  ;;  %v2010_v32 = vld [vmem:[%s2574_s26 + $0x48] sm:$0xff]  ;;  %v2013_v36 = vld [vmem:[%s2574_s26 + $0x60] sm:$0xff]  ;;  %s3577_s29 = sshll.u32 %s3861_s20, 4 }
  0x64   : > { %2154 = vpow2.f32 %v2004_v10  ;;  %v2014_v37 = vld [vmem:[%s2574_s26 + $0x68] sm:$0xff]  ;;  %v2011_v38 = vmul.f32 -1.442695, %v2009_v31  ;;  %v2012_v41 = vmul.f32 -1.442695, %v2010_v32  ;;  %s608_s6 = scalar_lea.vmem %s3696_s2, %s3577_s29  ;;  %s613_s9 = scalar_lea.vmem %s3697_s3, %s3577_s29 }
  0x65   : > { %v648_v15 = vmul.u32 128, %v646_v12  ;;  %v2586_v16 = vadd.s32 %v647_v13, %v2571_v3  ;;  %2156 = vpow2.f32 %v2007_v11  ;;  %v2015_v45 = vmul.f32 -1.442695, %v2013_v36  ;;  %s618_s12 = scalar_lea.vmem %s3698_s4, %s3577_s29  ;;  %s623_s15 = scalar_lea.vmem %s3699_s5, %s3577_s29 }
  0x66   : > { %2158 = vpow2.f32 %v2008_v19  ;;  %v2016_v46 = vmul.f32 -1.442695, %v2014_v37 }
  0x67   : > { %3724 = vst [vmem:[#allocation4_spill] sm:$0xff] %v2586_v16  ;;  %v2589_v17 = vadd.s32 %v648_v15, %v2571_v3  ;;  %v653_v18 = vcvt.s32.f32 %v2586_v16 }
  0x69   : > { %3725 = vst [vmem:[#allocation5_spill] sm:$0xff] %v2589_v17  ;;  %v2153_v20 = vpop.eup %2152  ;;  %v2593_v21 = vcvt.s32.f32 %v2589_v17  ;;  %v655_v22 = vmul.f32 0.015625, %v653_v18 }
  0x6a   : > { %v2155_v23 = vpop.eup %2154  ;;  %v2595_v24 = vadd.f32 1.0, %v2153_v20 }
  0x6b   : > { %v656_v25 = vmul.f32 0.015625, %v2593_v21  ;;  %v657_v26 = vfloor.f32 %v655_v22  ;;  %v2157_v27 = vpop.eup %2156  ;;  %v2598_v28 = vadd.f32 1.0, %v2155_v23 }
  0x6c   : > { %2160 = vrcp.f32 %v2595_v24  ;;  %v2604_v35 = vadd.f32 1.0, %v2157_v27  ;;  %v2159_v39 = vpop.eup %2158  ;;  %v766_v5 = vand.u32 2147483647, %v2595_v24  ;;  %v768_v6 = vand.u32 2147483648, %v2595_v24 }
  0x6d   : > { %v658_v29 = vfloor.f32 %v656_v25  ;;  %v659_v30 = vmul.f32 64.0, %v657_v26  ;;  %2162 = vrcp.f32 %v2598_v28  ;;  %v2616_v51 = vadd.f32 1.0, %v2159_v39 }
  0x6e   : > { %2164 = vrcp.f32 %v2604_v35  ;;  %v781_v8 = vand.u32 2147483647, %v2598_v28  ;;  %vm762_vm4 = vweird.f32 %v2595_v24  ;;  %vm777_vm6 = vweird.f32 %v2598_v28 }
  0x6f   : > { %v660_v33 = vmul.f32 64.0, %v658_v29  ;;  %v661_v34 = vsub.f32 %v653_v18, %v659_v30  ;;  %2166 = vpow2.f32 %v2011_v38  ;;  %vm804_vm8 = vweird.f32 %v2604_v35 }
  0x70   : > { %2168 = vpow2.f32 %v2012_v41 }
  0x71   : > { %v662_v40 = vsub.f32 %v2593_v21, %v660_v33  ;;  %vm663_vm0 = vcmp.ge.f32.partialorder %v661_v34, 64.0  ;;  %vm669_vm1 = vcmp.lt.f32.partialorder %v661_v34, 0.0  ;;  %2170 = vpow2.f32 %v2015_v45 }
  0x72   : > { %v665_v43 = vsel %vm663_vm0, 1.0, %v3706_v42  ;;  %v671_v44 = vsel %vm669_vm1, 1.0, %v3706_v42  ;;  %v2611_v47 = vpop.eup %2160  ;;  %2172 = vpow2.f32 %v2016_v46 }
  0x73   : > { %vm664_vm2 = vcmp.ge.f32.partialorder %v662_v40, 64.0  ;;  %v667_v48 = vadd.f32 %v665_v43, %v657_v26  ;;  %vm670_vm3 = vcmp.lt.f32.partialorder %v662_v40, 0.0  ;;  %v2618_v52 = vpop.eup %2162  ;;  %v758_v55 = vmul.f32 %v2611_v47, %v2595_v24 }
  0x74   : > { %v666_v49 = vsel %vm664_vm2, 1.0, %v3706_v42  ;;  %v672_v50 = vsel %vm670_vm3, 1.0, %v3706_v42  ;;  %v773_v59 = vmul.f32 %v2618_v52, %v2598_v28  ;;  %2174 = vrcp.f32 %v2616_v51  ;;  %v2631_v60 = vpop.eup %2164 }
  0x75   : > { %v668_v53 = vadd.f32 %v666_v49, %v658_v29  ;;  %v2620_v54 = vsub.f32 %v667_v48, %v671_v44  ;;  %v2637_v2 = vpop.eup %2166  ;;  %v759_v4 = vsub.f32 1.0, %v758_v55  ;;  %vm763_vm5 = vweird.f32 %v2611_v47 }
  0x76   : > { %v2642_v9 = vpop.eup %2168  ;;  %v774_v15 = vsub.f32 1.0, %v773_v59  ;;  %v800_v19 = vmul.f32 %v2631_v60, %v2604_v35  ;;  %vm778_vm7 = vweird.f32 %v2618_v52  ;;  %vm805_vm9 = vweird.f32 %v2631_v60  ;;  %vm2686_vm2 = vmor %vm762_vm4, %vm763_vm5 }
  0x77   : > { %v2624_v56 = vsub.f32 %v668_v53, %v672_v50  ;;  %v675_v57 = vmul.f32 64.0, %v2620_v54  ;;  %v703_v58 = vmul.f32 0.33333334, %v2620_v54  ;;  %v2648_v14 = vpop.eup %2170  ;;  %v760_v27 = vmul.f32 %v2611_v47, %v759_v4  ;;  %vm2718_vm5 = vmor %vm804_vm8, %vm805_vm9 }
  0x78   : > { %v2655_v20 = vpop.eup %2172  ;;  %v810_v29 = vand.u32 2147483648, %v2604_v35  ;;  %v775_v34 = vmul.f32 %v2618_v52, %v774_v15  ;;  %v801_v36 = vsub.f32 1.0, %v800_v19  ;;  %vm2690_vm3 = vcmp.eq.f32.partialorder %v766_v5, 8.507059e+37 }
  0x79   : > { %v676_v61 = vmul.f32 64.0, %v2624_v56  ;;  %v2634_v62 = vsub.f32 %v653_v18, %v675_v57  ;;  %v704_v63 = vmul.f32 0.33333334, %v2624_v56  ;;  %v705_v0 = vfloor.f32 %v703_v58 }
  0x7a   : > { %v783_v18 = vand.u32 2147483648, %v2598_v28  ;;  %v2660_v26 = vpop.eup %2174  ;;  %v802_v50 = vmul.f32 %v2631_v60, %v801_v36  ;;  %v761_v57 = vadd.f32 %v2611_v47, %v760_v27  ;;  %v769_v15 = vor.u32 1.1754944e-38, %v768_v6 }
  0x7b   : > { %v2645_v10 = vsub.f32 %v2593_v21, %v676_v61  ;;  %v679_v11 = vmul.f32 0.125, %v2634_v62  ;;  %v706_v12 = vfloor.f32 %v704_v63  ;;  %v707_v13 = vmul.f32 3.0, %v705_v0 }
  0x7c   : > { %v815_v43 = vmul.f32 %v2660_v26, %v2616_v51  ;;  %v803_v5 = vadd.f32 %v2631_v60, %v802_v50  ;;  %vm2710_vm4 = vcmp.eq.f32.partialorder %v781_v8, 8.507059e+37  ;;  %v784_v6 = vor.u32 1.1754944e-38, %v783_v18 }
  0x7d   : > { %v680_v21 = vmul.f32 0.125, %v2645_v10  ;;  %v681_v22 = vfloor.f32 %v679_v11  ;;  %v708_v23 = vmul.f32 3.0, %v706_v12  ;;  %v709_v25 = vsub.f32 %v2620_v54, %v707_v13 }
  0x7e   : > { %v776_v11 = vadd.f32 %v2618_v52, %v775_v34  ;;  %v811_v28 = vor.u32 1.1754944e-38, %v810_v29  ;;  %v2727_v8 = vadd.f32 1.0, %v2637_v2  ;;  %v825_v2 = vand.u32 2147483648, %v2616_v51 }
  0x7f   : > { %v682_v30 = vfloor.f32 %v680_v21  ;;  %v683_v31 = vmul.f32 8.0, %v681_v22  ;;  %v710_v32 = vsub.f32 %v2624_v56, %v708_v23  ;;  %vm711_vm10 = vcmp.ge.f32.partialorder %v709_v25, 3.0 }
  0x80   : > { %v713_v33 = vsel %vm711_vm10, 1.0, %v3706_v42  ;;  %vm717_vm11 = vcmp.lt.f32.partialorder %v709_v25, 0.0  ;;  %vm2701_vm10 = vmor %vm777_vm6, %vm778_vm7  ;;  %v808_v21 = vand.u32 2147483647, %v2604_v35  ;;  %vm819_vm7 = vweird.f32 %v2616_v51 }
  0x81   : > { %v684_v37 = vmul.f32 8.0, %v682_v30  ;;  %v685_v38 = vsub.f32 %v2634_v62, %v683_v31  ;;  %vm712_vm12 = vcmp.ge.f32.partialorder %v710_v32, 3.0  ;;  %v715_v39 = vadd.f32 %v713_v33, %v705_v0 }
  0x82   : > { %v714_v40 = vsel %vm712_vm12, 1.0, %v3706_v42  ;;  %vm718_vm13 = vcmp.lt.f32.partialorder %v710_v32, 0.0  ;;  %v719_v41 = vsel %vm717_vm11, 1.0, %v3706_v42  ;;  %v780_v35 = vsel %vm2701_vm10, %v2618_v52, %v776_v11 }
  0x83   : > { %v686_v44 = vsub.f32 %v2645_v10, %v684_v37  ;;  %vm687_vm14 = vcmp.ge.f32.partialorder %v685_v38, 8.0  ;;  %vm693_vm15 = vcmp.lt.f32.partialorder %v685_v38, 0.0  ;;  %v716_v45 = vadd.f32 %v714_v40, %v706_v12 }
  0x84   : > { %v689_v46 = vsel %vm687_vm14, 1.0, %v3706_v42  ;;  %v720_v48 = vsel %vm718_vm13, 1.0, %v3706_v42  ;;  %v721_v49 = vsub.f32 %v715_v39, %v719_v41  ;;  %v695_v59 = vsel %vm693_vm15, 1.0, %v3706_v42 }
  0x85   : > { %vm688_vm0 = vcmp.ge.f32.partialorder %v686_v44, 8.0  ;;  %v691_v53 = vadd.f32 %v689_v46, %v681_v22  ;;  %v722_v55 = vsub.f32 %v716_v45, %v720_v48  ;;  %vm694_vm1 = vcmp.lt.f32.partialorder %v686_v44, 0.0 }
  0x86   : > { %v690_v58 = vsel %vm688_vm0, 1.0, %v3706_v42  ;;  %v723_v61 = vmul.f32 3.0, %v721_v49  ;;  %v816_v12 = vsub.f32 1.0, %v815_v43  ;;  %v696_v22 = vsel %vm694_vm1, 1.0, %v3706_v42 }
  0x87   : > { %v724_v63 = vmul.f32 3.0, %v722_v55  ;;  %v692_v13 = vadd.f32 %v690_v58, %v682_v30  ;;  %v697_v23 = vsub.f32 %v691_v53, %v695_v59  ;;  %v765_v30 = vsel %vm2686_vm2, %v2611_v47, %v761_v57 }
  0x88   : > { %v725_v27 = vsub.f32 %v2620_v54, %v723_v61  ;;  %v817_v31 = vmul.f32 %v2660_v26, %v816_v12  ;;  %v823_v32 = vand.u32 2147483647, %v2616_v51  ;;  %v807_v47 = vsel %vm2718_vm5, %v2631_v60, %v803_v5 }
  0x89   : > { %v2730_v18 = vsub.f32 %v2624_v56, %v724_v63  ;;  %v698_v54 = vsub.f32 %v692_v13, %v696_v22  ;;  %vm809_vm6 = vcmp.eq.f32.partialorder %v808_v21, 8.507059e+37  ;;  %v699_v29 = vmul.f32 8.0, %v697_v23 }
  0x8a   : > { %v770_v56 = vsel %vm2690_vm3, %v769_v15, %v765_v30  ;;  %vm820_vm8 = vweird.f32 %v2660_v26  ;;  %vm727_vm9 = vcmp.lt.f32.partialorder %v725_v27, 1.5  ;;  %v785_v52 = vsel %vm2710_vm4, %v784_v6, %v780_v35 }
  0x8b   : > { %v840_v33 = vadd.f32 1.0, %v2642_v9  ;;  %2176 = vrcp.f32 %v2727_v8  ;;  %vm728_vm11 = vcmp.lt.f32.partialorder %v2730_v18, 1.5  ;;  %v2750_v60 = vsel %vm809_vm6, %v811_v28, %v807_v47  ;;  %vm2757_vm14 = vmor %vm819_vm7, %vm820_vm8 }
  0x8c   : > { %v818_v34 = vadd.f32 %v2660_v26, %v817_v31  ;;  %vm2753_vm12 = vcmp.eq.f32.partialorder %v823_v32, 8.507059e+37  ;;  %v700_v51 = vmul.f32 8.0, %v698_v54  ;;  %vm733_vm13 = vcmp.lt.f32.partialorder %v725_v27, 0.5 }
  0x8d   : > { %v826_v38 = vor.u32 1.1754944e-38, %v825_v2  ;;  %2178 = vrcp.f32 %v840_v33  ;;  %v2762_v9 = vsub.f32 %v2634_v62, %v699_v29  ;;  %v3702_v39 = vmov 46.625  }
  0x8e   : > { %v729_v40 = vsel %vm727_vm9, 19.5, %v3702_v39  ;;  %v2767_v41 = vadd.f32 1.0, %v2648_v14  ;;  %v2770_v43 = vadd.f32 1.0, %v2655_v20  ;;  %v730_v44 = vsel %vm728_vm11, 19.5, %v3702_v39 }
  0x8f   : > { %v3700_v45 = vmov 40.75   ;;  %vm734_vm15 = vcmp.lt.f32.partialorder %v2730_v18, 0.5  ;;  %v850_v62 = vand.u32 2147483647, %v2727_v8  ;;  %v822_v20 = vsel %vm2757_vm14, %v2660_v26, %v818_v34 }
  0x90   : > { %v731_v46 = vsel %vm727_vm9, 24.75, %v3700_v45  ;;  %v2782_v14 = vsel %vm728_vm11, 24.75, %v3700_v45  ;;  %v852_v48 = vand.u32 2147483648, %v2727_v8  ;;  %2180 = vrcp.f32 %v2767_v41 }
  0x91   : > { %v2177_v49 = vpop.eup %2176  ;;  %v2790_v50 = vsub.f32 %v2645_v10, %v700_v51  ;;  %v865_v53 = vand.u32 2147483647, %v840_v33  ;;  %v867_v55 = vand.u32 2147483648, %v840_v33  ;;  %2182 = vrcp.f32 %v2770_v43 }
  0x92   : > { %v2794_v57 = vsel %vm733_vm13, 14.5, %v729_v40  ;;  %v2798_v58 = vsel %vm734_vm15, 14.5, %v730_v44  ;;  %v2801_v26 = vsel %vm733_vm13, 11.25, %v731_v46  ;;  %v842_v59 = vmul.f32 %v2177_v49, %v2727_v8 }
  0x93   : > { %v2179_v61 = vpop.eup %2178  ;;  %v827_v10 = vsel %vm2753_vm12, %v826_v38, %v822_v20  ;;  %vm846_vm0 = vweird.f32 %v2727_v8  ;;  %vm2807_vm1 = vcmp.eq.f32.partialorder %v850_v62, 8.507059e+37  ;;  %vm861_vm2 = vweird.f32 %v840_v33  ;;  %v2021_v8 = vld [vmem:[%s2856_s18 + $0x20] sm:$0xff] }
  0x94   : > { %v843_v0 = vsub.f32 1.0, %v842_v59  ;;  %vm847_vm3 = vweird.f32 %v2177_v49  ;;  %v853_v4 = vor.u32 1.1754944e-38, %v852_v48  ;;  %v857_v11 = vmul.f32 %v2179_v61, %v840_v33 }
  0x95   : > { %vm2811_vm10 = vcmp.eq.f32.partialorder %v865_v53, 8.507059e+37  ;;  %v868_v13 = vor.u32 1.1754944e-38, %v867_v55  ;;  %v892_v15 = vand.u32 2147483647, %v2767_v41  ;;  %v913_v19 = vmul.f32 2.0, %v770_v56  ;;  %vm2818_vm5 = vmor %vm846_vm0, %vm847_vm3 }
  0x96   : > { %v2181_v5 = vpop.eup %2180  ;;  %v844_v21 = vmul.f32 %v2177_v49, %v843_v0  ;;  %v858_v22 = vsub.f32 1.0, %v857_v11  ;;  %vm862_vm4 = vweird.f32 %v2179_v61  ;;  %v914_v23 = vmul.f32 2.0, %v785_v52 }
  0x97   : > { %v2183_v24 = vpop.eup %2182  ;;  %v884_v25 = vmul.f32 %v2181_v5, %v2767_v41  ;;  %vm888_vm6 = vweird.f32 %v2767_v41  ;;  %v894_v27 = vand.u32 2147483648, %v2767_v41  ;;  %vm903_vm7 = vweird.f32 %v2770_v43  ;;  %vm2829_vm8 = vmor %vm861_vm2, %vm862_vm4 }
  0x98   : > { %v845_v30 = vadd.f32 %v2177_v49, %v844_v21  ;;  %v859_v28 = vmul.f32 %v2179_v61, %v858_v22  ;;  %v899_v35 = vmul.f32 %v2183_v24, %v2770_v43  ;;  %v907_v31 = vand.u32 2147483647, %v2770_v43  ;;  %v937_v22 = vld [vmem:[%s2856_s18] sm:$0xff] }
  0x99   : > { %v885_v32 = vsub.f32 1.0, %v884_v25  ;;  %vm889_vm9 = vweird.f32 %v2181_v5  ;;  %vm2833_vm11 = vcmp.eq.f32.partialorder %v892_v15, 8.507059e+37  ;;  %v909_v47 = vand.u32 2147483648, %v2770_v43  ;;  %v2025_v43 = vld [vmem:[%s2856_s18 + $0x60] sm:$0xff] }
  0x9a   : > { %v849_v2 = vsel %vm2818_vm5, %v2177_v49, %v845_v30  ;;  %v860_v29 = vadd.f32 %v2179_v61, %v859_v28  ;;  %v900_v56 = vsub.f32 1.0, %v899_v35  ;;  %vm904_vm12 = vweird.f32 %v2183_v24  ;;  %vm2847_vm13 = vmor %vm888_vm6, %vm889_vm9 }
  0x9b   : > { %v854_v52 = vsel %vm2807_vm1, %v853_v4, %v849_v2  ;;  %v886_v33 = vmul.f32 %v2181_v5, %v885_v32  ;;  %v895_v34 = vor.u32 1.1754944e-38, %v894_v27  ;;  %v919_v36 = vmul.f32 2.0, %v2750_v60  ;;  %v2859_v60 = vld [vmem:[%s2856_s18 + $0x40] sm:$0xff]  ;;  %vm2865_vm0 = vmor %vm903_vm7, %vm904_vm12 }
  0x9c   : > { %v864_v51 = vsel %vm2829_vm8, %v2179_v61, %v860_v29  ;;  %v901_v38 = vmul.f32 %v2183_v24, %v900_v56  ;;  %vm2851_vm14 = vcmp.eq.f32.partialorder %v907_v31, 8.507059e+37  ;;  %v925_v44 = vmul.f32 2.0, %v854_v52  ;;  %v2870_v61 = vld [vmem:[%s2856_s18 + $0x48] sm:$0xff] }
  0x9d   : > { %v869_v41 = vsel %vm2811_vm10, %v868_v13, %v864_v51  ;;  %v887_v46 = vadd.f32 %v2181_v5, %v886_v33  ;;  %v910_v20 = vor.u32 1.1754944e-38, %v909_v47  ;;  %v920_v48 = vmul.f32 2.0, %v827_v10  ;;  %v2022_v29 = vld [vmem:[%s2856_s18 + $0x28] sm:$0xff]  ;;  %v2027_v33 = vld [vmem:[%s2574_s26 + $0xa0] sm:$0xff] }
  0x9e   : > { %v902_v49 = vadd.f32 %v2183_v24, %v901_v38  ;;  %v2017_v53 = vadd.f32 -0.5, %v913_v19  ;;  %v926_v55 = vmul.f32 2.0, %v869_v41  ;;  %v927_v59 = vmul.f32 %v925_v44, %v925_v44  ;;  %v2028_v41 = vld [vmem:[%s2574_s26 + $0xa8] sm:$0xff] }
  0x9f   : > { %v891_v63 = vsel %vm2847_vm13, %v2181_v5, %v887_v46  ;;  %v2018_v0 = vadd.f32 -0.5, %v914_v23  ;;  %v2019_v4 = vadd.f32 -0.5, %v919_v36  ;;  %v960_v11 = vmul.f32 0.5, %v2859_v60  ;;  %v2026_v23 = vld [vmem:[%s2856_s18 + $0x68] sm:$0xff] }
  0xa0   : > { %v896_v10 = vsel %vm2833_vm11, %v895_v34, %v891_v63  ;;  %v906_v12 = vsel %vm2865_vm0, %v2183_v24, %v902_v49  ;;  %v928_v13 = vmul.f32 %v926_v55, %v926_v55  ;;  %v2881_v15 = vmul.f32 %v927_v59, %v2794_v57  ;;  %v938_v57 = vld [vmem:[%s2856_s18 + $0x8] sm:$0xff] }
  0xa1   : > { %v911_v19 = vsel %vm2851_vm14, %v910_v20, %v906_v12  ;;  %v2020_v5 = vadd.f32 -0.5, %v920_v48  ;;  %v931_v21 = vmul.f32 2.0, %v896_v10  ;;  %v961_v6 = vmul.f32 0.5, %v2870_v61 }
  0xa2   : > { %v738_v25 = vsel %vm734_vm15, 11.25, %v2782_v14  ;;  %v2892_v24 = vmul.f32 %v928_v13, %v2798_v58  ;;  %v932_v27 = vmul.f32 2.0, %v911_v19  ;;  %v966_v30 = vmul.f32 0.5, %v2025_v43 }
  0xa3   : > { %v917_v28 = vadd.f32 %v2017_v53, %v2762_v9  ;;  %v918_v35 = vadd.f32 %v2018_v0, %v2790_v50  ;;  %v933_v31 = vmul.f32 %v931_v21, %v931_v21  ;;  %v948_v32 = vmul.f32 0.5, %v2881_v15 }
  0xa4   : > { %v923_v54 = vadd.f32 %v2019_v4, %v2762_v9  ;;  %v934_v18 = vmul.f32 %v932_v27, %v932_v27  ;;  %v962_v14 = vsub.f32 %v937_v22, %v960_v11  ;;  %v967_v47 = vmul.f32 0.5, %v2026_v23 }
  0xa5   : > { %v924_v58 = vadd.f32 %v2020_v5, %v2790_v50  ;;  %v935_v2 = vmul.f32 %v933_v31, %v2801_v26  ;;  %v949_v56 = vmul.f32 0.5, %v2892_v24  ;;  %v963_v52 = vsub.f32 %v938_v57, %v961_v6 }
  0xa6   : > { %v936_v34 = vmul.f32 %v934_v18, %v738_v25  ;;  %v964_v36 = vadd.f32 %v960_v11, %v937_v22  ;;  %v965_v51 = vadd.f32 %v961_v6, %v938_v57  ;;  %v968_v37 = vsub.f32 %v2021_v8, %v966_v30 }
  0xa7   : > { %v950_v38 = vsub.f32 %v917_v28, %v948_v32  ;;  %v952_v40 = vadd.f32 %v948_v32, %v917_v28  ;;  %v954_v9 = vmul.f32 0.5, %v935_v2  ;;  %v970_v44 = vadd.f32 %v2021_v8, %v966_v30 }
  0xa8   : > { %v955_v46 = vmul.f32 0.5, %v936_v34  ;;  %v969_v62 = vsub.f32 %v2022_v29, %v967_v47  ;;  %v971_v20 = vadd.f32 %v2022_v29, %v967_v47  ;;  %v2906_v50 = vclamps-f32 %v2027_v33, 16.118095 }
  0xa9   : > { %v951_v26 = vsub.f32 %v918_v35, %v949_v56  ;;  %v953_v48 = vadd.f32 %v949_v56, %v918_v35  ;;  %v956_v49 = vsub.f32 %v923_v54, %v954_v9  ;;  %v958_v53 = vadd.f32 %v954_v9, %v923_v54  ;;  %v2033_v56 = vld [vmem:[%s2574_s26 + $0xc0] sm:$0xff] }
  0xaa   : > { %v957_v55 = vsub.f32 %v924_v58, %v955_v46  ;;  %v959_v59 = vadd.f32 %v955_v46, %v924_v58  ;;  %v2908_v63 = vclamps-f32 %v2028_v41, 16.118095  ;;  %v972_v0 = vmin.f32 %v952_v40, %v964_v36 }
  0xab   : > { %v974_v4 = vmax.f32 %v950_v38, %v962_v14  ;;  %v980_v43 = vmin.f32 %v958_v53, %v970_v44  ;;  %v982_v11 = vmax.f32 %v956_v49, %v968_v37  ;;  %v1043_v10 = vand.u32 2147483647, %v2906_v50 }
  0xac   : > { %v973_v12 = vmin.f32 %v953_v48, %v965_v51  ;;  %v975_v13 = vmax.f32 %v951_v26, %v963_v52  ;;  %v981_v19 = vmin.f32 %v959_v59, %v971_v20  ;;  %v983_v5 = vmax.f32 %v957_v55, %v969_v62 }
  0xad   : > { %v976_v21 = vsub.f32 %v972_v0, %v974_v4  ;;  %v984_v22 = vsub.f32 %v980_v43, %v982_v11  ;;  %v1044_v23 = vand.u32 2147483647, %v2908_v63  ;;  %v1002_v6 = vmax.f32 %v952_v40, %v964_v36  ;;  %v2040_v11 = vld [vmem:[%s2574_s26 + $0xe8] sm:$0xff] }
  0xae   : > { %v1004_v25 = vmin.f32 %v950_v38, %v962_v14  ;;  %v1010_v27 = vmax.f32 %v958_v53, %v970_v44  ;;  %v1012_v57 = vmin.f32 %v956_v49, %v968_v37  ;;  %v977_v30 = vsub.f32 %v973_v12, %v975_v13 }
  0xaf   : > { %v985_v28 = vsub.f32 %v981_v19, %v983_v5  ;;  %v1045_v35 = vsub.f32 0.0, %v1043_v10  ;;  %v1003_v31 = vmax.f32 %v953_v48, %v965_v51  ;;  %v1005_v8 = vmin.f32 %v951_v26, %v963_v52  ;;  %v2031_v19 = vld [vmem:[%s2856_s18 + $0xa0] sm:$0xff] }
  0xb0   : > { %v1011_v32 = vmax.f32 %v959_v59, %v971_v20  ;;  %v1013_v54 = vmin.f32 %v957_v55, %v969_v62  ;;  %v978_v18 = vmax.f32 %v976_v21, 0.0  ;;  %v986_v47 = vmax.f32 %v984_v22, 0.0  ;;  %v2034_v20 = vld [vmem:[%s2574_s26 + $0xc8] sm:$0xff]  ;;  %v2039_v59 = vld [vmem:[%s2574_s26 + $0xe0] sm:$0xff] }
  0xb1   : > { %v990_v58 = vmul.f32 %v935_v2, %v2881_v15  ;;  %v992_v29 = vmul.f32 %v2859_v60, %v935_v2  ;;  %v1006_v33 = vsub.f32 %v1002_v6, %v1004_v25  ;;  %v1014_v36 = vsub.f32 %v1010_v27, %v1012_v57  ;;  %v2946_v5 = vld [vmem:[%s2856_s18 + $0x80] sm:$0xff]  ;;  %v2032_v21 = vld [vmem:[%s2856_s18 + $0xa8] sm:$0xff] }
  0xb2   : > { %v1046_v14 = vsub.f32 0.0, %v1044_v23  ;;  %v979_v38 = vmax.f32 %v977_v30, 0.0  ;;  %v987_v37 = vmax.f32 %v985_v28, 0.0  ;;  %v991_v40 = vmul.f32 %v936_v34, %v2892_v24  ;;  %v2037_v22 = vld [vmem:[%s2856_s18 + $0xc0] sm:$0xff] }
  0xb3   : > { %v993_v51 = vmul.f32 %v2870_v61, %v936_v34  ;;  %v1007_v52 = vsub.f32 %v1003_v31, %v1005_v8  ;;  %v1015_v9 = vsub.f32 %v1011_v32, %v1013_v54  ;;  %v1047_v44 = vmul.f32 1.442695, %v1045_v35  ;;  %v2038_v35 = vld [vmem:[%s2856_s18 + $0xc8] sm:$0xff]  ;;  %v2045_v32 = vld [vmem:[%s2574_s26 + $0x80] sm:$0xff] }
  0xb4   : > { %v2917_v41 = vclamps-f32 %v2033_v56, 16.118095  ;;  %v2919_v46 = vmul.f32 %v986_v47, %v978_v18  ;;  %v994_v60 = vadd.f32 %v992_v29, %v990_v58  ;;  %v1008_v15 = vmax.f32 %v1006_v33, 0.0  ;;  %v2977_v56 = vld [vmem:[%s2856_s18 + $0x88] sm:$0xff] }
  0xb5   : > { %v1016_v2 = vmax.f32 %v1014_v36, 0.0  ;;  %v1049_v62 = vmul.f32 1.442695, %v1046_v14  ;;  %v2922_v26 = vmul.f32 %v987_v37, %v979_v38  ;;  %v995_v48 = vadd.f32 %v993_v51, %v991_v40  ;;  %v2046_v38 = vld [vmem:[%s2574_s26 + $0x88] sm:$0xff]  ;;  %v2051_v40 = vld [vmem:[%s2574_s26 + $0x10] sm:$0xff] }
  0xb6   : > { %v1009_v24 = vmax.f32 %v1007_v52, 0.0  ;;  %v1017_v49 = vmax.f32 %v1015_v9, 0.0  ;;  %2184 = vpow2.f32 %v1047_v44  ;;  %v1080_v61 = vand.u32 2147483647, %v2917_v41 }
  0xb7   : > { %v2926_v34 = vsub.f32 %v994_v60, %v2919_v46  ;;  %v2928_v53 = vclamps-f32 %v2034_v20, 16.118095  ;;  %v2930_v55 = vmul.f32 %v1016_v2, %v1008_v15  ;;  %2186 = vpow2.f32 %v1049_v62 }
  0xb8   : > { %v2934_v0 = vsub.f32 %v995_v48, %v2922_v26  ;;  %v2936_v4 = vmul.f32 %v1017_v49, %v1009_v24  ;;  %v1082_v43 = vsub.f32 0.0, %v1080_v61  ;;  %v2941_v12 = vclamps-f32 %v2039_v59, 16.118095 }
  0xb9   : > { %2188 = vrcp.f32 %v2926_v34  ;;  %v1081_v10 = vand.u32 2147483647, %v2928_v53  ;;  %v2951_v23 = vclamps-f32 %v2040_v11, 16.118095  ;;  %v1041_v25 = vmax.f32 %v2906_v50, 0.0 }
  0xba   : > { %3756 = vst [vmem:[#allocation6_spill] sm:$0xff] %v2941_v12  ;;  %2190 = vrcp.f32 %v2930_v55  ;;  %v1042_v27 = vmax.f32 %v2908_v63, 0.0  ;;  %v1084_v57 = vmul.f32 1.442695, %v1082_v43  ;;  %v2961_v28 = vmul.f32 %v2031_v19, %v2906_v50  ;;  %v2044_v43 = vld [vmem:[%s2856_s18 + $0xe8] sm:$0xff] }
  0xbb   : > { %2192 = vrcp.f32 %v2934_v0  ;;  %3757 = vst [vmem:[#allocation7_spill] sm:$0xff] %v2951_v23  ;;  %v1083_v31 = vsub.f32 0.0, %v1081_v10  ;;  %v1117_v8 = vand.u32 2147483647, %v2941_v12  ;;  %vm651_vm15 = vcmp.lt.s32.totalorder %v2586_v16, 384 }
  0xbc   : > { %v2185_v13 = vpop.eup %2184  ;;  %2194 = vrcp.f32 %v2936_v4  ;;  %3758 = vst [vmem:[#allocation8_spill] sm:$0xff] %v2961_v28  ;;  %vm743_vm1 = vcmp.eq.f32.partialorder %v2946_v5, 1.0  ;;  %v2969_v54 = vmul.f32 %v2032_v21, %v2908_v63  ;;  %v2974_v58 = vmul.f32 %v2037_v22, %v2917_v41 }
  0xbd   : > { %v2187_v6 = vpop.eup %2186  ;;  %v1051_v30 = vadd.f32 1.0, %v2185_v13  ;;  %v1020_v33 = vsub.f32 %v2930_v55, %v2926_v34  ;;  %v1118_v14 = vand.u32 2147483647, %v2951_v23  ;;  %v1191_v37 = vstv %s2958_s28  ;;  %vm3027_vm10 = vmand %vm743_vm1, %vm651_vm15 }
  0xbe   : > { %3759 = vst [vmem:[#allocation9_spill] sm:$0xff] %v2969_v54  ;;  %v1052_v36 = vadd.f32 1.0, %v2187_v6  ;;  %v1021_v52 = vsub.f32 %v2936_v4, %v2934_v0  ;;  %2196 = vpow2.f32 %v1084_v57  ;;  %v2988_v9 = vmul.f32 %v2038_v35, %v2928_v53  ;;  %v2052_v0 = vld [vmem:[%s2574_s26 + $0x18] sm:$0xff]  ;;  %v2043_v4 = vld [vmem:[%s2856_s18 + $0xe0] sm:$0xff]  ;;  %v2085_v54 = vld [vmem:[%s2574_s26 + $0xd0] sm:$0xff] }
  0xbf   : > { %v2189_v29 = vpop.eup %2188  ;;  %v2990_v44 = vclamps-f32 %v2045_v32, 16.118095  ;;  %2198 = vlog2.f32 %v1051_v30  ;;  %v1086_v15 = vmul.f32 1.442695, %v1083_v31  ;;  %v1119_v62 = vsub.f32 0.0, %v1117_v8 }
  0xc0   : > { %v2191_v51 = vpop.eup %2190  ;;  %3760 = vst [vmem:[#allocation10_spill] sm:$0xff] %v2988_v9  ;;  %vm652_vm2 = vcmp.lt.s32.totalorder %v2589_v17, 384  ;;  %vm744_vm3 = vcmp.eq.f32.partialorder %v2977_v56, 1.0  ;;  %v2995_v48 = vclamps-f32 %v2046_v38, 16.118095  ;;  %v1192_v24 = vadd.s32 %v1191_v37, %v2567_v1 }
  0xc1   : > { %3761 = vst [vmem:[#allocation11_spill] sm:$0xff] %v2990_v44  ;;  %v2193_v60 = vpop.eup %2192  ;;  %v1193_v49 = vadd.s32 %v1191_v37, %v2580_v7  ;;  %v2053_v61 = vmul.f32 -1.442695, %v2051_v40  ;;  %v1000_v34 = vmul.f32 %v2189_v29, %v2919_v46  ;;  %v1024_v55 = vmul.f32 %v2191_v51, %v1020_v33  ;;  %vm3054_vm4 = vmand %vm744_vm3, %vm652_vm2 }
  0xc2   : > { %v2195_v20 = vpop.eup %2194  ;;  %3762 = vst [vmem:[#allocation12_spill] sm:$0xff] %v2995_v48  ;;  %2200 = vlog2.f32 %v1052_v36  ;;  %v1120_v59 = vsub.f32 0.0, %v1118_v14  ;;  %v1152_v11 = vand.u32 2147483647, %v2990_v44  ;;  %v1194_v10 = vmul.u32 128, %v1192_v24 }
  0xc3   : > { %v1195_v13 = vmul.u32 128, %v1193_v49  ;;  %2202 = vpow2.f32 %v2053_v61  ;;  %v1001_v19 = vmul.f32 %v2193_v60, %v2922_v26  ;;  %v1025_v21 = vmul.f32 %v2195_v20, %v1021_v52 }
  0xc4   : > { %v1121_v7 = vmul.f32 1.442695, %v1119_v62  ;;  %v2197_v22 = vpop.eup %2196  ;;  %v1153_v46 = vand.u32 2147483647, %v2995_v48  ;;  %v3008_v6 = vadd.s32 %v1194_v10, %v2571_v3  ;;  %v2054_v30 = vmul.f32 -1.442695, %v2052_v0 }
  0xc5   : > { %v3011_v57 = vadd.s32 %v1195_v13, %v2571_v3  ;;  %v2199_v35 = vpop.eup %2198  ;;  %v3013_v31 = vsub.f32 %v1000_v34, %v1024_v55  ;;  %2204 = vpow2.f32 %v1086_v15  ;;  %v3016_v26 = vmul.f32 %v2043_v4, %v2941_v12  ;;  %v2055_v15 = vld [vmem:[%s2574_s26 + $0x30] sm:$0xff] }
  0xc6   : > { %v3019_v8 = vmul.f32 %v2044_v43, %v2951_v23  ;;  %v1123_v32 = vmul.f32 1.442695, %v1120_v59  ;;  %v1154_v36 = vsub.f32 0.0, %v1152_v11  ;;  %v3765_v14 = vmov 0 }
  0xc7   : > { %3763 = vst [vmem:[#allocation13_spill] sm:$0xff] %v3016_v26  ;;  %v3766_v14 = vsel %vm3027_vm10, 4294967295, %v3765_v14  ;;  %v3031_v38 = vsub.f32 %v1001_v19, %v1025_v21  ;;  %2206 = vpow2.f32 %v1121_v7  ;;  %v3034_v37 = vcvt.s32.f32 %v3008_v6 }
  0xc8   : > { %3764 = vst [vmem:[#allocation14_spill] sm:$0xff] %v3019_v8  ;;  %v2201_v3 = vpop.eup %2200  ;;  %v3037_v40 = vcvt.s32.f32 %v3011_v57  ;;  %v1054_v52 = vmul.f32 0.6931472, %v2199_v35  ;;  %v1155_v60 = vsub.f32 0.0, %v1153_v46  ;;  %v3042_v5 = vsel %vm3027_vm10, 1.0, %v3706_v42 }
  0xc9   : > { %3767 = vst [vmem:[#allocation15_spill] sm:$0xff] %v3766_v14  ;;  %v2203_v51 = vpop.eup %2202  ;;  %2208 = vpow2.f32 %v2054_v30  ;;  %v1088_v62 = vadd.f32 1.0, %v2197_v22  ;;  %v1139_v20 = vmax.f32 %v3013_v31, 0.0  ;;  %v1202_v24 = vmul.f32 0.015625, %v3034_v37  ;;  %v2056_v30 = vld [vmem:[%s2574_s26 + $0x38] sm:$0xff] }
  0xca   : > { %3768 = vst [vmem:[#allocation16_spill] sm:$0xff] %v3042_v5  ;;  %v1203_v49 = vmul.f32 0.015625, %v3037_v40  ;;  %v1056_v61 = vmul.f32 0.6931472, %v2201_v3  ;;  %2210 = vpow2.f32 %v1123_v32  ;;  %v1156_v34 = vmul.f32 1.442695, %v1154_v36 }
  0xcb   : > { %v3048_v55 = vadd.f32 1.0, %v2203_v51  ;;  %v2205_v59 = vpop.eup %2204  ;;  %v3769_v0 = vmov 0  ;;  %v1140_v4 = vmax.f32 %v3031_v38, 0.0  ;;  %v1204_v43 = vfloor.f32 %v1202_v24 }
  0xcc   : > { %v3770_v0 = vsel %vm3054_vm4, 4294967295, %v3769_v0  ;;  %v1205_v11 = vfloor.f32 %v1203_v49  ;;  %v2057_v10 = vmul.f32 -1.442695, %v2055_v15  ;;  %v3061_v13 = vadd.f32 %v1054_v52, %v1041_v25 }
  0xcd   : > { %3771 = vst [vmem:[#allocation17_spill] sm:$0xff] %v3770_v0  ;;  %v1158_v19 = vmul.f32 1.442695, %v1155_v60  ;;  %v3066_v21 = vsel %vm3054_vm4, 1.0, %v3706_v42  ;;  %2212 = vrcp.f32 %v3048_v55  ;;  %v2207_v56 = vpop.eup %2206  ;;  %v1141_v7 = vsel %vm3027_vm10, %v1139_v20, 0.0  ;;  %v2080_v0 = vld [vmem:[%s2574_s26 + $0xb8] sm:$0xff] }
  0xce   : > { %3772 = vst [vmem:[#allocation18_spill] sm:$0xff] %v3061_v13  ;;  %2214 = vlog2.f32 %v1088_v62  ;;  %v1206_v22 = vmul.f32 64.0, %v1204_v43  ;;  %v1207_v46 = vmul.f32 64.0, %v1205_v11  ;;  %v3074_v50 = vadd.f32 %v1056_v61, %v1042_v27 }
  0xcf   : > { %3773 = vst [vmem:[#allocation19_spill] sm:$0xff] %v3066_v21  ;;  %v2209_v35 = vpop.eup %2208  ;;  %v1089_v25 = vadd.f32 1.0, %v2205_v59  ;;  %2216 = vpow2.f32 %v1156_v34  ;;  %v1176_v32 = vsub.f32 1.0, %v3013_v31  ;;  %v1142_v36 = vsel %vm3054_vm4, %v1140_v4, 0.0 }
  0xd0   : > { %3774 = vst [vmem:[#allocation20_spill] sm:$0xff] %v3074_v50  ;;  %v1208_v3 = vsub.f32 %v3034_v37, %v1206_v22  ;;  %v1209_v51 = vsub.f32 %v3037_v40, %v1207_v46  ;;  %2218 = vpow2.f32 %v2057_v10  ;;  %v2211_v52 = vpop.eup %2210  ;;  %v3084_v63 = vmul.f32 %v2990_v44, %v1141_v7 }
  0xd1   : > { %2220 = vpow2.f32 %v1158_v19  ;;  %v2058_v27 = vmul.f32 -1.442695, %v2056_v30  ;;  %v3086_v31 = vadd.f32 1.0, %v2209_v35  ;;  %v1125_v62 = vadd.f32 1.0, %v2207_v56 }
  0xd2   : > { %3775 = vst [vmem:[#allocation21_spill] sm:$0xff] %v3084_v63  ;;  %vm1210_vm5 = vcmp.ge.f32.partialorder %v1208_v3, 64.0  ;;  %vm1211_vm6 = vcmp.ge.f32.partialorder %v1209_v51, 64.0  ;;  %vm1216_vm7 = vcmp.lt.f32.partialorder %v1208_v3, 0.0  ;;  %vm1217_vm8 = vcmp.lt.f32.partialorder %v1209_v51, 0.0 }
  0xd3   : > { %v3088_v15 = vpop.eup %2212  ;;  %v1212_v20 = vsel %vm1210_vm5, 1.0, %v3706_v42  ;;  %v1213_v24 = vsel %vm1211_vm6, 1.0, %v3706_v42  ;;  %2222 = vlog2.f32 %v1089_v25  ;;  %v1218_v59 = vsel %vm1216_vm7, 1.0, %v3706_v42 }
  0xd4   : > { %v2215_v49 = vpop.eup %2214  ;;  %v1214_v61 = vadd.f32 %v1212_v20, %v1204_v43  ;;  %v1215_v34 = vadd.f32 %v1213_v24, %v1205_v11  ;;  %v1126_v10 = vadd.f32 1.0, %v2211_v52  ;;  %v1219_v19 = vsel %vm1217_vm8, 1.0, %v3706_v42 }
  0xd5   : > { %v3093_v4 = vpop.eup %2216  ;;  %v1306_v7 = vmul.f32 %v3088_v15, %v3048_v55  ;;  %2224 = vpow2.f32 %v2058_v27  ;;  %v3099_v22 = vmul.f32 %v2995_v48, %v1142_v36  ;;  %v3115_v27 = vmul.f32 0.6931472, %v2215_v49 }
  0xd6   : > { %v2219_v56 = vpop.eup %2218  ;;  %v3101_v46 = vsub.f32 %v1214_v61, %v1218_v59  ;;  %v3103_v30 = vsub.f32 %v1215_v34, %v1219_v19  ;;  %2226 = vrcp.f32 %v3086_v31  ;;  %v3119_v20 = vsel %vm3027_vm10, %v1176_v32, 0.0 }
  0xd7   : > { %3776 = vst [vmem:[#allocation22_spill] sm:$0xff] %v3099_v22  ;;  %v3106_v43 = vpop.eup %2220  ;;  %2228 = vlog2.f32 %v1125_v62  ;;  %v1307_v25 = vsub.f32 1.0, %v1306_v7  ;;  %v3121_v24 = vadd.f32 1.0, %v2219_v56  ;;  %vm1310_vm9 = vweird.f32 %v3048_v55 }
  0xd8   : > { %v1222_v3 = vmul.f32 64.0, %v3101_v46  ;;  %v1223_v36 = vmul.f32 64.0, %v3103_v30  ;;  %v1250_v51 = vmul.f32 0.33333334, %v3101_v46  ;;  %v1251_v52 = vmul.f32 0.33333334, %v3103_v30 }
  0xd9   : > { %2230 = vlog2.f32 %v1126_v10  ;;  %3777 = vst [vmem:[#allocation23_spill] sm:$0xff] %v3119_v20  ;;  %v3123_v62 = vpop.eup %2222  ;;  %v1308_v49 = vmul.f32 %v3088_v15, %v1307_v25  ;;  %vm1311_vm11 = vweird.f32 %v3088_v15  ;;  %vm1325_vm12 = vweird.f32 %v3086_v31  ;;  %v2086_v20 = vld [vmem:[%s2574_s26 + $0xd8] sm:$0xff] }
  0xda   : > { %v3126_v61 = vsub.f32 %v3034_v37, %v1222_v3  ;;  %v3129_v34 = vsub.f32 %v3037_v40, %v1223_v36  ;;  %v1252_v59 = vfloor.f32 %v1250_v51  ;;  %v1253_v19 = vfloor.f32 %v1251_v52 }
  0xdb   : > { %v2225_v7 = vpop.eup %2224  ;;  %2232 = vrcp.f32 %v3121_v24  ;;  %v1329_v51 = vand.u32 2147483647, %v3086_v31  ;;  %v1331_v52 = vand.u32 2147483648, %v3086_v31  ;;  %v3153_v47 = vadd.f32 %v3088_v15, %v1308_v49 }
  0xdc   : > { %v3135_v56 = vpop.eup %2226  ;;  %v1226_v33 = vmul.f32 0.125, %v3126_v61  ;;  %v1227_v37 = vmul.f32 0.125, %v3129_v34  ;;  %v1254_v3 = vmul.f32 3.0, %v1252_v59  ;;  %v1255_v40 = vmul.f32 3.0, %v1253_v19 }
  0xdd   : > { %v3141_v36 = vpop.eup %2228  ;;  %v1321_v25 = vmul.f32 %v3135_v56, %v3086_v31  ;;  %vm1326_vm13 = vweird.f32 %v3135_v56  ;;  %v3156_v39 = vadd.f32 1.0, %v2225_v7  ;;  %vm1352_vm1 = vweird.f32 %v3121_v24 }
  0xde   : > { %v1228_v29 = vfloor.f32 %v1226_v33  ;;  %v1229_v11 = vfloor.f32 %v1227_v37  ;;  %v1256_v1 = vsub.f32 %v3101_v46, %v1254_v3  ;;  %v1257_v2 = vsub.f32 %v3103_v30, %v1255_v40 }
  0xdf   : > { %v3150_v60 = vpop.eup %2230  ;;  %v1322_v45 = vsub.f32 1.0, %v1321_v25  ;;  %2234 = vrcp.f32 %v3156_v39  ;;  %v3430_v9 = vclamps-f32 %v2085_v54, 16.118095 }
  0xe0   : > { %3778 = vst [vmem:[#allocation24_spill] sm:$0xff] %v3150_v60  ;;  %v1230_v18 = vmul.f32 8.0, %v1228_v29  ;;  %v1231_v35 = vmul.f32 8.0, %v1229_v11  ;;  %vm1258_vm14 = vcmp.ge.f32.partialorder %v1256_v1, 3.0  ;;  %vm1259_vm0 = vcmp.ge.f32.partialorder %v1257_v2, 3.0 }
  0xe1   : > { %v3159_v33 = vpop.eup %2232  ;;  %v1260_v37 = vsel %vm1258_vm14, 1.0, %v3706_v42  ;;  %v1261_v3 = vsel %vm1259_vm0, 1.0, %v3706_v42  ;;  %vm1264_vm3 = vcmp.lt.f32.partialorder %v1256_v1, 0.0  ;;  %vm1265_vm5 = vcmp.lt.f32.partialorder %v1257_v2, 0.0  ;;  %vm3178_vm0 = vmor %vm1310_vm9, %vm1311_vm11 }
  0xe2   : > { %v1232_v49 = vsub.f32 %v3126_v61, %v1230_v18  ;;  %v1233_v40 = vsub.f32 %v3129_v34, %v1231_v35  ;;  %v1262_v7 = vadd.f32 %v1260_v37, %v1252_v59  ;;  %v1263_v25 = vadd.f32 %v1261_v3, %v1253_v19  ;;  %vm3189_vm9 = vmor %vm1325_vm12, %vm1326_vm13 }
  0xe3   : > { %v1266_v32 = vsel %vm1264_vm3, 1.0, %v3706_v42  ;;  %v1267_v10 = vsel %vm1265_vm5, 1.0, %v3706_v42  ;;  %v1323_v17 = vmul.f32 %v3135_v56, %v1322_v45  ;;  %v1348_v16 = vmul.f32 %v3159_v33, %v3121_v24 }
  0xe4   : > { %vm1234_vm6 = vcmp.ge.f32.partialorder %v1232_v49, 8.0  ;;  %vm1235_vm7 = vcmp.ge.f32.partialorder %v1233_v40, 8.0  ;;  %vm1240_vm8 = vcmp.lt.f32.partialorder %v1232_v49, 0.0  ;;  %vm1241_vm14 = vcmp.lt.f32.partialorder %v1233_v40, 0.0 }
  0xe5   : > { %v1236_v2 = vsel %vm1234_vm6, 1.0, %v3706_v42  ;;  %v1237_v18 = vsel %vm1235_vm7, 1.0, %v3706_v42  ;;  %v1242_v1 = vsel %vm1240_vm8, 1.0, %v3706_v42  ;;  %v1243_v35 = vsel %vm1241_vm14, 1.0, %v3706_v42 }
  0xe6   : > { %v1238_v59 = vadd.f32 %v1236_v2, %v1228_v29  ;;  %v1239_v19 = vadd.f32 %v1237_v18, %v1229_v11  ;;  %v1268_v37 = vsub.f32 %v1262_v7, %v1266_v32  ;;  %v1269_v3 = vsub.f32 %v1263_v25, %v1267_v10 }
  0xe7   : > { %v1324_v49 = vadd.f32 %v3135_v56, %v1323_v17  ;;  %v1349_v40 = vsub.f32 1.0, %v1348_v16  ;;  %vm1353_vm3 = vweird.f32 %v3159_v33  ;;  %v1358_v42 = vand.u32 2147483648, %v3121_v24 }
  0xe8   : > { %v1244_v29 = vsub.f32 %v1238_v59, %v1242_v1  ;;  %v1245_v11 = vsub.f32 %v1239_v19, %v1243_v35  ;;  %v1270_v32 = vmul.f32 3.0, %v1268_v37  ;;  %v1271_v10 = vmul.f32 3.0, %v1269_v3  ;;  %v2059_v19 = vld [vmem:[%s2574_s26 + $0x50] sm:$0xff]  ;;  %vm3224_vm13 = vmor %vm1352_vm1, %vm1353_vm3 }
  0xe9   : > { %v3783_v17 = vand.u32 2147483647, %v3048_v55  ;;  %v1350_v25 = vmul.f32 %v3159_v33, %v1349_v40  ;;  %v1356_v2 = vand.u32 2147483647, %v3121_v24  ;;  %v1313_v31 = vsel %vm3178_vm0, %v3088_v15, %v3153_v47 }
  0xea   : > { %v3786_v18 = vand.u32 2147483648, %v3048_v55  ;;  %vm3208_vm12 = vcmp.eq.f32.partialorder %v1329_v51, 8.507059e+37  ;;  %v1332_v59 = vor.u32 1.1754944e-38, %v1331_v52  ;;  %v1246_v37 = vmul.f32 8.0, %v1244_v29 }
  0xeb   : > { %vm3195_vm11 = vcmp.eq.f32.partialorder %v3783_v17, 8.507059e+37  ;;  %v3214_v3 = vsub.f32 %v3101_v46, %v1270_v32  ;;  %v1328_v40 = vsel %vm3189_vm9, %v3135_v56, %v1324_v49  ;;  %v1351_v47 = vadd.f32 %v3159_v33, %v1350_v25  ;;  %v3260_v32 = vpop.eup %2234 }
  0xec   : > { %v1317_v1 = vor.u32 1.1754944e-38, %v3786_v18  ;;  %v3791_v15 = vsub.f32 1.0, %v3031_v38  ;;  %v1247_v51 = vmul.f32 8.0, %v1245_v11  ;;  %v3235_v56 = vsub.f32 %v3103_v30, %v1271_v10 }
  0xed   : > { %v1359_v52 = vor.u32 1.1754944e-38, %v1358_v42  ;;  %v3793_v45 = vmax.f32 %v2917_v41, 0.0  ;;  %v3243_v49 = vadd.f32 1.0, %v3093_v4  ;;  %vm3245_vm1 = vcmp.eq.f32.partialorder %v1356_v2, 8.507059e+37  ;;  %v2060_v41 = vld [vmem:[%s2574_s26 + $0x58] sm:$0xff]  ;;  %v2063_v4 = vld [vmem:[%s2574_s26 + $0x70] sm:$0xff] }
  0xee   : > { %v3232_v46 = vsel %vm3054_vm4, %v3791_v15, 0.0  ;;  %v2061_v38 = vmul.f32 -1.442695, %v2059_v19  ;;  %v1318_v11 = vsel %vm3195_vm11, %v1317_v1, %v1313_v31  ;;  %v1333_v30 = vsel %vm3208_vm12, %v1332_v59, %v1328_v40 }
  0xef   : > { %3792 = vst [vmem:[#allocation25_spill] sm:$0xff] %v3232_v46  ;;  %v3240_v24 = vadd.f32 %v3115_v27, %v3793_v45  ;;  %v1355_v42 = vsel %vm3224_vm13, %v3159_v33, %v1351_v47  ;;  %vm1367_vm5 = vweird.f32 %v3156_v39  ;;  %v2064_v27 = vld [vmem:[%s2574_s26 + $0x78] sm:$0xff]  ;;  %v1248_v10 = vsub.f32 %v3126_v61, %v1246_v37 }
  0xf0   : > { %vm1274_vm6 = vcmp.lt.f32.partialorder %v3214_v3, 1.5  ;;  %v1371_v7 = vand.u32 2147483647, %v3156_v39  ;;  %v1373_v17 = vand.u32 2147483648, %v3156_v39  ;;  %v3267_v16 = vsub.f32 %v3129_v34, %v1247_v51 }
  0xf1   : > { %vm1275_vm7 = vcmp.lt.f32.partialorder %v3235_v56, 1.5  ;;  %v1360_v33 = vsel %vm3245_vm1, %v1359_v52, %v1355_v42  ;;  %v1363_v25 = vmul.f32 %v3260_v32, %v3156_v39  ;;  %2236 = vpow2.f32 %v2061_v38  ;;  %v3288_v52 = vld [vmem:[%s2856_s18 + $0x50] sm:$0xff] }
  0xf2   : > { %v2062_v2 = vmul.f32 -1.442695, %v2060_v41  ;;  %v2065_v61 = vmul.f32 -1.442695, %v2063_v4  ;;  %v2066_v31 = vmul.f32 -1.442695, %v2064_v27  ;;  %vm1368_vm8 = vweird.f32 %v3260_v32 }
  0xf3   : > { %v3796_v18 = vmov 46.625   ;;  %v1364_v35 = vsub.f32 1.0, %v1363_v25  ;;  %v1461_v34 = vmul.f32 2.0, %v1318_v11  ;;  %v1462_v59 = vmul.f32 2.0, %v1333_v30  ;;  %vm3304_vm3 = vmor %vm1367_vm5, %vm1368_vm8  ;;  %v3317_v4 = vld [vmem:[%s2856_s18 + $0x58] sm:$0xff]  ;;  %v2077_v27 = vld [vmem:[%s2856_s18 + $0x70] sm:$0xff] }
  0xf4   : > { %v1276_v1 = vsel %vm1274_vm6, 19.5, %v3796_v18  ;;  %v1277_v19 = vsel %vm1275_vm7, 19.5, %v3796_v18  ;;  %2238 = vpow2.f32 %v2062_v2  ;;  %v1467_v37 = vmul.f32 2.0, %v1360_v33  ;;  %v3368_v30 = vld [vmem:[%s2856_s18 + $0x38] sm:$0xff] }
  0xf5   : > { %v3797_v40 = vmov 40.75   ;;  %vm1280_vm14 = vcmp.lt.f32.partialorder %v3214_v3, 0.5  ;;  %v1365_v55 = vmul.f32 %v3260_v32, %v1364_v35  ;;  %2240 = vpow2.f32 %v2065_v61 }
  0xf6   : > { %v1278_v47 = vsel %vm1274_vm6, 24.75, %v3797_v40  ;;  %vm1281_vm0 = vcmp.lt.f32.partialorder %v3235_v56, 0.5  ;;  %2242 = vpow2.f32 %v2066_v31  ;;  %v2067_v15 = vadd.f32 -0.5, %v1461_v34  ;;  %v2078_v31 = vld [vmem:[%s2856_s18 + $0x78] sm:$0xff] }
  0xf7   : > { %v2068_v51 = vadd.f32 -0.5, %v1462_v59  ;;  %v3291_v45 = vmul.f32 0.6931472, %v3123_v62  ;;  %v3294_v29 = vadd.f32 1.0, %v3106_v43  ;;  %v1279_v38 = vsel %vm1275_vm7, 24.75, %v3797_v40  ;;  %v2237_v62 = vpop.eup %2236 }
  0xf8   : > { %v1366_v11 = vadd.f32 %v3260_v32, %v1365_v55  ;;  %v3310_v43 = vsel %vm1280_vm14, 14.5, %v1276_v1  ;;  %vm3312_vm9 = vcmp.eq.f32.partialorder %v1371_v7, 8.507059e+37  ;;  %v2069_v41 = vadd.f32 -0.5, %v1467_v37  ;;  %v2071_v7 = vld [vmem:[%s2856_s18 + $0x10] sm:$0xff] }
  0xf9   : > { %v1509_v33 = vmul.f32 0.5, %v3288_v52  ;;  %v3323_v39 = vsel %vm1281_vm0, 14.5, %v1277_v19  ;;  %v3327_v25 = vsel %vm1280_vm14, 11.25, %v1278_v47  ;;  %v1374_v2 = vor.u32 1.1754944e-38, %v1373_v17  ;;  %v3357_v55 = vld [vmem:[%s2856_s18 + $0x30] sm:$0xff] }
  0xfa   : > { %v3329_v61 = vadd.f32 1.0, %v2237_v62  ;;  %v2239_v18 = vpop.eup %2238  ;;  %v3335_v1 = vsel %vm1281_vm0, 11.25, %v1279_v38  ;;  %v1370_v35 = vsel %vm3304_vm3, %v3260_v32, %v1366_v11  ;;  %v3340_v34 = vadd.f32 %v2067_v15, %v1248_v10  ;;  %v2072_v32 = vld [vmem:[%s2856_s18 + $0x18] sm:$0xff] }
  0xfb   : > { %v3343_v3 = vadd.f32 %v2068_v51, %v3267_v16  ;;  %v2241_v17 = vpop.eup %2240  ;;  %v3345_v59 = vadd.f32 1.0, %v2239_v18  ;;  %v1510_v19 = vmul.f32 0.5, %v3317_v4  ;;  %v3349_v56 = vmul.f32 0.5, %v2077_v27 }
  0xfc   : > { %2244 = vrcp.f32 %v3329_v61  ;;  %v2243_v37 = vpop.eup %2242  ;;  %v3351_v40 = vadd.f32 1.0, %v2241_v17  ;;  %v3353_v47 = vadd.f32 %v2069_v41, %v1248_v10  ;;  %v3359_v15 = vsub.f32 %v2071_v7, %v1509_v33 }
  0xfd   : > { %v3361_v51 = vmul.f32 0.5, %v2078_v31  ;;  %v1375_v38 = vsel %vm3312_vm9, %v1374_v2, %v1370_v35  ;;  %v1398_v11 = vand.u32 2147483647, %v3329_v61  ;;  %2246 = vrcp.f32 %v3345_v59  ;;  %v2079_v35 = vld [vmem:[%s2574_s26 + $0xb0] sm:$0xff] }
  0xfe   : > { %v3370_v62 = vadd.f32 %v2071_v7, %v1509_v33  ;;  %v1400_v10 = vand.u32 2147483648, %v3329_v61  ;;  %v1413_v41 = vand.u32 2147483647, %v3345_v59  ;;  %v3374_v27 = vadd.f32 1.0, %v2243_v37 }
  0xff   : > { %2248 = vrcp.f32 %v3351_v40  ;;  %v1415_v42 = vand.u32 2147483648, %v3345_v59  ;;  %v3378_v2 = vsub.f32 %v2072_v32, %v1510_v19  ;;  %v3380_v31 = vadd.f32 %v2072_v32, %v1510_v19 }
 0x100   : > { %v3384_v18 = vsub.f32 %v3357_v55, %v3349_v56  ;;  %vm1394_vm11 = vweird.f32 %v3329_v61  ;;  %2250 = vrcp.f32 %v3374_v27  ;;  %v1468_v33 = vmul.f32 2.0, %v1375_v38 }
 0x101   : > { %v3390_v7 = vsub.f32 %v3368_v30, %v3361_v51  ;;  %vm3393_vm12 = vcmp.eq.f32.partialorder %v1398_v11, 8.507059e+37  ;;  %vm1409_vm13 = vweird.f32 %v3345_v59  ;;  %v1440_v19 = vand.u32 2147483647, %v3351_v40 }
 0x102   : > { %v2245_v17 = vpop.eup %2244  ;;  %v1442_v32 = vand.u32 2147483648, %v3351_v40  ;;  %v1401_v14 = vor.u32 1.1754944e-38, %v1400_v10  ;;  %vm3402_vm1 = vcmp.eq.f32.partialorder %v1413_v41, 8.507059e+37  ;;  %vm1436_vm5 = vweird.f32 %v3351_v40 }
 0x103   : > { %v1390_v38 = vmul.f32 %v2245_v17, %v3329_v61  ;;  %v2247_v11 = vpop.eup %2246  ;;  %v1416_v63 = vor.u32 1.1754944e-38, %v1415_v42  ;;  %vm1451_vm6 = vweird.f32 %v3374_v27  ;;  %v1455_v48 = vand.u32 2147483647, %v3374_v27 }
 0x104   : > { %v3409_v44 = vclamps-f32 %v2079_v35, 16.118095  ;;  %vm1395_vm7 = vweird.f32 %v2245_v17  ;;  %v1405_v10 = vmul.f32 %v2247_v11, %v3345_v59  ;;  %v3412_v41 = vclamps-f32 %v2080_v0, 16.118095 }
 0x105   : > { %v2249_v8 = vpop.eup %2248  ;;  %v1391_v26 = vsub.f32 1.0, %v1390_v38  ;;  %vm1410_vm8 = vweird.f32 %v2247_v11  ;;  %vm3416_vm14 = vcmp.eq.f32.partialorder %v1440_v19, 8.507059e+37  ;;  %v1443_v42 = vor.u32 1.1754944e-38, %v1442_v32  ;;  %vm3425_vm0 = vmor %vm1394_vm11, %vm1395_vm7 }
 0x106   : > { %3806 = vst [vmem:[#allocation26_spill] sm:$0xff] %v3409_v44  ;;  %v1432_v50 = vmul.f32 %v2249_v8, %v3351_v40  ;;  %v2251_v21 = vpop.eup %2250  ;;  %v1406_v5 = vsub.f32 1.0, %v1405_v10  ;;  %v1592_v38 = vand.u32 2147483647, %v3409_v44  ;;  %v1593_v23 = vand.u32 2147483647, %v3412_v41  ;;  %vm3438_vm9 = vmor %vm1409_vm13, %vm1410_vm8 }
 0x107   : > { %3807 = vst [vmem:[#allocation27_spill] sm:$0xff] %v3412_v41  ;;  %v1392_v35 = vmul.f32 %v2245_v17, %v1391_v26  ;;  %vm1437_vm3 = vweird.f32 %v2249_v8  ;;  %v1447_v19 = vmul.f32 %v2251_v21, %v3374_v27  ;;  %v1457_v26 = vand.u32 2147483648, %v3374_v27 }
 0x108   : > { %v1433_v12 = vsub.f32 1.0, %v1432_v50  ;;  %v1407_v60 = vmul.f32 %v2247_v11, %v1406_v5  ;;  %v3433_v10 = vclamps-f32 %v2086_v20, 16.118095  ;;  %vm1452_vm11 = vweird.f32 %v2251_v21  ;;  %vm3446_vm7 = vmor %vm1436_vm5, %vm1437_vm3 }
 0x109   : > { %v1393_v32 = vadd.f32 %v2245_v17, %v1392_v35  ;;  %v1448_v50 = vsub.f32 1.0, %v1447_v19  ;;  %v2070_v44 = vadd.f32 -0.5, %v1468_v33  ;;  %v1594_v20 = vsub.f32 0.0, %v1592_v38  ;;  %vm3457_vm13 = vmor %vm1451_vm6, %vm1452_vm11 }
 0x10a   : > { %v1434_v41 = vmul.f32 %v2249_v8, %v1433_v12  ;;  %v1408_v35 = vadd.f32 %v2247_v11, %v1407_v60  ;;  %v1595_v59 = vsub.f32 0.0, %v1593_v23  ;;  %v1629_v19 = vand.u32 2147483647, %v3430_v9 }
 0x10b   : > { %v1397_v54 = vsel %vm3425_vm0, %v2245_v17, %v1393_v32  ;;  %v1449_v12 = vmul.f32 %v2251_v21, %v1448_v50  ;;  %v1458_v40 = vor.u32 1.1754944e-38, %v1457_v26  ;;  %v1630_v23 = vand.u32 2147483647, %v3433_v10 }
 0x10c   : > { %v1402_v28 = vsel %vm3393_vm12, %v1401_v14, %v1397_v54  ;;  %v1435_v13 = vadd.f32 %v2249_v8, %v1434_v41  ;;  %v1412_v33 = vsel %vm3438_vm9, %v2247_v11, %v1408_v35  ;;  %vm1456_vm12 = vcmp.eq.f32.partialorder %v1455_v48, 8.507059e+37 }
 0x10d   : > { %v1473_v17 = vmul.f32 2.0, %v1402_v28  ;;  %v1417_v14 = vsel %vm3402_vm1, %v1416_v63, %v1412_v33  ;;  %v1450_v41 = vadd.f32 %v2251_v21, %v1449_v12  ;;  %v1596_v0 = vmul.f32 1.442695, %v1594_v20 }
 0x10e   : > { %v1439_v37 = vsel %vm3446_vm7, %v2249_v8, %v1435_v13  ;;  %v1474_v27 = vmul.f32 2.0, %v1417_v14  ;;  %v1598_v26 = vmul.f32 1.442695, %v1595_v59  ;;  %v1631_v61 = vsub.f32 0.0, %v1629_v19 }
 0x10f   : > { %v1444_v11 = vsel %vm3416_vm14, %v1443_v42, %v1439_v37  ;;  %v1475_v38 = vmul.f32 %v1473_v17, %v1473_v17  ;;  %v1454_v32 = vsel %vm3457_vm13, %v2251_v21, %v1450_v41  ;;  %v1632_v54 = vsub.f32 0.0, %v1630_v23 }
 0x110   : > { %v1479_v28 = vmul.f32 2.0, %v1444_v11  ;;  %v1459_v50 = vsel %vm1456_vm12, %v1458_v40, %v1454_v32  ;;  %v1476_v22 = vmul.f32 %v1474_v27, %v1474_v27  ;;  %v1472_v8 = vadd.f32 %v2070_v44, %v3267_v16 }
 0x111   : > { %v1477_v63 = vmul.f32 %v1475_v38, %v3310_v43  ;;  %v1480_v48 = vmul.f32 2.0, %v1459_v50  ;;  %v3474_v46 = vadd.f32 %v3357_v55, %v3349_v56  ;;  %v1520_v21 = vadd.f32 %v3368_v30, %v3361_v51 }
 0x112   : > { %v1481_v13 = vmul.f32 %v1479_v28, %v1479_v28  ;;  %v1478_v42 = vmul.f32 %v1476_v22, %v3323_v39  ;;  %2252 = vpow2.f32 %v1596_v0  ;;  %v1633_v43 = vmul.f32 1.442695, %v1631_v61 }
 0x113   : > { %v1497_v35 = vmul.f32 0.5, %v1477_v63  ;;  %v1482_v5 = vmul.f32 %v1480_v48, %v1480_v48  ;;  %2254 = vpow2.f32 %v1598_v26  ;;  %v1635_v12 = vmul.f32 1.442695, %v1632_v54 }
 0x114   : > { %v1483_v20 = vmul.f32 %v1481_v13, %v3327_v25  ;;  %v1498_v59 = vmul.f32 0.5, %v1478_v42  ;;  %2256 = vpow2.f32 %v1633_v43  ;;  %vm1198_vm1 = vcmp.lt.s32.totalorder %v3008_v6, 384 }
 0x115   : > { %v1499_v44 = vsub.f32 %v3340_v34, %v1497_v35  ;;  %v1501_v16 = vadd.f32 %v1497_v35, %v3340_v34  ;;  %v1484_v56 = vmul.f32 %v1482_v5, %v3335_v1  ;;  %2258 = vlog2.f32 %v3243_v49 }
 0x116   : > { %v1503_v55 = vmul.f32 0.5, %v1483_v20  ;;  %v1539_v39 = vmul.f32 %v1483_v20, %v1477_v63  ;;  %v1541_v19 = vmul.f32 %v3288_v52, %v1483_v20  ;;  %v1500_v51 = vsub.f32 %v3343_v3, %v1498_v59 }
 0x117   : > { %v1502_v30 = vadd.f32 %v1498_v59, %v3343_v3  ;;  %v1521_v25 = vmin.f32 %v1501_v16, %v3370_v62  ;;  %v1523_v33 = vmax.f32 %v1499_v44, %v3359_v15  ;;  %v1504_v60 = vmul.f32 0.5, %v1484_v56 }
 0x118   : > { %v1505_v40 = vsub.f32 %v3353_v47, %v1503_v55  ;;  %v1507_v34 = vadd.f32 %v1503_v55, %v3353_v47  ;;  %v2253_v17 = vpop.eup %2252  ;;  %v1524_v23 = vmax.f32 %v1500_v51, %v3378_v2  ;;  %v1540_v14 = vmul.f32 %v1484_v56, %v1478_v42 }
 0x119   : > { %v1522_v1 = vmin.f32 %v1502_v30, %v3380_v31  ;;  %v1525_v52 = vsub.f32 %v1521_v25, %v1523_v33  ;;  %v2255_v37 = vpop.eup %2254  ;;  %v1506_v41 = vsub.f32 %v1472_v8, %v1504_v60  ;;  %v1508_v3 = vadd.f32 %v1504_v60, %v1472_v8  ;;  %v2097_v33 = vld [vmem:[%s2574_s26 + $0x90] sm:$0xff] }
 0x11a   : > { %v1529_v11 = vmin.f32 %v1507_v34, %v3474_v46  ;;  %v1531_v27 = vmax.f32 %v1505_v40, %v3384_v18  ;;  %v1542_v32 = vmul.f32 %v3317_v4, %v1484_v56  ;;  %v1543_v47 = vadd.f32 %v1541_v19, %v1539_v39  ;;  %v2257_v48 = vpop.eup %2256  ;;  %v2092_v39 = vld [vmem:[%s2574_s26 + $0xf8] sm:$0xff] }
 0x11b   : > { %v1526_v38 = vsub.f32 %v1522_v1, %v1524_v23  ;;  %v1527_v0 = vmax.f32 %v1525_v52, 0.0  ;;  %v1530_v28 = vmin.f32 %v1508_v3, %v1520_v21  ;;  %v1532_v26 = vmax.f32 %v1506_v41, %v3390_v7  ;;  %v3523_v60 = vpop.eup %2258  ;;  %v3819_v1 = vld [vmem:[#allocation18_spill] sm:$0xff]  ;;  %v3820_v23 = vld [vmem:[#allocation8_spill] sm:$0xff] }
 0x11c   : > { %v1533_v61 = vsub.f32 %v1529_v11, %v1531_v27  ;;  %v1551_v50 = vmax.f32 %v1501_v16, %v3370_v62  ;;  %v1552_v63 = vmax.f32 %v1502_v30, %v3380_v31  ;;  %v1553_v54 = vmin.f32 %v1499_v44, %v3359_v15  ;;  %v2050_v27 = vld [vmem:[%s2856_s18 + $0x98] sm:$0xff] }
 0x11d   : > { %v1528_v22 = vmax.f32 %v1526_v38, 0.0  ;;  %v1554_v8 = vmin.f32 %v1500_v51, %v3378_v2  ;;  %v1534_v13 = vsub.f32 %v1530_v28, %v1532_v26  ;;  %v1559_v35 = vmax.f32 %v1507_v34, %v3474_v46  ;;  %v2098_v34 = vld [vmem:[%s2574_s26 + $0x98] sm:$0xff]  ;;  %v3823_v26 = vld [vmem:[#allocation10_spill] sm:$0xff] }
 0x11e   : > { %v1535_v42 = vmax.f32 %v1533_v61, 0.0  ;;  %v1560_v4 = vmax.f32 %v1508_v3, %v1520_v21  ;;  %v1555_v5 = vsub.f32 %v1551_v50, %v1553_v54  ;;  %v1561_v43 = vmin.f32 %v1505_v40, %v3384_v18  ;;  %v2091_v18 = vld [vmem:[%s2574_s26 + $0xf0] sm:$0xff] }
 0x11f   : > { %v1556_v20 = vsub.f32 %v1552_v63, %v1554_v8  ;;  %v1562_v62 = vmin.f32 %v1506_v41, %v3390_v7  ;;  %v1536_v31 = vmax.f32 %v1534_v13, 0.0  ;;  %v1544_v59 = vadd.f32 %v1542_v32, %v1540_v14  ;;  %v3822_v41 = vld [vmem:[#allocation24_spill] sm:$0xff] }
 0x120   : > { %v1537_v15 = vmul.f32 %v1535_v42, %v1527_v0  ;;  %v1557_v2 = vmax.f32 %v1555_v5, 0.0  ;;  %v1563_v16 = vsub.f32 %v1559_v35, %v1561_v43  ;;  %v1098_v46 = vsub.f32 %v3240_v24, %v2974_v58  ;;  %v2049_v24 = vld [vmem:[%s2856_s18 + $0x90] sm:$0xff] }
 0x121   : > { %v1558_v44 = vmax.f32 %v1556_v20, 0.0  ;;  %v1564_v56 = vsub.f32 %v1560_v4, %v1562_v62  ;;  %v1538_v21 = vmul.f32 %v1536_v31, %v1528_v22  ;;  %2260 = vpow2.f32 %v1635_v12 }
 0x122   : > { %v3506_v55 = vsub.f32 %v1543_v47, %v1537_v15  ;;  %2262 = vlog2.f32 %v3294_v29  ;;  %v1565_v49 = vmax.f32 %v1563_v16, 0.0  ;;  %v3818_v19 = vmax.f32 %v2928_v53, 0.0 }
 0x123   : > { %v1566_v7 = vmax.f32 %v1564_v56, 0.0  ;;  %vm1199_vm5 = vcmp.lt.s32.totalorder %v3011_v57, 384  ;;  %v1546_v58 = vsub.f32 %v1544_v59, %v1538_v21  ;;  %v1600_v30 = vadd.f32 1.0, %v2253_v17 }
 0x124   : > { %v3515_v51 = vadd.f32 %v3291_v45, %v3818_v19  ;;  %2264 = vrcp.f32 %v3506_v55  ;;  %v1567_v12 = vmul.f32 %v1565_v49, %v1557_v2  ;;  %v3520_v25 = vclamps-f32 %v2091_v18, 16.118095  ;;  %v3827_v2 = vld [vmem:[#allocation6_spill] sm:$0xff] }
 0x125   : > { %v1568_v29 = vmul.f32 %v1566_v7, %v1558_v44  ;;  %v1128_v53 = vmul.f32 0.6931472, %v3141_v36  ;;  %2266 = vrcp.f32 %v1546_v58  ;;  %v1601_v45 = vadd.f32 1.0, %v2255_v37 }
 0x126   : > { %v3526_v40 = vclamps-f32 %v2092_v39, 16.118095  ;;  %v3821_v52 = vsub.f32 %v3819_v1, %v3820_v23  ;;  %v1130_v17 = vmul.f32 0.6931472, %v3822_v41  ;;  %2268 = vrcp.f32 %v1567_v12  ;;  %v3831_v39 = vld [vmem:[#allocation7_spill] sm:$0xff] }
 0x127   : > { %v1637_v3 = vadd.f32 1.0, %v2257_v48  ;;  %v2261_v11 = vpop.eup %2260  ;;  %vm1290_vm6 = vcmp.eq.f32.partialorder %v2049_v24, 1.0  ;;  %2270 = vrcp.f32 %v1568_v29  ;;  %v1666_v36 = vand.u32 2147483647, %v3520_v25  ;;  %v2083_v24 = vld [vmem:[%s2856_s18 + $0xb0] sm:$0xff] }
 0x128   : > { %v3533_v14 = vadd.f32 %v1098_v46, %v3821_v52  ;;  %v3538_v37 = vclamps-f32 %v2097_v33, 16.118095  ;;  %v3540_v38 = vpop.eup %2262  ;;  %2272 = vlog2.f32 %v1600_v30  ;;  %v1638_v0 = vadd.f32 1.0, %v2261_v11  ;;  %vm3554_vm14 = vmand %vm1290_vm6, %vm1198_vm1  ;;  %v3834_v33 = vld [vmem:[#allocation16_spill] sm:$0xff]  ;;  %v3835_v52 = vld [vmem:[#allocation19_spill] sm:$0xff] }
 0x129   : > { %v1667_v32 = vand.u32 2147483647, %v3526_v40  ;;  %v3543_v47 = vclamps-f32 %v2098_v34, 16.118095  ;;  %v1099_v61 = vsub.f32 %v3515_v51, %v3823_v26  ;;  %v1569_v50 = vsub.f32 %v1567_v12, %v3506_v55  ;;  %v3833_v12 = vld [vmem:[#allocation26_spill] sm:$0xff]  ;;  %v3836_v11 = vld [vmem:[#allocation27_spill] sm:$0xff] }
 0x12a   : > { %v2265_v28 = vpop.eup %2264  ;;  %2274 = vlog2.f32 %v1601_v45  ;;  %v1668_v22 = vsub.f32 0.0, %v1666_v36  ;;  %vm1291_vm8 = vcmp.eq.f32.partialorder %v2050_v27, 1.0  ;;  %v1570_v63 = vsub.f32 %v1568_v29, %v1546_v58 }
 0x12b   : > { %2276 = vlog2.f32 %v1637_v3  ;;  %v1669_v54 = vsub.f32 0.0, %v1667_v32  ;;  %v2267_v8 = vpop.eup %2266  ;;  %v1549_v13 = vmul.f32 %v2265_v28, %v1537_v15  ;;  %v1701_v35 = vand.u32 2147483647, %v3538_v37  ;;  %vm3570_vm0 = vmand %vm1291_vm8, %vm1199_vm5 }
 0x12c   : > { %2278 = vlog2.f32 %v1638_v0  ;;  %v1670_v42 = vmul.f32 1.442695, %v1668_v22  ;;  %v2269_v4 = vpop.eup %2268  ;;  %v1550_v5 = vmul.f32 %v2267_v8, %v1538_v21  ;;  %v1702_v43 = vand.u32 2147483647, %v3543_v47  ;;  %v2084_v0 = vld [vmem:[%s2856_s18 + $0xb8] sm:$0xff] }
 0x12d   : > { %v1672_v20 = vmul.f32 1.442695, %v1669_v54  ;;  %v3826_v62 = vmov 0.0   ;;  %v2271_v59 = vpop.eup %2270  ;;  %v3828_v44 = vmax.f32 %v3827_v2, 0.0  ;;  %v1573_v56 = vmul.f32 %v2269_v4, %v1569_v50  ;;  %v2089_v54 = vld [vmem:[%s2856_s18 + $0xd0] sm:$0xff] }
 0x12e   : > { %v1721_v31 = vsel %vm3554_vm14, 1.0, %v3826_v62  ;;  %2280 = vpow2.f32 %v1670_v42  ;;  %v1703_v46 = vsub.f32 0.0, %v1701_v35  ;;  %v2273_v21 = vpop.eup %2272  ;;  %v1574_v55 = vmul.f32 %v2271_v59, %v1570_v63  ;;  %v2090_v42 = vld [vmem:[%s2856_s18 + $0xd8] sm:$0xff] }
 0x12f   : > { %v3565_v16 = vadd.f32 %v1128_v53, %v3828_v44  ;;  %2282 = vpow2.f32 %v1672_v20  ;;  %v1704_v18 = vsub.f32 0.0, %v1702_v43  ;;  %v1722_v49 = vsel %vm3570_vm0, 1.0, %v3826_v62  ;;  %v3837_v44 = vld [vmem:[#allocation23_spill] sm:$0xff] }
 0x130   : > { %v2275_v7 = vpop.eup %2274  ;;  %v3832_v19 = vmax.f32 %v3831_v39, 0.0  ;;  %v1590_v29 = vmax.f32 %v3833_v12, 0.0  ;;  %v1705_v30 = vmul.f32 1.442695, %v1703_v46  ;;  %v1723_v53 = vadd.f32 %v1721_v31, %v3834_v33  ;;  %v3838_v46 = vld [vmem:[#allocation25_spill] sm:$0xff] }
 0x131   : > { %v2277_v45 = vpop.eup %2276  ;;  %v3586_v34 = vsub.f32 %v1549_v13, %v1573_v56  ;;  %v3588_v1 = vsub.f32 %v1550_v5, %v1574_v55  ;;  %v1707_v23 = vmul.f32 1.442695, %v1704_v18  ;;  %v1724_v41 = vadd.f32 %v1722_v49, %v3835_v52  ;;  %v3842_v33 = vld [vmem:[#allocation13_spill] sm:$0xff] }
 0x132   : > { %v3581_v58 = vadd.f32 %v1130_v17, %v3832_v19  ;;  %v2279_v3 = vpop.eup %2278  ;;  %v1591_v17 = vmax.f32 %v3836_v11, 0.0  ;;  %v1603_v27 = vmul.f32 0.6931472, %v2273_v21  ;;  %v1627_v36 = vmax.f32 %v3430_v9, 0.0  ;;  %1743 = vst [vmem:[%s608_s6] sm:$0xff] %v1723_v53 }
 0x133   : > { %2284 = vpow2.f32 %v1705_v30  ;;  %v3599_v32 = vmul.f32 %v2083_v24, %v3833_v12  ;;  %v1725_v28 = vsub.f32 1.0, %v3586_v34  ;;  %v1726_v50 = vsub.f32 1.0, %v3588_v1  ;;  %1744 = vst [vmem:[%s608_s6 + $0x8] sm:$0xff] %v1724_v41  ;;  %v3839_v24 = vld [vmem:[#allocation20_spill] sm:$0xff]  ;;  %v3840_v12 = vld [vmem:[#allocation9_spill] sm:$0xff]  ;;  %v2095_v41 = vld [vmem:[%s2856_s18 + $0xf0] sm:$0xff] }
 0x134   : > { %2286 = vpow2.f32 %v1707_v23  ;;  %v2281_v22 = vpop.eup %2280  ;;  %v1605_v63 = vmul.f32 0.6931472, %v2275_v7  ;;  %v1640_v8 = vmul.f32 0.6931472, %v2277_v45  ;;  %v1628_v35 = vmax.f32 %v3433_v10, 0.0 }
 0x135   : > { %v2283_v13 = vpop.eup %2282  ;;  %v1642_v4 = vmul.f32 0.6931472, %v2279_v3  ;;  %v1674_v5 = vadd.f32 1.0, %v2281_v22  ;;  %v1727_v20 = vsel %vm3554_vm14, %v1725_v28, 0.0  ;;  %v1606_v43 = vadd.f32 %v1603_v27, %v1590_v29 }
 0x136   : > { %v1609_v62 = vmul.f32 %v2084_v0, %v3836_v11  ;;  %v1675_v31 = vadd.f32 1.0, %v2283_v13  ;;  %v1728_v59 = vsel %vm3570_vm0, %v1726_v50, 0.0  ;;  %v1645_v2 = vmul.f32 %v2089_v54, %v3430_v9 }
 0x137   : > { %2288 = vlog2.f32 %v1674_v5  ;;  %v1729_v56 = vadd.f32 %v1727_v20, %v3837_v44  ;;  %v1730_v21 = vadd.f32 %v1728_v59, %v3838_v46  ;;  %v1607_v18 = vadd.f32 %v1605_v63, %v1591_v17  ;;  %v2096_v17 = vld [vmem:[%s2856_s18 + $0xf8] sm:$0xff] }
 0x138   : > { %v1643_v49 = vadd.f32 %v1640_v8, %v1627_v36  ;;  %v1646_v7 = vmul.f32 %v2090_v42, %v3433_v10  ;;  %2290 = vlog2.f32 %v1675_v31  ;;  %v1644_v9 = vadd.f32 %v1642_v4, %v1628_v35 }
 0x139   : > { %v2285_v55 = vpop.eup %2284  ;;  %v3841_v29 = vsub.f32 %v3839_v24, %v3840_v12  ;;  %v1135_v53 = vsub.f32 %v3565_v16, %v3842_v33  ;;  %v1163_v45 = vmul.f32 0.6931472, %v3523_v60  ;;  %v1165_v10 = vmul.f32 0.6931472, %v3540_v38  ;;  %1749 = vst [vmem:[%s613_s9] sm:$0xff] %v1729_v56  ;;  %v3843_v60 = vld [vmem:[#allocation14_spill] sm:$0xff] }
 0x13a   : > { %v2287_v39 = vpop.eup %2286  ;;  %v1709_v19 = vadd.f32 1.0, %v2285_v55  ;;  %v1610_v52 = vsub.f32 %v1606_v43, %v3599_v32  ;;  %v1688_v3 = vmax.f32 %v3586_v34, 0.0  ;;  %v1647_v11 = vsub.f32 %v1643_v49, %v1645_v2  ;;  %1750 = vst [vmem:[%s613_s9 + $0x8] sm:$0xff] %v1730_v21  ;;  %v3844_v32 = vld [vmem:[#allocation11_spill] sm:$0xff]  ;;  %v3848_v2 = vld [vmem:[#allocation21_spill] sm:$0xff]  ;;  %v3849_v21 = vld [vmem:[#allocation22_spill] sm:$0xff] }
 0x13b   : > { %v1101_v30 = vadd.f32 %v1099_v61, %v3841_v29  ;;  %v1710_v23 = vadd.f32 1.0, %v2287_v39  ;;  %v1664_v51 = vmax.f32 %v3520_v25, 0.0  ;;  %v1689_v26 = vmax.f32 %v3588_v1, 0.0  ;;  %v3846_v1 = vld [vmem:[#allocation12_spill] sm:$0xff] }
 0x13c   : > { %2292 = vlog2.f32 %v1709_v19  ;;  %v1136_v16 = vsub.f32 %v3581_v58, %v3843_v60  ;;  %v1611_v38 = vsub.f32 %v1607_v18, %v1609_v62  ;;  %v1648_v27 = vsub.f32 %v1644_v9, %v1646_v7 }
 0x13d   : > { %2294 = vlog2.f32 %v1710_v23  ;;  %v2289_v61 = vpop.eup %2288  ;;  %v1665_v36 = vmax.f32 %v3526_v40, 0.0  ;;  %v1137_v34 = vadd.f32 %v1135_v53, %v3533_v14  ;;  %v3845_v28 = vmax.f32 %v3844_v32, 0.0 }
 0x13e   : > { %v2291_v0 = vpop.eup %2290  ;;  %v1677_v22 = vmul.f32 0.6931472, %v2289_v61  ;;  %v1682_v63 = vmul.f32 %v2095_v41, %v3520_v25  ;;  %v3847_v54 = vmax.f32 %v3846_v1, 0.0  ;;  %v1683_v42 = vmul.f32 %v2096_v17, %v3526_v40 }
 0x13f   : > { %v1166_v50 = vadd.f32 %v1163_v45, %v3845_v28  ;;  %v1679_v13 = vmul.f32 0.6931472, %v2291_v0  ;;  %v1690_v58 = vsel %vm3554_vm14, %v1688_v3, 0.0  ;;  %v1649_v35 = vadd.f32 %v1647_v11, %v1610_v52 }
 0x140   : > { %v1167_v8 = vadd.f32 %v1165_v10, %v3847_v54  ;;  %v1680_v4 = vadd.f32 %v1677_v22, %v1664_v51  ;;  %v1691_v14 = vsel %vm3570_vm0, %v1689_v26, 0.0  ;;  %v1699_v5 = vmax.f32 %v3538_v37, 0.0 }
 0x141   : > { %v1138_v43 = vadd.f32 %v1136_v16, %v1101_v30  ;;  %v1650_v62 = vadd.f32 %v1648_v27, %v1611_v38  ;;  %v1681_v25 = vadd.f32 %v1679_v13, %v1665_v36  ;;  %v1700_v31 = vmax.f32 %v3543_v47, 0.0 }
 0x142   : > { %v2293_v20 = vpop.eup %2292  ;;  %v1170_v44 = vsub.f32 %v1166_v50, %v3848_v2  ;;  %v1684_v40 = vsub.f32 %v1680_v4, %v1682_v63  ;;  %v1717_v46 = vmul.f32 %v3538_v37, %v1690_v58  ;;  %v1171_v55 = vsub.f32 %v1167_v8, %v3849_v21 }
 0x143   : > { %v2295_v59 = vpop.eup %2294  ;;  %v1712_v56 = vmul.f32 0.6931472, %v2293_v20  ;;  %v1685_v18 = vsub.f32 %v1681_v25, %v1683_v42  ;;  %v1718_v7 = vmul.f32 %v3543_v47, %v1691_v14  ;;  %v1182_v9 = vsel %vm3027_vm10, %v1137_v34, 0.0 }
 0x144   : > { %v1714_v49 = vmul.f32 0.6931472, %v2295_v59  ;;  %v1686_v19 = vadd.f32 %v1684_v40, %v1649_v35  ;;  %v1183_v29 = vsel %vm3054_vm4, %v1138_v43, 0.0  ;;  %v1186_v37 = vsel %vm651_vm15, %v1170_v44, 0.0 }
 0x145   : > { %v1715_v24 = vadd.f32 %v1712_v56, %v1699_v5  ;;  %v1687_v30 = vadd.f32 %v1685_v18, %v1650_v62  ;;  %v1187_v47 = vsel %vm652_vm2, %v1171_v55, 0.0 }
 0x146   : > { %v1716_v33 = vadd.f32 %v1714_v49, %v1700_v31  ;;  %v1731_v23 = vsel %vm3554_vm14, %v1686_v19, 0.0 }
 0x147   : > { %v1719_v45 = vsub.f32 %v1715_v24, %v1717_v46  ;;  %v1732_v41 = vsel %vm3570_vm0, %v1687_v30, 0.0  ;;  %v1733_v3 = vadd.f32 %v1731_v23, %v1182_v9 }
 0x148   : > { %v1720_v52 = vsub.f32 %v1716_v33, %v1718_v7  ;;  %v1734_v11 = vadd.f32 %v1732_v41, %v1183_v29 }
 0x149   : > { %v1735_v17 = vsel %vm1198_vm1, %v1719_v45, 0.0  ;;  %1755 = vst [vmem:[%s618_s12] sm:$0xff] %v1733_v3 }
 0x14a   : > { %v1736_v48 = vsel %vm1199_vm5, %v1720_v52, 0.0  ;;  %v1737_v51 = vadd.f32 %v1735_v17, %v1186_v37  ;;  %1756 = vst [vmem:[%s618_s12 + $0x8] sm:$0xff] %v1734_v11 }
 0x14b   : > { %v1738_v26 = vadd.f32 %v1736_v48, %v1187_v47 }
 0x14c   : > { %1761 = vst [vmem:[%s623_s15] sm:$0xff] %v1737_v51 }
 0x14d   : > { %1762 = vst [vmem:[%s623_s15 + $0x8] sm:$0xff] %v1738_v26 }
 0x14e PF: > { %s16_s22 = sadd.s32 1, %s2334_s22   ;;  %s3854_s18 = smov %s2322_s19 }
 0x14f   : > { %p13_p10 = scmp.ge.s32.totalorder %s16_s22, 4   ;;  %s3855_s19 = smov %s2408_s27 }
 0x150   : > { %s3856_s20 = smov %s2330_s21  ;;  %s3857_s21 = smov %s3859_s23 }
 0x151   :  { %15 = sbr.rel (!%p13_p10) target bundleno = 3 (0x3), region = 217 }

</bundles_post_ra>
